<compile_context>
chip_gen: v6e
topology: v6e:2x2x1
jax: 0.10.0
libtpu: 0.0.40
codegen_flags: <defaults>
</compile_context>

<pallas_src>
import functools

import jax
import jax.numpy as jnp
from jax.experimental import pallas as pl
from jax.experimental.pallas import tpu as pltpu

LANE = 128
SUBLANE = 8


def _round_up(x, m):
    return (x + m - 1) // m * m


def _apply_act(h, act):
    if act is None:
        return h
    if act == "softplus":
        return jax.nn.softplus(h)
    if act == "relu":
        return jnp.maximum(h, 0.0)
    if act == "sigmoid":
        return jax.nn.sigmoid(h)
    raise ValueError(f"unknown activation {act!r}")


# ----------------------------- Pallas kernel ------------------------------- #
def _fused_mlp_kernel(t_ref, x_ref, w0_ref, wrest_ref, aux_ref, o_ref, *,
                      num_layers, activation, final_activation, d_in0, d_out):
    """Whole ConcatSquash MLP for one (row-tile, batch) grid step.

    Refs:
      t_ref    : (B,) f32 in SMEM (scalar prefetch) — per-batch time
      x_ref    : (TR, Din0)      input row tile (batch dim squeezed)
      w0_ref   : (Din0, Dp) bf16 layer-0 weight, output cols zero-padded to Dp
      wrest_ref: (L-1, Dp, Dp) bf16 layers 1..L-1 weights, zero-padded both dims
                 (or a (1,8,128) placeholder when L == 1; never read then)
      aux_ref  : (L, 8, Dp) f32  rows 0..3 = bias, wg, bg, wb (zero-padded)
      o_ref    : (TR, Dout)      narrow (un-padded) output tile
    """
    b = pl.program_id(1)
    tval = t_ref[b]                                  # scalar read from SMEM

    h = x_ref[...].astype(jnp.float32)               # (TR, Din0) f32
    for l in range(num_layers):
        aux = aux_ref[l]                             # (8, Dp) f32
        if l == 0 and d_in0 <= 8:
            # Tiny-K first layer: a handful of VPU broadcast FMAs beats an
            # MXU dot that uses a K=4 sliver of the systolic array.
            w0 = w0_ref[...].astype(jnp.float32)     # (Din0, Dp)
            z = aux[0:1, :] + h[:, 0:1] * w0[0:1, :]
            for d in range(1, d_in0):
                z = z + h[:, d:d + 1] * w0[d:d + 1, :]
        else:
            w = w0_ref[...] if l == 0 else wrest_ref[l - 1]   # (K, Dp) bf16
            z = jnp.dot(h.astype(jnp.bfloat16), w,
                        preferred_element_type=jnp.float32) + aux[0:1, :]
        gate = jax.nn.sigmoid(tval * aux[1:2, :] + aux[2:3, :])
        hbias = jnp.tanh(tval * aux[3:4, :])
        h = z * gate + hbias                          # f32 elementwise
        act = activation if l < num_layers - 1 else final_activation
        h = _apply_act(h, act)

    # Only store the real output lanes (no padded-lane HBM writeback).
    o_ref[...] = h[:, :d_out].astype(o_ref.dtype)


# ------------------------------ Wrapper call -------------------------------- #
def _choose_row_tile(M):
    """Largest tile from {1024,512,256} with <=15% pad-row waste, else one tile."""
    for cand in (1024, 512, 256):
        if M >= cand:
            m_pad = _round_up(M, cand)
            if (m_pad - M) <= 0.15 * m_pad:
                return cand, m_pad
    tr = _round_up(M, SUBLANE)
    return tr, tr


def mlp_concat_squash_forward(t, x4d, packed, dims, activation, final_activation):
    """t: (B,), x4d: (B, S1, S2, Din). Returns (B, S1, S2, Dout)."""
    B, S1, S2, Din = x4d.shape
    assert Din == dims[0][0], "input channel dim mismatch"
    L = len(dims)
    Dout = dims[-1][1]
    Dp = packed["Dp"]
    M = S1 * S2

    TR, M_pad = _choose_row_tile(M)

    x = x4d.reshape(B, M, Din)
    if M_pad != M:
        x = jnp.pad(x, ((0, 0), (0, M_pad - M), (0, 0)))

    out_dtype = x4d.dtype
    W0, W_rest, aux = packed["W0"], packed["W_rest"], packed["aux"]

    kernel = functools.partial(
        _fused_mlp_kernel,
        num_layers=L,
        activation=activation,
        final_activation=final_activation,
        d_in0=Din,
        d_out=Dout,
    )

    grid = (M_pad // TR, B)   # row tiles first so they can carry the core split

    # VMEM budget (upper bound: constants double-buffered, f32 intermediates).
    x_item = jnp.dtype(x.dtype).itemsize
    o_item = jnp.dtype(out_dtype).itemsize
    needed = (2 * TR * Din * x_item          # x tile, double-buffered
              + 2 * TR * Dout * o_item       # out tile, double-buffered
              + 2 * W0.size * W0.dtype.itemsize
              + 2 * W_rest.size * W_rest.dtype.itemsize
              + 2 * aux.size * aux.dtype.itemsize
              + 6 * TR * Dp * 4)             # in-kernel f32 intermediates headroom
    vmem_limit = int(min(128 * 2**20, max(32 * 2**20, 2 * needed)))

    def build_call(single_buffer_consts):
        const_kw = {}
        if single_buffer_consts and hasattr(pl, "Buffered"):
            const_kw = dict(pipeline_mode=pl.Buffered(1))
        in_specs = [
            # x: batch dim squeezed, rows tiled, narrow Din kept full
            pl.BlockSpec((None, TR, Din), lambda r, b, t_s: (b, r, 0)),
            # grid-constant weight / aux blocks (fetched once)
            pl.BlockSpec(W0.shape, lambda r, b, t_s: (0, 0), **const_kw),
            pl.BlockSpec(W_rest.shape, lambda r, b, t_s: (0, 0, 0), **const_kw),
            pl.BlockSpec(aux.shape, lambda r, b, t_s: (0, 0, 0), **const_kw),
        ]
        out_spec = pl.BlockSpec((None, TR, Dout), lambda r, b, t_s: (b, r, 0))
        return pl.pallas_call(
            kernel,
            out_shape=jax.ShapeDtypeStruct((B, M_pad, Dout), out_dtype),
            grid_spec=pltpu.PrefetchScalarGridSpec(
                num_scalar_prefetch=1,           # t -> SMEM
                grid=grid,
                in_specs=in_specs,
                out_specs=out_spec,
            ),
            compiler_params=pltpu.CompilerParams(
                dimension_semantics=("parallel", "parallel"),
                vmem_limit_bytes=vmem_limit),
        )

    t32 = t.astype(jnp.float32)
    try:
        out = build_call(True)(t32, x, W0, W_rest, aux)
    except Exception:
        # Fallback: default (double) buffering if Buffered(1) is rejected.
        out = build_call(False)(t32, x, W0, W_rest, aux)

    return out[:, :M, :].reshape(B, S1, S2, Dout)


# ------------------------- Parameter initialization ------------------------ #
def init_layer_params(key, dim_in, dim_out):
    """Matches nn.Linear default init U(-1/sqrt(fan_in), +1/sqrt(fan_in))."""
    k1, k2, k3, k4, k5 = jax.random.split(key, 5)
    k_lin = 1.0 / jnp.sqrt(jnp.float32(dim_in))
    return {
        # _layer: weight stored transposed as (dim_in, dim_out)
        "W": jax.random.uniform(k1, (dim_in, dim_out), jnp.float32, -k_lin, k_lin),
        "b": jax.random.uniform(k2, (dim_out,), jnp.float32, -k_lin, k_lin),
        # _hyper_gate: Linear(1, dim_out) with bias  (fan_in = 1)
        "wg": jax.random.uniform(k3, (dim_out,), jnp.float32, -1.0, 1.0),
        "bg": jax.random.uniform(k4, (dim_out,), jnp.float32, -1.0, 1.0),
        # _hyper_bias: Linear(1, dim_out), no bias
        "wb": jax.random.uniform(k5, (dim_out,), jnp.float32, -1.0, 1.0),
    }


def pack_params(layer_params, dims):
    """Zero-pad + stack per-layer params into the kernel's fused layout."""
    L = len(dims)
    Dp = _round_up(max(max(d) for d in dims), LANE)
    din0, dout0 = dims[0]

    # Layer-0 weight: (din0, Dp), output cols zero-padded; bf16 for the MXU.
    W0 = jnp.zeros((din0, Dp), jnp.float32).at[:, :dout0].set(layer_params[0]["W"])
    W0 = W0.astype(jnp.bfloat16)

    if L > 1:
        # Layers 1..L-1: (L-1, Dp, Dp), zero-padded rows and cols (zero rows
        # keep padded lanes of the previous activation from leaking in).
        W_rest = jnp.zeros((L - 1, Dp, Dp), jnp.float32)
        for l in range(1, L):
            din, dout = dims[l]
            W_rest = W_rest.at[l - 1, :din, :dout].set(layer_params[l]["W"])
        W_rest = W_rest.astype(jnp.bfloat16)
    else:
        # Tiny placeholder (never read in-kernel): avoids a pointless Dp^2 DMA.
        W_rest = jnp.zeros((1, SUBLANE, LANE), jnp.bfloat16)

    # aux: (L, 8, Dp) f32 — row 0 = bias, 1 = wg, 2 = bg, 3 = wb, rest zero.
    aux = jnp.zeros((L, SUBLANE, Dp), jnp.float32)
    for l in range(L):
        dout = dims[l][1]
        p = layer_params[l]
        aux = aux.at[l, 0, :dout].set(p["b"])
        aux = aux.at[l, 1, :dout].set(p["wg"])
        aux = aux.at[l, 2, :dout].set(p["bg"])
        aux = aux.at[l, 3, :dout].set(p["wb"])

    return {"W0": W0, "W_rest": W_rest, "aux": aux, "Dp": Dp}


# --------------------------------- Model ----------------------------------- #
class MLPConcatSquashTrainable:
    def __init__(self, dims, nonlinearity="softplus", final_activation=None,
                 extra_dim=True, key=None):
        # extra_dim has no effect on the forward math (both PyTorch branches
        # are identical); kept for signature parity.
        self.dims = [tuple(d) for d in dims]
        self.num_layers = len(dims)
        self.nonlinearity = nonlinearity
        self.final_activation = final_activation
        self.extra_dim = extra_dim
        key = jax.random.PRNGKey(0) if key is None else key
        keys = jax.random.split(key, self.num_layers)
        self.layer_params = [
            init_layer_params(keys[i], *self.dims[i]) for i in range(self.num_layers)
        ]
        self.packed = pack_params(self.layer_params, self.dims)

    def __call__(self, t, x):
        """t: (B,), x: (B, S1, S2, D_in) channel-last -> (B, S1, S2, D_out)."""
        return mlp_concat_squash_forward(
            t, x, self.packed, self.dims, self.nonlinearity, self.final_activation)


# ------------------------------ Pure-JAX ref -------------------------------- #
def reference_forward(model, t, x):
    B, S1, S2, Din = x.shape
    h = x.reshape(B, S1 * S2, Din).astype(jnp.float32)
    tcol = t.reshape(B, 1, 1).astype(jnp.float32)
    for i, p in enumerate(model.layer_params):
        lin = jnp.einsum("bmd,de->bme", h, p["W"]) + p["b"][None, None, :]
        gate = jax.nn.sigmoid(tcol * p["wg"][None, None, :] + p["bg"][None, None, :])
        hb = jnp.tanh(tcol * p["wb"][None, None, :])
        h = lin * gate + hb
        act = model.nonlinearity if i < model.num_layers - 1 else model.final_activation
        h = _apply_act(h, act)
    return h.reshape(B, S1, S2, model.dims[-1][1])


# ---------------------------------- Main ------------------------------------ #
if __name__ == "__main__":
    key = jax.random.PRNGKey(0)
    kx, kt, kp = jax.random.split(key, 3)

    B, S1, S2 = 2, 16, 8
    dims = [(4, 32), (32, 32), (32, 4)]

    x = jax.random.normal(kx, (B, S1, S2, dims[0][0]), jnp.float32)
    t = jax.random.uniform(kt, (B,), jnp.float32)

    model = MLPConcatSquashTrainable(dims, nonlinearity="softplus",
                                     final_activation=None, key=kp)

    out = jax.block_until_ready(model(t, x))

    ref = reference_forward(model, t, x)
    assert out.shape == (B, S1, S2, dims[-1][1])
    max_err = float(jnp.max(jnp.abs(out.astype(jnp.float32) - ref)))
    # bf16 matmul weights -> slightly looser tolerance than the f32 reference.
    assert jnp.allclose(out.astype(jnp.float32), ref, rtol=5e-2, atol=5e-2), (
        f"mismatch vs reference, max abs err = {max_err}")

    print("KERNEL_OK")
</pallas_src>

<mosaic_0001>
module attributes {stable_mosaic.version = 11 : i64} {
  func.func @_fused_mlp_kernel(%arg0: i32, %arg1: i32, %arg2: memref<2xf32, #tpu.memory_space<smem>>, %arg3: memref<1x128x4xf32, #tpu.memory_space<vmem>>, %arg4: memref<4x128xbf16, #tpu.memory_space<vmem>>, %arg5: memref<2x128x128xbf16, #tpu.memory_space<vmem>>, %arg6: memref<3x8x128xf32, #tpu.memory_space<vmem>>, %arg7: memref<1x128x4xf32, #tpu.memory_space<vmem>>) attributes {dimension_semantics = [#tpu.dimension_semantics<parallel>, #tpu.dimension_semantics<parallel>], iteration_bounds = array<i64: 1, 2>, scalar_prefetch = 1 : i64, scratch_operands = 0 : i64, tpu.core_type = #tpu.core_type<tc>, window_params = [{transform_indices = @transform_0, window_bounds = array<i64: 1, 128, 4>}, {pipeline_mode = #tpu.pipeline_mode<synchronous>, transform_indices = @transform_1, window_bounds = array<i64: 4, 128>}, {pipeline_mode = #tpu.pipeline_mode<synchronous>, transform_indices = @transform_2, window_bounds = array<i64: 2, 128, 128>}, {pipeline_mode = #tpu.pipeline_mode<synchronous>, transform_indices = @transform_3, window_bounds = array<i64: 3, 8, 128>}, {transform_indices = @transform_4, window_bounds = array<i64: 1, 128, 4>}]} {
    %0 = arith.index_cast %arg1 : i32 to index
    %1 = memref.load %arg2[%0] : memref<2xf32, #tpu.memory_space<smem>>
    %c0 = arith.constant 0 : index
    %c0_0 = arith.constant 0 : index
    %c0_1 = arith.constant 0 : index
    %2 = vector.load %arg3[%c0, %c0_0, %c0_1] : memref<1x128x4xf32, #tpu.memory_space<vmem>>, vector<1x128x4xf32>
    %3 = vector.shape_cast %2 : vector<1x128x4xf32> to vector<128x4xf32>
    %c0_2 = arith.constant 0 : index
    %c0_3 = arith.constant 0 : index
    %c0_4 = arith.constant 0 : index
    %4 = vector.load %arg6[%c0_2, %c0_3, %c0_4] : memref<3x8x128xf32, #tpu.memory_space<vmem>>, vector<1x8x128xf32>
    %5 = vector.shape_cast %4 : vector<1x8x128xf32> to vector<8x128xf32>
    %c0_5 = arith.constant 0 : index
    %c0_6 = arith.constant 0 : index
    %6 = vector.load %arg4[%c0_5, %c0_6] : memref<4x128xbf16, #tpu.memory_space<vmem>>, vector<4x128xbf16>
    %7 = arith.extf %6 : vector<4x128xbf16> to vector<4x128xf32>
    %8 = vector.extract_strided_slice %5 {offsets = [0, 0], sizes = [1, 128], strides = [1, 1]} : vector<8x128xf32> to vector<1x128xf32>
    %9 = vector.extract_strided_slice %3 {offsets = [0, 0], sizes = [128, 1], strides = [1, 1]} : vector<128x4xf32> to vector<128x1xf32>
    %10 = vector.extract_strided_slice %7 {offsets = [0, 0], sizes = [1, 128], strides = [1, 1]} : vector<4x128xf32> to vector<1x128xf32>
    %11 = vector.broadcast %9 : vector<128x1xf32> to vector<128x128xf32>
    %12 = vector.broadcast %10 : vector<1x128xf32> to vector<128x128xf32>
    %13 = arith.mulf %11, %12 : vector<128x128xf32>
    %14 = vector.broadcast %8 : vector<1x128xf32> to vector<128x128xf32>
    %15 = arith.addf %14, %13 : vector<128x128xf32>
    %16 = vector.extract_strided_slice %3 {offsets = [0, 1], sizes = [128, 1], strides = [1, 1]} : vector<128x4xf32> to vector<128x1xf32>
    %17 = vector.extract_strided_slice %7 {offsets = [1, 0], sizes = [1, 128], strides = [1, 1]} : vector<4x128xf32> to vector<1x128xf32>
    %18 = vector.broadcast %16 : vector<128x1xf32> to vector<128x128xf32>
    %19 = vector.broadcast %17 : vector<1x128xf32> to vector<128x128xf32>
    %20 = arith.mulf %18, %19 : vector<128x128xf32>
    %21 = arith.addf %15, %20 : vector<128x128xf32>
    %22 = vector.extract_strided_slice %3 {offsets = [0, 2], sizes = [128, 1], strides = [1, 1]} : vector<128x4xf32> to vector<128x1xf32>
    %23 = vector.extract_strided_slice %7 {offsets = [2, 0], sizes = [1, 128], strides = [1, 1]} : vector<4x128xf32> to vector<1x128xf32>
    %24 = vector.broadcast %22 : vector<128x1xf32> to vector<128x128xf32>
    %25 = vector.broadcast %23 : vector<1x128xf32> to vector<128x128xf32>
    %26 = arith.mulf %24, %25 : vector<128x128xf32>
    %27 = arith.addf %21, %26 : vector<128x128xf32>
    %28 = vector.extract_strided_slice %3 {offsets = [0, 3], sizes = [128, 1], strides = [1, 1]} : vector<128x4xf32> to vector<128x1xf32>
    %29 = vector.extract_strided_slice %7 {offsets = [3, 0], sizes = [1, 128], strides = [1, 1]} : vector<4x128xf32> to vector<1x128xf32>
    %30 = vector.broadcast %28 : vector<128x1xf32> to vector<128x128xf32>
    %31 = vector.broadcast %29 : vector<1x128xf32> to vector<128x128xf32>
    %32 = arith.mulf %30, %31 : vector<128x128xf32>
    %33 = arith.addf %27, %32 : vector<128x128xf32>
    %34 = vector.extract_strided_slice %5 {offsets = [1, 0], sizes = [1, 128], strides = [1, 1]} : vector<8x128xf32> to vector<1x128xf32>
    %35 = vector.broadcast %1 : f32 to vector<1x128xf32>
    %36 = arith.mulf %35, %34 : vector<1x128xf32>
    %37 = vector.extract_strided_slice %5 {offsets = [2, 0], sizes = [1, 128], strides = [1, 1]} : vector<8x128xf32> to vector<1x128xf32>
    %38 = arith.addf %36, %37 : vector<1x128xf32>
    %39 = arith.negf %38 : vector<1x128xf32>
    %40 = math.exp %39 : vector<1x128xf32>
    %cst = arith.constant 1.000000e+00 : f32
    %41 = vector.broadcast %cst : f32 to vector<1x128xf32>
    %42 = arith.addf %41, %40 : vector<1x128xf32>
    %43 = arith.divf %41, %42 : vector<1x128xf32>
    %44 = vector.extract_strided_slice %5 {offsets = [3, 0], sizes = [1, 128], strides = [1, 1]} : vector<8x128xf32> to vector<1x128xf32>
    %45 = vector.broadcast %1 : f32 to vector<1x128xf32>
    %46 = arith.mulf %45, %44 : vector<1x128xf32>
    %47 = math.tanh %46 : vector<1x128xf32>
    %48 = vector.broadcast %43 : vector<1x128xf32> to vector<128x128xf32>
    %49 = arith.mulf %33, %48 : vector<128x128xf32>
    %50 = vector.broadcast %47 : vector<1x128xf32> to vector<128x128xf32>
    %51 = arith.addf %49, %50 : vector<128x128xf32>
    %cst_7 = arith.constant 0.000000e+00 : f32
    %52 = vector.broadcast %cst_7 : f32 to vector<128x128xf32>
    %53 = arith.maximumf %51, %52 : vector<128x128xf32>
    %54 = vector.broadcast %cst_7 : f32 to vector<128x128xf32>
    %55 = arith.subf %51, %54 : vector<128x128xf32>
    %56 = arith.cmpf one, %55, %55 : vector<128x128xf32>
    %57 = vector.broadcast %cst_7 : f32 to vector<128x128xf32>
    %58 = arith.addf %51, %57 : vector<128x128xf32>
    %59 = math.absf %55 : vector<128x128xf32>
    %cst_8 = arith.constant 0.000000e+00 : f32
    %60 = vector.broadcast %cst_8 : f32 to vector<128x128xf32>
    %61 = arith.subf %60, %59 : vector<128x128xf32>
    %62 = math.exp %61 : vector<128x128xf32>
    %63 = math.log1p %62 : vector<128x128xf32>
    %64 = arith.addf %53, %63 : vector<128x128xf32>
    %65 = arith.select %56, %58, %64 : vector<128x128xi1>, vector<128x128xf32>
    %c1 = arith.constant 1 : index
    %c0_9 = arith.constant 0 : index
    %c0_10 = arith.constant 0 : index
    %66 = vector.load %arg6[%c1, %c0_9, %c0_10] : memref<3x8x128xf32, #tpu.memory_space<vmem>>, vector<1x8x128xf32>
    %67 = vector.shape_cast %66 : vector<1x8x128xf32> to vector<8x128xf32>
    %c0_11 = arith.constant 0 : index
    %c0_12 = arith.constant 0 : index
    %c0_13 = arith.constant 0 : index
    %68 = vector.load %arg5[%c0_11, %c0_12, %c0_13] : memref<2x128x128xbf16, #tpu.memory_space<vmem>>, vector<1x128x128xbf16>
    %69 = vector.shape_cast %68 : vector<1x128x128xbf16> to vector<128x128xbf16>
    %70 = arith.truncf %65 : vector<128x128xf32> to vector<128x128xbf16>
    %cst_14 = arith.constant dense<0.000000e+00> : vector<128x128xf32>
    %71 = tpu.matmul %70, %69, %cst_14 {dimension_numbers = #tpu.dot_dimension_numbers<[1], [0], [0], [1], [0, 0, 1, 1], [], []>} : vector<128x128xbf16>, vector<128x128xbf16>, vector<128x128xf32> -> vector<128x128xf32>
    %72 = vector.extract_strided_slice %67 {offsets = [0, 0], sizes = [1, 128], strides = [1, 1]} : vector<8x128xf32> to vector<1x128xf32>
    %73 = vector.broadcast %72 : vector<1x128xf32> to vector<128x128xf32>
    %74 = arith.addf %71, %73 : vector<128x128xf32>
    %75 = vector.extract_strided_slice %67 {offsets = [1, 0], sizes = [1, 128], strides = [1, 1]} : vector<8x128xf32> to vector<1x128xf32>
    %76 = vector.broadcast %1 : f32 to vector<1x128xf32>
    %77 = arith.mulf %76, %75 : vector<1x128xf32>
    %78 = vector.extract_strided_slice %67 {offsets = [2, 0], sizes = [1, 128], strides = [1, 1]} : vector<8x128xf32> to vector<1x128xf32>
    %79 = arith.addf %77, %78 : vector<1x128xf32>
    %80 = arith.negf %79 : vector<1x128xf32>
    %81 = math.exp %80 : vector<1x128xf32>
    %cst_15 = arith.constant 1.000000e+00 : f32
    %82 = vector.broadcast %cst_15 : f32 to vector<1x128xf32>
    %83 = arith.addf %82, %81 : vector<1x128xf32>
    %84 = arith.divf %82, %83 : vector<1x128xf32>
    %85 = vector.extract_strided_slice %67 {offsets = [3, 0], sizes = [1, 128], strides = [1, 1]} : vector<8x128xf32> to vector<1x128xf32>
    %86 = vector.broadcast %1 : f32 to vector<1x128xf32>
    %87 = arith.mulf %86, %85 : vector<1x128xf32>
    %88 = math.tanh %87 : vector<1x128xf32>
    %89 = vector.broadcast %84 : vector<1x128xf32> to vector<128x128xf32>
    %90 = arith.mulf %74, %89 : vector<128x128xf32>
    %91 = vector.broadcast %88 : vector<1x128xf32> to vector<128x128xf32>
    %92 = arith.addf %90, %91 : vector<128x128xf32>
    %cst_16 = arith.constant 0.000000e+00 : f32
    %93 = vector.broadcast %cst_16 : f32 to vector<128x128xf32>
    %94 = arith.maximumf %92, %93 : vector<128x128xf32>
    %95 = vector.broadcast %cst_16 : f32 to vector<128x128xf32>
    %96 = arith.subf %92, %95 : vector<128x128xf32>
    %97 = arith.cmpf one, %96, %96 : vector<128x128xf32>
    %98 = vector.broadcast %cst_16 : f32 to vector<128x128xf32>
    %99 = arith.addf %92, %98 : vector<128x128xf32>
    %100 = math.absf %96 : vector<128x128xf32>
    %cst_17 = arith.constant 0.000000e+00 : f32
    %101 = vector.broadcast %cst_17 : f32 to vector<128x128xf32>
    %102 = arith.subf %101, %100 : vector<128x128xf32>
    %103 = math.exp %102 : vector<128x128xf32>
    %104 = math.log1p %103 : vector<128x128xf32>
    %105 = arith.addf %94, %104 : vector<128x128xf32>
    %106 = arith.select %97, %99, %105 : vector<128x128xi1>, vector<128x128xf32>
    %c2 = arith.constant 2 : index
    %c0_18 = arith.constant 0 : index
    %c0_19 = arith.constant 0 : index
    %107 = vector.load %arg6[%c2, %c0_18, %c0_19] : memref<3x8x128xf32, #tpu.memory_space<vmem>>, vector<1x8x128xf32>
    %108 = vector.shape_cast %107 : vector<1x8x128xf32> to vector<8x128xf32>
    %c1_20 = arith.constant 1 : index
    %c0_21 = arith.constant 0 : index
    %c0_22 = arith.constant 0 : index
    %109 = vector.load %arg5[%c1_20, %c0_21, %c0_22] : memref<2x128x128xbf16, #tpu.memory_space<vmem>>, vector<1x128x128xbf16>
    %110 = vector.shape_cast %109 : vector<1x128x128xbf16> to vector<128x128xbf16>
    %111 = arith.truncf %106 : vector<128x128xf32> to vector<128x128xbf16>
    %cst_23 = arith.constant dense<0.000000e+00> : vector<128x128xf32>
    %112 = tpu.matmul %111, %110, %cst_23 {dimension_numbers = #tpu.dot_dimension_numbers<[1], [0], [0], [1], [0, 0, 1, 1], [], []>} : vector<128x128xbf16>, vector<128x128xbf16>, vector<128x128xf32> -> vector<128x128xf32>
    %113 = vector.extract_strided_slice %108 {offsets = [0, 0], sizes = [1, 128], strides = [1, 1]} : vector<8x128xf32> to vector<1x128xf32>
    %114 = vector.broadcast %113 : vector<1x128xf32> to vector<128x128xf32>
    %115 = arith.addf %112, %114 : vector<128x128xf32>
    %116 = vector.extract_strided_slice %108 {offsets = [1, 0], sizes = [1, 128], strides = [1, 1]} : vector<8x128xf32> to vector<1x128xf32>
    %117 = vector.broadcast %1 : f32 to vector<1x128xf32>
    %118 = arith.mulf %117, %116 : vector<1x128xf32>
    %119 = vector.extract_strided_slice %108 {offsets = [2, 0], sizes = [1, 128], strides = [1, 1]} : vector<8x128xf32> to vector<1x128xf32>
    %120 = arith.addf %118, %119 : vector<1x128xf32>
    %121 = arith.negf %120 : vector<1x128xf32>
    %122 = math.exp %121 : vector<1x128xf32>
    %cst_24 = arith.constant 1.000000e+00 : f32
    %123 = vector.broadcast %cst_24 : f32 to vector<1x128xf32>
    %124 = arith.addf %123, %122 : vector<1x128xf32>
    %125 = arith.divf %123, %124 : vector<1x128xf32>
    %126 = vector.extract_strided_slice %108 {offsets = [3, 0], sizes = [1, 128], strides = [1, 1]} : vector<8x128xf32> to vector<1x128xf32>
    %127 = vector.broadcast %1 : f32 to vector<1x128xf32>
    %128 = arith.mulf %127, %126 : vector<1x128xf32>
    %129 = math.tanh %128 : vector<1x128xf32>
    %130 = vector.broadcast %125 : vector<1x128xf32> to vector<128x128xf32>
    %131 = arith.mulf %115, %130 : vector<128x128xf32>
    %132 = vector.broadcast %129 : vector<1x128xf32> to vector<128x128xf32>
    %133 = arith.addf %131, %132 : vector<128x128xf32>
    %134 = vector.extract_strided_slice %133 {offsets = [0, 0], sizes = [128, 4], strides = [1, 1]} : vector<128x128xf32> to vector<128x4xf32>
    %c0_25 = arith.constant 0 : index
    %c0_26 = arith.constant 0 : index
    %c0_27 = arith.constant 0 : index
    %135 = vector.load %arg7[%c0_25, %c0_26, %c0_27] : memref<1x128x4xf32, #tpu.memory_space<vmem>>, vector<1x128x4xf32>
    %136 = vector.shape_cast %135 : vector<1x128x4xf32> to vector<128x4xf32>
    %137 = vector.shape_cast %134 : vector<128x4xf32> to vector<1x128x4xf32>
    tpu.vector_store %arg7[%c0_25, %c0_26, %c0_27], %137 {strides = array<i32>} : memref<1x128x4xf32, #tpu.memory_space<vmem>>, vector<1x128x4xf32>,
    return
  }
  func.func @transform_0(%arg0: i32, %arg1: i32, %arg2: memref<2xf32, #tpu.memory_space<smem>>) -> (i32, i32, i32) {
    %c0_i32 = arith.constant 0 : i32
    %c0_i32_0 = arith.constant 0 : i32
    return %arg1, %arg0, %c0_i32 : i32, i32, i32
  }
  func.func @transform_1(%arg0: i32, %arg1: i32, %arg2: memref<2xf32, #tpu.memory_space<smem>>) -> (i32, i32) {
    %c0_i32 = arith.constant 0 : i32
    %c0_i32_0 = arith.constant 0 : i32
    %c0_i32_1 = arith.constant 0 : i32
    return %c0_i32, %c0_i32_0 : i32, i32
  }
  func.func @transform_2(%arg0: i32, %arg1: i32, %arg2: memref<2xf32, #tpu.memory_space<smem>>) -> (i32, i32, i32) {
    %c0_i32 = arith.constant 0 : i32
    %c0_i32_0 = arith.constant 0 : i32
    %c0_i32_1 = arith.constant 0 : i32
    %c0_i32_2 = arith.constant 0 : i32
    return %c0_i32, %c0_i32_0, %c0_i32_1 : i32, i32, i32
  }
  func.func @transform_3(%arg0: i32, %arg1: i32, %arg2: memref<2xf32, #tpu.memory_space<smem>>) -> (i32, i32, i32) {
    %c0_i32 = arith.constant 0 : i32
    %c0_i32_0 = arith.constant 0 : i32
    %c0_i32_1 = arith.constant 0 : i32
    %c0_i32_2 = arith.constant 0 : i32
    return %c0_i32, %c0_i32_0, %c0_i32_1 : i32, i32, i32
  }
  func.func @transform_4(%arg0: i32, %arg1: i32, %arg2: memref<2xf32, #tpu.memory_space<smem>>) -> (i32, i32, i32) {
    %c0_i32 = arith.constant 0 : i32
    %c0_i32_0 = arith.constant 0 : i32
    return %arg1, %arg0, %c0_i32 : i32, i32, i32
  }
}

module attributes {stable_mosaic.version = 11 : i64} {
  func.func @_fused_mlp_kernel(%arg0: i32, %arg1: i32, %arg2: memref<2xf32, #tpu.memory_space<smem>>, %arg3: memref<1x128x4xf32, #tpu.memory_space<vmem>>, %arg4: memref<4x128xbf16, #tpu.memory_space<vmem>>, %arg5: memref<2x128x128xbf16, #tpu.memory_space<vmem>>, %arg6: memref<3x8x128xf32, #tpu.memory_space<vmem>>, %arg7: memref<1x128x4xf32, #tpu.memory_space<vmem>>) attributes {dimension_semantics = [#tpu.dimension_semantics<parallel>, #tpu.dimension_semantics<parallel>], iteration_bounds = array<i64: 1, 2>, scalar_prefetch = 1 : i64, scratch_operands = 0 : i64, tpu.core_type = #tpu.core_type<tc>, window_params = [{transform_indices = @transform_0, window_bounds = array<i64: 1, 128, 4>}, {pipeline_mode = #tpu.pipeline_mode<synchronous>, transform_indices = @transform_1, window_bounds = array<i64: 4, 128>}, {pipeline_mode = #tpu.pipeline_mode<synchronous>, transform_indices = @transform_2, window_bounds = array<i64: 2, 128, 128>}, {pipeline_mode = #tpu.pipeline_mode<synchronous>, transform_indices = @transform_3, window_bounds = array<i64: 3, 8, 128>}, {transform_indices = @transform_4, window_bounds = array<i64: 1, 128, 4>}]} {
    %0 = arith.index_cast %arg1 : i32 to index
    %1 = memref.load %arg2[%0] : memref<2xf32, #tpu.memory_space<smem>>
    %c0 = arith.constant 0 : index
    %c0_0 = arith.constant 0 : index
    %c0_1 = arith.constant 0 : index
    %2 = vector.load %arg3[%c0, %c0_0, %c0_1] : memref<1x128x4xf32, #tpu.memory_space<vmem>>, vector<1x128x4xf32>
    %3 = vector.shape_cast %2 : vector<1x128x4xf32> to vector<128x4xf32>
    %c0_2 = arith.constant 0 : index
    %c0_3 = arith.constant 0 : index
    %c0_4 = arith.constant 0 : index
    %4 = vector.load %arg6[%c0_2, %c0_3, %c0_4] : memref<3x8x128xf32, #tpu.memory_space<vmem>>, vector<1x8x128xf32>
    %5 = vector.shape_cast %4 : vector<1x8x128xf32> to vector<8x128xf32>
    %c0_5 = arith.constant 0 : index
    %c0_6 = arith.constant 0 : index
    %6 = vector.load %arg4[%c0_5, %c0_6] : memref<4x128xbf16, #tpu.memory_space<vmem>>, vector<4x128xbf16>
    %7 = arith.extf %6 : vector<4x128xbf16> to vector<4x128xf32>
    %8 = vector.extract_strided_slice %5 {offsets = [0, 0], sizes = [1, 128], strides = [1, 1]} : vector<8x128xf32> to vector<1x128xf32>
    %9 = vector.extract_strided_slice %3 {offsets = [0, 0], sizes = [128, 1], strides = [1, 1]} : vector<128x4xf32> to vector<128x1xf32>
    %10 = vector.extract_strided_slice %7 {offsets = [0, 0], sizes = [1, 128], strides = [1, 1]} : vector<4x128xf32> to vector<1x128xf32>
    %11 = vector.broadcast %9 : vector<128x1xf32> to vector<128x128xf32>
    %12 = vector.broadcast %10 : vector<1x128xf32> to vector<128x128xf32>
    %13 = arith.mulf %11, %12 : vector<128x128xf32>
    %14 = vector.broadcast %8 : vector<1x128xf32> to vector<128x128xf32>
    %15 = arith.addf %14, %13 : vector<128x128xf32>
    %16 = vector.extract_strided_slice %3 {offsets = [0, 1], sizes = [128, 1], strides = [1, 1]} : vector<128x4xf32> to vector<128x1xf32>
    %17 = vector.extract_strided_slice %7 {offsets = [1, 0], sizes = [1, 128], strides = [1, 1]} : vector<4x128xf32> to vector<1x128xf32>
    %18 = vector.broadcast %16 : vector<128x1xf32> to vector<128x128xf32>
    %19 = vector.broadcast %17 : vector<1x128xf32> to vector<128x128xf32>
    %20 = arith.mulf %18, %19 : vector<128x128xf32>
    %21 = arith.addf %15, %20 : vector<128x128xf32>
    %22 = vector.extract_strided_slice %3 {offsets = [0, 2], sizes = [128, 1], strides = [1, 1]} : vector<128x4xf32> to vector<128x1xf32>
    %23 = vector.extract_strided_slice %7 {offsets = [2, 0], sizes = [1, 128], strides = [1, 1]} : vector<4x128xf32> to vector<1x128xf32>
    %24 = vector.broadcast %22 : vector<128x1xf32> to vector<128x128xf32>
    %25 = vector.broadcast %23 : vector<1x128xf32> to vector<128x128xf32>
    %26 = arith.mulf %24, %25 : vector<128x128xf32>
    %27 = arith.addf %21, %26 : vector<128x128xf32>
    %28 = vector.extract_strided_slice %3 {offsets = [0, 3], sizes = [128, 1], strides = [1, 1]} : vector<128x4xf32> to vector<128x1xf32>
    %29 = vector.extract_strided_slice %7 {offsets = [3, 0], sizes = [1, 128], strides = [1, 1]} : vector<4x128xf32> to vector<1x128xf32>
    %30 = vector.broadcast %28 : vector<128x1xf32> to vector<128x128xf32>
    %31 = vector.broadcast %29 : vector<1x128xf32> to vector<128x128xf32>
    %32 = arith.mulf %30, %31 : vector<128x128xf32>
    %33 = arith.addf %27, %32 : vector<128x128xf32>
    %34 = vector.extract_strided_slice %5 {offsets = [1, 0], sizes = [1, 128], strides = [1, 1]} : vector<8x128xf32> to vector<1x128xf32>
    %35 = vector.broadcast %1 : f32 to vector<1x128xf32>
    %36 = arith.mulf %35, %34 : vector<1x128xf32>
    %37 = vector.extract_strided_slice %5 {offsets = [2, 0], sizes = [1, 128], strides = [1, 1]} : vector<8x128xf32> to vector<1x128xf32>
    %38 = arith.addf %36, %37 : vector<1x128xf32>
    %39 = arith.negf %38 : vector<1x128xf32>
    %40 = math.exp %39 : vector<1x128xf32>
    %cst = arith.constant 1.000000e+00 : f32
    %41 = vector.broadcast %cst : f32 to vector<1x128xf32>
    %42 = arith.addf %41, %40 : vector<1x128xf32>
    %43 = arith.divf %41, %42 : vector<1x128xf32>
    %44 = vector.extract_strided_slice %5 {offsets = [3, 0], sizes = [1, 128], strides = [1, 1]} : vector<8x128xf32> to vector<1x128xf32>
    %45 = vector.broadcast %1 : f32 to vector<1x128xf32>
    %46 = arith.mulf %45, %44 : vector<1x128xf32>
    %47 = math.tanh %46 : vector<1x128xf32>
    %48 = vector.broadcast %43 : vector<1x128xf32> to vector<128x128xf32>
    %49 = arith.mulf %33, %48 : vector<128x128xf32>
    %50 = vector.broadcast %47 : vector<1x128xf32> to vector<128x128xf32>
    %51 = arith.addf %49, %50 : vector<128x128xf32>
    %cst_7 = arith.constant 0.000000e+00 : f32
    %52 = vector.broadcast %cst_7 : f32 to vector<128x128xf32>
    %53 = arith.maximumf %51, %52 : vector<128x128xf32>
    %54 = vector.broadcast %cst_7 : f32 to vector<128x128xf32>
    %55 = arith.subf %51, %54 : vector<128x128xf32>
    %56 = arith.cmpf one, %55, %55 : vector<128x128xf32>
    %57 = vector.broadcast %cst_7 : f32 to vector<128x128xf32>
    %58 = arith.addf %51, %57 : vector<128x128xf32>
    %59 = math.absf %55 : vector<128x128xf32>
    %cst_8 = arith.constant 0.000000e+00 : f32
    %60 = vector.broadcast %cst_8 : f32 to vector<128x128xf32>
    %61 = arith.subf %60, %59 : vector<128x128xf32>
    %62 = math.exp %61 : vector<128x128xf32>
    %63 = math.log1p %62 : vector<128x128xf32>
    %64 = arith.addf %53, %63 : vector<128x128xf32>
    %65 = arith.select %56, %58, %64 : vector<128x128xi1>, vector<128x128xf32>
    %c1 = arith.constant 1 : index
    %c0_9 = arith.constant 0 : index
    %c0_10 = arith.constant 0 : index
    %66 = vector.load %arg6[%c1, %c0_9, %c0_10] : memref<3x8x128xf32, #tpu.memory_space<vmem>>, vector<1x8x128xf32>
    %67 = vector.shape_cast %66 : vector<1x8x128xf32> to vector<8x128xf32>
    %c0_11 = arith.constant 0 : index
    %c0_12 = arith.constant 0 : index
    %c0_13 = arith.constant 0 : index
    %68 = vector.load %arg5[%c0_11, %c0_12, %c0_13] : memref<2x128x128xbf16, #tpu.memory_space<vmem>>, vector<1x128x128xbf16>
    %69 = vector.shape_cast %68 : vector<1x128x128xbf16> to vector<128x128xbf16>
    %70 = arith.truncf %65 : vector<128x128xf32> to vector<128x128xbf16>
    %cst_14 = arith.constant dense<0.000000e+00> : vector<128x128xf32>
    %71 = tpu.matmul %70, %69, %cst_14 {dimension_numbers = #tpu.dot_dimension_numbers<[1], [0], [0], [1], [0, 0, 1, 1], [], []>} : vector<128x128xbf16>, vector<128x128xbf16>, vector<128x128xf32> -> vector<128x128xf32>
    %72 = vector.extract_strided_slice %67 {offsets = [0, 0], sizes = [1, 128], strides = [1, 1]} : vector<8x128xf32> to vector<1x128xf32>
    %73 = vector.broadcast %72 : vector<1x128xf32> to vector<128x128xf32>
    %74 = arith.addf %71, %73 : vector<128x128xf32>
    %75 = vector.extract_strided_slice %67 {offsets = [1, 0], sizes = [1, 128], strides = [1, 1]} : vector<8x128xf32> to vector<1x128xf32>
    %76 = vector.broadcast %1 : f32 to vector<1x128xf32>
    %77 = arith.mulf %76, %75 : vector<1x128xf32>
    %78 = vector.extract_strided_slice %67 {offsets = [2, 0], sizes = [1, 128], strides = [1, 1]} : vector<8x128xf32> to vector<1x128xf32>
    %79 = arith.addf %77, %78 : vector<1x128xf32>
    %80 = arith.negf %79 : vector<1x128xf32>
    %81 = math.exp %80 : vector<1x128xf32>
    %cst_15 = arith.constant 1.000000e+00 : f32
    %82 = vector.broadcast %cst_15 : f32 to vector<1x128xf32>
    %83 = arith.addf %82, %81 : vector<1x128xf32>
    %84 = arith.divf %82, %83 : vector<1x128xf32>
    %85 = vector.extract_strided_slice %67 {offsets = [3, 0], sizes = [1, 128], strides = [1, 1]} : vector<8x128xf32> to vector<1x128xf32>
    %86 = vector.broadcast %1 : f32 to vector<1x128xf32>
    %87 = arith.mulf %86, %85 : vector<1x128xf32>
    %88 = math.tanh %87 : vector<1x128xf32>
    %89 = vector.broadcast %84 : vector<1x128xf32> to vector<128x128xf32>
    %90 = arith.mulf %74, %89 : vector<128x128xf32>
    %91 = vector.broadcast %88 : vector<1x128xf32> to vector<128x128xf32>
    %92 = arith.addf %90, %91 : vector<128x128xf32>
    %cst_16 = arith.constant 0.000000e+00 : f32
    %93 = vector.broadcast %cst_16 : f32 to vector<128x128xf32>
    %94 = arith.maximumf %92, %93 : vector<128x128xf32>
    %95 = vector.broadcast %cst_16 : f32 to vector<128x128xf32>
    %96 = arith.subf %92, %95 : vector<128x128xf32>
    %97 = arith.cmpf one, %96, %96 : vector<128x128xf32>
    %98 = vector.broadcast %cst_16 : f32 to vector<128x128xf32>
    %99 = arith.addf %92, %98 : vector<128x128xf32>
    %100 = math.absf %96 : vector<128x128xf32>
    %cst_17 = arith.constant 0.000000e+00 : f32
    %101 = vector.broadcast %cst_17 : f32 to vector<128x128xf32>
    %102 = arith.subf %101, %100 : vector<128x128xf32>
    %103 = math.exp %102 : vector<128x128xf32>
    %104 = math.log1p %103 : vector<128x128xf32>
    %105 = arith.addf %94, %104 : vector<128x128xf32>
    %106 = arith.select %97, %99, %105 : vector<128x128xi1>, vector<128x128xf32>
    %c2 = arith.constant 2 : index
    %c0_18 = arith.constant 0 : index
    %c0_19 = arith.constant 0 : index
    %107 = vector.load %arg6[%c2, %c0_18, %c0_19] : memref<3x8x128xf32, #tpu.memory_space<vmem>>, vector<1x8x128xf32>
    %108 = vector.shape_cast %107 : vector<1x8x128xf32> to vector<8x128xf32>
    %c1_20 = arith.constant 1 : index
    %c0_21 = arith.constant 0 : index
    %c0_22 = arith.constant 0 : index
    %109 = vector.load %arg5[%c1_20, %c0_21, %c0_22] : memref<2x128x128xbf16, #tpu.memory_space<vmem>>, vector<1x128x128xbf16>
    %110 = vector.shape_cast %109 : vector<1x128x128xbf16> to vector<128x128xbf16>
    %111 = arith.truncf %106 : vector<128x128xf32> to vector<128x128xbf16>
    %cst_23 = arith.constant dense<0.000000e+00> : vector<128x128xf32>
    %112 = tpu.matmul %111, %110, %cst_23 {dimension_numbers = #tpu.dot_dimension_numbers<[1], [0], [0], [1], [0, 0, 1, 1], [], []>} : vector<128x128xbf16>, vector<128x128xbf16>, vector<128x128xf32> -> vector<128x128xf32>
    %113 = vector.extract_strided_slice %108 {offsets = [0, 0], sizes = [1, 128], strides = [1, 1]} : vector<8x128xf32> to vector<1x128xf32>
    %114 = vector.broadcast %113 : vector<1x128xf32> to vector<128x128xf32>
    %115 = arith.addf %112, %114 : vector<128x128xf32>
    %116 = vector.extract_strided_slice %108 {offsets = [1, 0], sizes = [1, 128], strides = [1, 1]} : vector<8x128xf32> to vector<1x128xf32>
    %117 = vector.broadcast %1 : f32 to vector<1x128xf32>
    %118 = arith.mulf %117, %116 : vector<1x128xf32>
    %119 = vector.extract_strided_slice %108 {offsets = [2, 0], sizes = [1, 128], strides = [1, 1]} : vector<8x128xf32> to vector<1x128xf32>
    %120 = arith.addf %118, %119 : vector<1x128xf32>
    %121 = arith.negf %120 : vector<1x128xf32>
    %122 = math.exp %121 : vector<1x128xf32>
    %cst_24 = arith.constant 1.000000e+00 : f32
    %123 = vector.broadcast %cst_24 : f32 to vector<1x128xf32>
    %124 = arith.addf %123, %122 : vector<1x128xf32>
    %125 = arith.divf %123, %124 : vector<1x128xf32>
    %126 = vector.extract_strided_slice %108 {offsets = [3, 0], sizes = [1, 128], strides = [1, 1]} : vector<8x128xf32> to vector<1x128xf32>
    %127 = vector.broadcast %1 : f32 to vector<1x128xf32>
    %128 = arith.mulf %127, %126 : vector<1x128xf32>
    %129 = math.tanh %128 : vector<1x128xf32>
    %130 = vector.broadcast %125 : vector<1x128xf32> to vector<128x128xf32>
    %131 = arith.mulf %115, %130 : vector<128x128xf32>
    %132 = vector.broadcast %129 : vector<1x128xf32> to vector<128x128xf32>
    %133 = arith.addf %131, %132 : vector<128x128xf32>
    %134 = vector.extract_strided_slice %133 {offsets = [0, 0], sizes = [128, 4], strides = [1, 1]} : vector<128x128xf32> to vector<128x4xf32>
    %c0_25 = arith.constant 0 : index
    %c0_26 = arith.constant 0 : index
    %c0_27 = arith.constant 0 : index
    %135 = vector.load %arg7[%c0_25, %c0_26, %c0_27] : memref<1x128x4xf32, #tpu.memory_space<vmem>>, vector<1x128x4xf32>
    %136 = vector.shape_cast %135 : vector<1x128x4xf32> to vector<128x4xf32>
    %137 = vector.shape_cast %134 : vector<128x4xf32> to vector<1x128x4xf32>
    tpu.vector_store %arg7[%c0_25, %c0_26, %c0_27], %137 {strides = array<i32>} : memref<1x128x4xf32, #tpu.memory_space<vmem>>, vector<1x128x4xf32>,
    return
  }
  func.func @transform_0(%arg0: i32, %arg1: i32, %arg2: memref<2xf32, #tpu.memory_space<smem>>) -> (i32, i32, i32) {
    %c0_i32 = arith.constant 0 : i32
    %c0_i32_0 = arith.constant 0 : i32
    return %arg1, %arg0, %c0_i32 : i32, i32, i32
  }
  func.func @transform_1(%arg0: i32, %arg1: i32, %arg2: memref<2xf32, #tpu.memory_space<smem>>) -> (i32, i32) {
    %c0_i32 = arith.constant 0 : i32
    %c0_i32_0 = arith.constant 0 : i32
    %c0_i32_1 = arith.constant 0 : i32
    return %c0_i32, %c0_i32_0 : i32, i32
  }
  func.func @transform_2(%arg0: i32, %arg1: i32, %arg2: memref<2xf32, #tpu.memory_space<smem>>) -> (i32, i32, i32) {
    %c0_i32 = arith.constant 0 : i32
    %c0_i32_0 = arith.constant 0 : i32
    %c0_i32_1 = arith.constant 0 : i32
    %c0_i32_2 = arith.constant 0 : i32
    return %c0_i32, %c0_i32_0, %c0_i32_1 : i32, i32, i32
  }
  func.func @transform_3(%arg0: i32, %arg1: i32, %arg2: memref<2xf32, #tpu.memory_space<smem>>) -> (i32, i32, i32) {
    %c0_i32 = arith.constant 0 : i32
    %c0_i32_0 = arith.constant 0 : i32
    %c0_i32_1 = arith.constant 0 : i32
    %c0_i32_2 = arith.constant 0 : i32
    return %c0_i32, %c0_i32_0, %c0_i32_1 : i32, i32, i32
  }
  func.func @transform_4(%arg0: i32, %arg1: i32, %arg2: memref<2xf32, #tpu.memory_space<smem>>) -> (i32, i32, i32) {
    %c0_i32 = arith.constant 0 : i32
    %c0_i32_0 = arith.constant 0 : i32
    return %arg1, %arg0, %c0_i32 : i32, i32, i32
  }
}

</mosaic_0001>

<bundles_post_ra>
// kernel: tpu_custom_call.1
= control target key start
LH: loop header
LB: loop body
LE: loop exit
PB: predicated region body
PF: predicated region fallthrough
CT: control target
= control target key end

     0   :  { %s3365_s0 = inlined_call_operand.vmem [shape: f32[2], index: 0, kind: input, shape index: {}]   ;;  %s3366_s1 = inlined_call_operand.vmem [shape: f32[2,128,4], index: 1, kind: input, shape index: {}]   ;;  %s3367_s2 = inlined_call_operand.vmem [shape: bf16[4,128], index: 2, kind: input, shape index: {}]   ;;  %s3368_s3 = inlined_call_operand.vmem [shape: bf16[2,128,128], index: 3, kind: input, shape index: {}]   ;;  %s3369_s4 = inlined_call_operand.vmem [shape: f32[3,8,128], index: 4, kind: input, shape index: {}]   ;;  %s3370_s5 = inlined_call_operand.vmem [shape: f32[2,128,4], index: 5, kind: output, shape index: {}]  }
   0x1   :  { %s10_s20 = sshll.u32 %s3365_s0, 4  ;;  %s11_s20 = int_to_ptr.vmem [resolvable:$true] %s10_s20 }
   0x2   :  { %s2230_s21 = scalar_lea.vmem %s11_s20, 16  ;;  %p2235_p1 = scmp.lt.s32.totalorder %s11_s20, %s11_s20 }
   0x3   :  { %p2231_p0 = scmp.ne.s32.totalorder %s11_s20, %s2230_s21  ;;  %p2236_p2 = scmp.lt.s32.totalorder %s2230_s21, %s2230_s21 }
   0x5   :  { %p2237_p3 = por %p2236_p2, %p2235_p1 }
   0x7   :  { %p2238_p4 = pnand %p2237_p3, %p2231_p0 }
   0x9   :  { %2241 = shalt.err (!%p2238_p4)  }
   0xa   :  { %s2268_s22 = smov [#allocation3]  }
   0xb   :  { %13 = dma.vmem_to_smem %s11_s20, 16, %s2268_s22, [#allocation2] }
   0xc   :  { %2254 = dma.done.wait [#allocation2], 16 }
   0xd   :  { %2255 = vsyncadd [#allocation2], 4294967280 }
   0xe   :  { %15 = sfence }
   0xf   :  { %s2306_s23 = smov 0   ;;  %s2308_s24 = smov 0  }
  0x10   :  { %s2310_s25 = smov 0  }
  0x11 LB: > { %s30_s0 = sadd.s32 1, %s2262_s24  ;;  %p1877_p5 = scmp.ge.s32.totalorder %s2266_s25, 1  ;;  %s2266_s25 = sphi %s2310_s25, %s21_s25   ;;  %s2262_s24 = sphi %s2308_s24, %s3420_s24   ;;  %s2258_s23 = sphi %s2306_s23, %s3419_s23  }
  0x12   : > { %p31_p6 = scmp.ge.s32.totalorder %s30_s0, 2  ;;  %p190_p7 = scmp.lt.s32.totalorder %s2266_s25, 3 }
  0x14   : > { %s3422_s0 = smov (%p31_p6, %s30_s0), 0  ;;  %p191_p8 = pnand %p1877_p5, %p190_p7 }
  0x15   : > { %p225_p9 = scmp.lt.s32.totalorder (!%p191_p8), %s2258_s23, 1  ;;  %s245_s12 = sld [smem:[#allocation3 + %s2258_s23]] (!%p191_p8) }
  0x16   : > { %194 = sbr.rel (%p191_p8) target bundleno = 831 (0x33f), region = 36 }
  0x1b   : > { %v2269_v0 = vmov 0   ;;  %s2330_s26 = scalar_select %p225_p9, %s2258_s23, 1  ;;  %v2270_v7 = vmov 1   ;;  %v2271_v9 = vmov 2   ;;  %v2272_v11 = vmov 3   ;;  %v2068_v19 = vld [vmem:[%s3368_s3 + $0x38] sm:$0xff]  }
  0x1c   : > { %2049 = vset.pattern.permute.xlu1 %v2269_v0  ;;  %2048 = vset.pattern.permute.xlu0 %v2269_v0  ;;  %v2069_v20 = vld [vmem:[%s3368_s3 + $0x30] sm:$0xff]   ;;  %v2070_v21 = vld [vmem:[%s3368_s3 + $0x28] sm:$0xff]   ;;  %v2071_v22 = vld [vmem:[%s3368_s3 + $0x20] sm:$0xff]   ;;  %v2409_v25 = vstv %s245_s12  ;;  %v345_v40 = vlaneseq }
  0x1d   : > { %s1921_s27 = sshll.u32 %s2330_s26, 7  ;;  %1955 = vmatprep.subr.bf16.mxu0 %v2068_v19  ;;  %v2072_v23 = vld [vmem:[%s3368_s3 + $0x18] sm:$0xff]   ;;  %v262_v24 = vld [vmem:[%s3369_s4] sm:$0xff]  ;;  %v2073_v26 = vld [vmem:[%s3368_s3 + $0x10] sm:$0xff]  }
  0x1e   : > { %s2338_s30 = scalar_lea.vmem %s3366_s1, %s1921_s27  ;;  %1956 = vmatpush3.bf16.msra.mxu0 %v2068_v19  ;;  %v686_v27 = vmul.f32 %v2409_v25, %v262_v24  ;;  %v688_v28 = vrot.slane %v262_v24, 1  ;;  %v2074_v29 = vld [vmem:[%s3368_s3 + $0x8] sm:$0xff]   ;;  %v2075_v31 = vld [vmem:[%s3368_s3] sm:$0xff]   ;;  %v346_v44 = vshrl.u32 %v345_v40, 7  ;;  %s3277_s7 = scalar_lea.vmem %s3370_s5, %s1921_s27 }
  0x1f   : > { %v248_v1 = vld [vmem:[%s2338_s30 + $0x10] sm:$0xff]  ;;  %v246_v2 = vld [vmem:[%s2338_s30] sm:$0xff]  ;;  %v249_v3 = vld [vmem:[%s2338_s30 + $0x18] sm:$0xff]  ;;  %1957 = vmatprep.subr.bf16.mxu0 %v2069_v20 }
  0x20   : > { %277 = vperm.xlu1 %2049, %v248_v1   ;;  %267 = vperm.xlu0 %2048, %v246_v2   ;;  %v247_v4 = vld [vmem:[%s2338_s30 + $0x8] sm:$0xff]  ;;  %v250_v10 = vld [vmem:[%s2338_s30 + $0x20] sm:$0xff]  ;;  %v253_v12 = vld [vmem:[%s2338_s30 + $0x38] sm:$0xff]  ;;  %v690_v30 = vadd.f32 %v688_v28, %v686_v27  ;;  %v2449_v50 = vsub.s32 0, %v346_v44  ;;  %v2456_v54 = vsub.s32 1, %v346_v44  ;;  %v551_v56 = vsub.s32 2, %v346_v44 }
  0x21   : > { %v251_v5 = vld [vmem:[%s2338_s30 + $0x28] sm:$0xff]  ;;  %v254_v13 = vld [vmem:[%s2338_s30 + $0x40] sm:$0xff]  ;;  %v2361_v14 = vld [vmem:[%s2338_s30 + $0x58] sm:$0xff] }
  0x22   : > { %v2346_v6 = vld [vmem:[%s2338_s30 + $0x48] sm:$0xff]  ;;  %v252_v15 = vld [vmem:[%s2338_s30 + $0x30] sm:$0xff]  ;;  %v2367_v16 = vld [vmem:[%s2338_s30 + $0x60] sm:$0xff]  ;;  %1958 = vmatpush3.bf16.msra.mxu0 %v2069_v20  ;;  %v1882_v32 = vmul.f32 -1.442695, %v690_v30  ;;  %v2465_v58 = vrot.slane %v262_v24, %v2449_v50 }
  0x23   : > { %v2351_v8 = vld [vmem:[%s2338_s30 + $0x68] sm:$0xff]  ;;  %v2371_v17 = vld [vmem:[%s2338_s30 + $0x78] sm:$0xff]  ;;  %v256_v18 = vld [vmem:[%s2338_s30 + $0x50] sm:$0xff]  ;;  %1959 = vmatprep.subr.bf16.mxu0 %v2070_v21 }
  0x24   : > { %282 = vperm.xlu1 %2049, %v249_v3   ;;  %272 = vperm.xlu0 %2048, %v247_v4   ;;  %2084 = vpow2.f32 %v1882_v32  ;;  %v260_v37 = vld [vmem:[%s2338_s30 + $0x70] sm:$0xff]  ;;  %v263_v47 = vld [vmem:[%s3367_s2] sm:$0x3] }
  0x25   : > { %v264_v49 = vunpack.c.l.bf16 %v263_v47 }
  0x26   : > { %1960 = vmatpush3.bf16.msra.mxu0 %v2070_v21 }
  0x27   : > { %1961 = vmatprep.subr.bf16.mxu0 %v2071_v22  ;;  %v2454_v53 = vrot.slane %v264_v49, %v2449_v50  ;;  %v2469_v60 = vrot.slane %v264_v49, %v2456_v54  ;;  %v2474_v63 = vrot.slane %v264_v49, %v551_v56 }
  0x28   : > { %2050 = vset.pattern.permute.xlu1 %v2270_v7  ;;  %292 = vperm.xlu0 %2048, %v251_v5  }
  0x29   : > { %390 = vperm.xlu1 %2050, %v247_v4  }
  0x2a   : > { %1962 = vmatpush3.bf16.msra.mxu0 %v2071_v22 }
  0x2b   : > { %1963 = vmatprep.subr.bf16.mxu0 %v2072_v23 }
  0x2c   : > { %312 = vperm.xlu0 %2048, %v2346_v6  }
  0x2d   : > { %394 = vperm.xlu1 %2050, %v248_v1  }
  0x2e   : > { %1964 = vmatpush3.bf16.msra.mxu0 %v2072_v23 }
  0x2f   : > { %1965 = vmatprep.subr.bf16.mxu0 %v2073_v26 }
  0x30   : > { %332 = vperm.xlu0 %2048, %v2351_v8  }
  0x31   : > { %2051 = vset.pattern.permute.xlu1 %v2271_v9  ;;  %v2085_v42 = vpop.eup %2084 }
  0x32   : > { %486 = vperm.xlu1 %2051, %v246_v2   ;;  %1966 = vmatpush3.bf16.msra.mxu0 %v2073_v26  ;;  %v694_v46 = vadd.f32 1.0, %v2085_v42 }
  0x33   : > { %1967 = vmatprep.subr.bf16.mxu0 %v2074_v29 }
  0x34   : > { %2062 = vset.pattern.permute.xlu0 %v2270_v7  ;;  %2086 = vrcp.f32 %v694_v46 }
  0x35   : > { %386 = vperm.xlu0 %2062, %v246_v2   ;;  %2088 = vtanh.f32 %v686_v27 }
  0x36   : > { %494 = vperm.xlu1 %2051, %v248_v1   ;;  %1968 = vmatpush3.bf16.msra.mxu0 %v2074_v29 }
  0x37   : > { %1969 = vmatprep.subr.bf16.mxu0 %v2075_v31 }
  0x39   : > { %398 = vperm.xlu0 %2062, %v249_v3  }
  0x3a   : > { %498 = vperm.xlu1 %2051, %v249_v3   ;;  %1970 = vmatpush3.bf16.msra.mxu0 %v2075_v31 }
  0x3d   : > { %402 = vperm.xlu0 %2062, %v250_v10  }
  0x3e   : > { %2052 = vset.pattern.permute.xlu1 %v2272_v11 }
  0x3f   : > { %590 = vperm.xlu1 %2052, %v247_v4  }
  0x41   : > { %414 = vperm.xlu0 %2062, %v253_v12  }
  0x43   : > { %594 = vperm.xlu1 %2052, %v248_v1  }
  0x45   : > { %418 = vperm.xlu0 %2062, %v254_v13  }
  0x47   : > { %2053 = vset.pattern.permute.xlu1 %v2269_v0 }
  0x48   : > { %287 = vperm.xlu1 %2053, %v250_v10  }
  0x49   : > { %430 = vperm.xlu0 %2062, %v2361_v14  }
  0x4c   : > { %297 = vperm.xlu1 %2053, %v252_v15  }
  0x4d   : > { %434 = vperm.xlu0 %2062, %v2367_v16  }
  0x50   : > { %302 = vperm.xlu1 %2053, %v253_v12  }
  0x51   : > { %446 = vperm.xlu0 %2062, %v2371_v17  }
  0x54   : > { %2054 = vset.pattern.permute.xlu1 %v2270_v7 }
  0x55   : > { %406 = vperm.xlu1 %2054, %v251_v5   ;;  %2064 = vset.pattern.permute.xlu0 %v2271_v9 }
  0x56   : > { %490 = vperm.xlu0 %2064, %v247_v4   ;;  %v2087_v4 = vpop.eup %2086 }
  0x59   : > { %410 = vperm.xlu1 %2054, %v252_v15  }
  0x5a   : > { %506 = vperm.xlu0 %2064, %v251_v5  }
  0x5d   : > { %2055 = vset.pattern.permute.xlu1 %v2271_v9 }
  0x5e   : > { %502 = vperm.xlu1 %2055, %v250_v10   ;;  %522 = vperm.xlu0 %2064, %v2346_v6  }
  0x62   : > { %510 = vperm.xlu1 %2055, %v252_v15   ;;  %538 = vperm.xlu0 %2064, %v2351_v8  }
  0x66   : > { %514 = vperm.xlu1 %2055, %v253_v12   ;;  %2066 = vset.pattern.permute.xlu0 %v2272_v11 }
  0x67   : > { %586 = vperm.xlu0 %2066, %v246_v2  }
  0x6a   : > { %2056 = vset.pattern.permute.xlu1 %v2272_v11 }
  0x6b   : > { %606 = vperm.xlu1 %2056, %v251_v5   ;;  %598 = vperm.xlu0 %2066, %v249_v3  }
  0x6f   : > { %610 = vperm.xlu1 %2056, %v252_v15   ;;  %602 = vperm.xlu0 %2066, %v250_v10  }
  0x73   : > { %2057 = vset.pattern.permute.xlu1 %v2269_v0  ;;  %614 = vperm.xlu0 %2066, %v253_v12  }
  0x74   : > { %307 = vperm.xlu1 %2057, %v254_v13  }
  0x77   : > { %618 = vperm.xlu0 %2066, %v254_v13  }
  0x78   : > { %317 = vperm.xlu1 %2057, %v256_v18  }
  0x7b   : > { %630 = vperm.xlu0 %2066, %v2361_v14  }
  0x7c   : > { %322 = vperm.xlu1 %2057, %v2361_v14  }
  0x7f   : > { %634 = vperm.xlu0 %2066, %v2367_v16  }
  0x80   : > { %2058 = vset.pattern.permute.xlu1 %v2270_v7 }
  0x81   : > { %422 = vperm.xlu1 %2058, %v2346_v6  }
  0x83   : > { %646 = vperm.xlu0 %2066, %v2371_v17  }
  0x85   : > { %426 = vperm.xlu1 %2058, %v256_v18  }
  0x89   : > { %2059 = vset.pattern.permute.xlu1 %v2271_v9 }
  0x8a   : > { %518 = vperm.xlu1 %2059, %v254_v13   ;;  %v2487_v13 = vrot.slane %v2087_v4, %v2456_v54 }
  0x8e   : > { %526 = vperm.xlu1 %2059, %v256_v18  }
  0x92   : > { %530 = vperm.xlu1 %2059, %v2361_v14  }
  0x96   : > { %2060 = vset.pattern.permute.xlu1 %v2272_v11 }
  0x97   : > { %622 = vperm.xlu1 %2060, %v2346_v6  }
  0x9b   : > { %v278_v33 = vpop.permute.xlu1 %277  ;;  %626 = vperm.xlu1 %2060, %v256_v18   ;;  %v2424_v34 = vpop.permute.xlu0 %267 }
  0x9c   : > { %v351_v59 = vmul.f32 %v2454_v53, %v278_v33  ;;  %v349_v46 = vmul.f32 %v2454_v53, %v2424_v34 }
  0x9e   : > { %v371_v2 = vadd.f32 %v2465_v58, %v351_v59  ;;  %v369_v59 = vadd.f32 %v2465_v58, %v349_v46 }
  0x9f   : > { %v2426_v35 = vpop.permute.xlu1 %282  ;;  %2061 = vset.pattern.permute.xlu1 %v2269_v0  ;;  %v2429_v36 = vpop.permute.xlu0 %272  ;;  %v2476_v0 = vsub.s32 3, %v346_v44 }
  0xa0   : > { %327 = vperm.xlu1 %2061, %v2367_v16   ;;  %v350_v26 = vmul.f32 %v2454_v53, %v2429_v36 }
  0xa3   : > { %v2433_v38 = vpop.permute.xlu0 %292 }
  0xa4   : > { %v2435_v39 = vpop.permute.xlu1 %390  ;;  %337 = vperm.xlu1 %2061, %v260_v37  }
  0xa5   : > { %v454_v29 = vmul.f32 %v2469_v60, %v2435_v39 }
  0xa7   : > { %v2437_v41 = vpop.permute.xlu0 %312 }
  0xa8   : > { %v395_v43 = vpop.permute.xlu1 %394  ;;  %342 = vperm.xlu1 %2061, %v2371_v17  }
  0xa9   : > { %v455_v62 = vmul.f32 %v2469_v60, %v395_v43 }
  0xab   : > { %v2440_v45 = vpop.permute.xlu0 %332  ;;  %v471_v6 = vadd.f32 %v455_v62, %v371_v2  ;;  %v354_v2 = vmul.f32 %v2454_v53, %v2433_v38 }
  0xac   : > { %2063 = vset.pattern.permute.xlu1 %v2270_v7  ;;  %v2483_v7 = vrot.slane %v264_v49, %v2476_v0 }
  0xad   : > { %438 = vperm.xlu1 %2063, %v2351_v8   ;;  %v2447_v48 = vpop.permute.xlu1 %486 }
  0xb0   : > { %v2451_v51 = vpop.permute.xlu0 %386 }
  0xb1   : > { %442 = vperm.xlu1 %2063, %v260_v37   ;;  %v495_v52 = vpop.permute.xlu1 %494  ;;  %v453_v62 = vmul.f32 %v2469_v60, %v2451_v51 }
  0xb2   : > { %v555_v3 = vmul.f32 %v2474_v63, %v495_v52  ;;  %v352_v52 = vmul.f32 %v2454_v53, %v2426_v35 }
  0xb4   : > { %v2458_v55 = vpop.permute.xlu0 %398  ;;  %v571_v12 = vadd.f32 %v555_v3, %v471_v6  ;;  %v372_v35 = vadd.f32 %v2465_v58, %v352_v52 }
  0xb5   : > { %2065 = vset.pattern.permute.xlu1 %v2271_v9  ;;  %v2461_v57 = vpop.permute.xlu1 %498  ;;  %v2089_v9 = vpop.eup %2088 }
  0xb6   : > { %534 = vperm.xlu1 %2065, %v2367_v16   ;;  %v2493_v16 = vrot.slane %v2089_v9, %v2476_v0  ;;  %v469_v9 = vadd.f32 %v453_v62, %v369_v59 }
  0xb8   : > { %v2471_v61 = vpop.permute.xlu0 %402 }
  0xba   : > { %542 = vperm.xlu1 %2065, %v260_v37   ;;  %v591_v1 = vpop.permute.xlu1 %590 }
  0xbb   : > { %v654_v40 = vmul.f32 %v2483_v7, %v591_v1  ;;  %v456_v1 = vmul.f32 %v2469_v60, %v2458_v55  ;;  %v553_v55 = vmul.f32 %v2474_v63, %v2447_v48  ;;  %v457_v48 = vmul.f32 %v2469_v60, %v2471_v61 }
  0xbc   : > { %v2480_v5 = vpop.permute.xlu0 %414 }
  0xbe   : > { %546 = vperm.xlu1 %2065, %v2371_v17   ;;  %v595_v10 = vpop.permute.xlu1 %594 }
  0xbf   : > { %v655_v14 = vmul.f32 %v2483_v7, %v595_v10  ;;  %v472_v10 = vadd.f32 %v456_v1, %v372_v35 }
  0xc0   : > { %v2490_v15 = vpop.permute.xlu0 %418 }
  0xc1   : > { %v671_v18 = vadd.f32 %v655_v14, %v571_v12  ;;  %v556_v12 = vmul.f32 %v2474_v63, %v2461_v57  ;;  %v374_v14 = vadd.f32 %v2465_v58, %v354_v2  ;;  %v569_v57 = vadd.f32 %v553_v55, %v469_v9 }
  0xc2   : > { %2067 = vset.pattern.permute.xlu1 %v2272_v11 }
  0xc3   : > { %v704_v19 = vmul.f32 %v2487_v13, %v671_v18  ;;  %638 = vperm.xlu1 %2067, %v2351_v8   ;;  %v288_v17 = vpop.permute.xlu1 %287  ;;  %v370_v8 = vadd.f32 %v2465_v58, %v350_v26 }
  0xc4   : > { %v2498_v20 = vpop.permute.xlu0 %430 }
  0xc5   : > { %v2501_v21 = vadd.f32 %v2493_v16, %v704_v19  ;;  %v470_v33 = vadd.f32 %v454_v29, %v370_v8 }
  0xc7   : > { %642 = vperm.xlu1 %2067, %v260_v37   ;;  %v298_v22 = vpop.permute.xlu1 %297  ;;  %v788_v24 = vand.u32 2147483647, %v2501_v21  ;;  %vm756_vm1 = vcmp.ne.f32.partialorder %v2501_v21, %v2501_v21 }
  0xc8   : > { %v2503_v23 = vpop.permute.xlu0 %434  ;;  %v355_v26 = vmul.f32 %v2454_v53, %v298_v22 }
  0xc9   : > { %v804_v28 = vsub.f32 0.0, %v788_v24  ;;  %v353_v24 = vmul.f32 %v2454_v53, %v288_v17 }
  0xca   : > { %v375_v22 = vadd.f32 %v2465_v58, %v355_v26 }
  0xcb   : > { %v303_v11 = vpop.permute.xlu1 %302  ;;  %v822_v31 = vmul.f32 1.442695, %v804_v28  ;;  %v373_v17 = vadd.f32 %v2465_v58, %v353_v24 }
  0xcc   : > { %v2508_v27 = vpop.permute.xlu0 %446 }
  0xcd   : > { %2090 = vpow2.f32 %v822_v31  ;;  %v572_v31 = vadd.f32 %v556_v12, %v472_v10 }
  0xd0   : > { %v407_v30 = vpop.permute.xlu1 %406 }
  0xd1   : > { %v491_v32 = vpop.permute.xlu0 %490  ;;  %v458_v18 = vmul.f32 %v2469_v60, %v407_v30 }
  0xd2   : > { %v554_v37 = vmul.f32 %v2474_v63, %v491_v32 }
  0xd3   : > { %v474_v30 = vadd.f32 %v458_v18, %v374_v14 }
  0xd4   : > { %v570_v42 = vadd.f32 %v554_v37, %v470_v33  ;;  %v411_v43 = vpop.permute.xlu1 %410 }
  0xd5   : > { %v507_v36 = vpop.permute.xlu0 %506  ;;  %v459_v32 = vmul.f32 %v2469_v60, %v411_v43 }
  0xd6   : > { %v670_v44 = vadd.f32 %v654_v40, %v570_v42  ;;  %v558_v8 = vmul.f32 %v2474_v63, %v507_v36  ;;  %v356_v40 = vmul.f32 %v2454_v53, %v303_v11  ;;  %v460_v11 = vmul.f32 %v2469_v60, %v2480_v5 }
  0xd7   : > { %v475_v52 = vadd.f32 %v459_v32, %v375_v22 }
  0xd8   : > { %v703_v47 = vmul.f32 %v2487_v13, %v670_v44  ;;  %v574_v46 = vadd.f32 %v558_v8, %v474_v30  ;;  %v376_v2 = vadd.f32 %v2465_v58, %v356_v40 }
  0xd9   : > { %v503_v49 = vpop.permute.xlu1 %502  ;;  %v2518_v39 = vpop.permute.xlu0 %522 }
  0xda   : > { %v2523_v56 = vadd.f32 %v2493_v16, %v703_v47  ;;  %v2542_v19 = vpop.eup %2090  ;;  %v557_v59 = vmul.f32 %v2474_v63, %v503_v49  ;;  %v476_v8 = vadd.f32 %v460_v11, %v376_v2 }
  0xdb   : > { %v868_v37 = vadd.f32 1.0, %v2542_v19 }
  0xdc   : > { %v787_v34 = vand.u32 2147483647, %v2523_v56  ;;  %vm755_vm3 = vcmp.ne.f32.partialorder %v2523_v56, %v2523_v56 }
  0xdd   : > { %v511_v3 = vpop.permute.xlu1 %510  ;;  %v2533_v4 = vpop.permute.xlu0 %538 }
  0xde   : > { %v803_v6 = vsub.f32 0.0, %v787_v34  ;;  %v559_v42 = vmul.f32 %v2474_v63, %v511_v3  ;;  %v473_v3 = vadd.f32 %v457_v48, %v373_v17 }
  0xe0   : > { %v820_v51 = vmul.f32 1.442695, %v803_v6  ;;  %v575_v35 = vadd.f32 %v559_v42, %v475_v52  ;;  %v573_v14 = vadd.f32 %v557_v59, %v473_v3 }
  0xe1   : > { %v515_v38 = vpop.permute.xlu1 %514 }
  0xe2   : > { %2092 = vpow2.f32 %v820_v51  ;;  %v587_v28 = vpop.permute.xlu0 %586  ;;  %v560_v55 = vmul.f32 %v2474_v63, %v515_v38 }
  0xe3   : > { %v653_v29 = vmul.f32 %v2483_v7, %v587_v28  ;;  %2094 = vlog2.f32 %v868_v37 }
  0xe4   : > { %v576_v37 = vadd.f32 %v560_v55, %v476_v8  ;;  %v358_v55 = vmul.f32 %v2454_v53, %v2437_v41  ;;  %v461_v41 = vmul.f32 %v2469_v60, %v2490_v15 }
  0xe5   : > { %v669_v33 = vadd.f32 %v653_v29, %v569_v57 }
  0xe6   : > { %v607_v36 = vpop.permute.xlu1 %606  ;;  %v599_v44 = vpop.permute.xlu0 %598 }
  0xe7   : > { %v702_v43 = vmul.f32 %v2487_v13, %v669_v33  ;;  %v658_v47 = vmul.f32 %v2483_v7, %v607_v36  ;;  %v656_v61 = vmul.f32 %v2483_v7, %v599_v44 }
  0xe9   : > { %v2561_v62 = vadd.f32 %v2493_v16, %v702_v43  ;;  %v674_v1 = vadd.f32 %v658_v47, %v574_v46  ;;  %v672_v34 = vadd.f32 %v656_v61, %v572_v31  ;;  %v871_v47 = vmul.f32 -0.5, %v2542_v19 }
  0xea   : > { %v611_v6 = vpop.permute.xlu1 %610  ;;  %v603_v9 = vpop.permute.xlu0 %602 }
  0xeb   : > { %v786_v10 = vand.u32 2147483647, %v2561_v62  ;;  %v707_v12 = vmul.f32 %v2487_v13, %v674_v1  ;;  %v705_v49 = vmul.f32 %v2487_v13, %v672_v34  ;;  %v659_v51 = vmul.f32 %v2483_v7, %v611_v6 }
  0xec   : > { %v657_v18 = vmul.f32 %v2483_v7, %v603_v9  ;;  %vm754_vm4 = vcmp.ne.f32.partialorder %v2561_v62, %v2561_v62 }
  0xed   : > { %v802_v5 = vsub.f32 0.0, %v786_v10  ;;  %v2573_v24 = vadd.f32 %v2493_v16, %v707_v12  ;;  %v2576_v26 = vadd.f32 %v2493_v16, %v705_v49  ;;  %v675_v28 = vadd.f32 %v659_v51, %v575_v35 }
  0xee   : > { %v673_v57 = vadd.f32 %v657_v18, %v573_v14  ;;  %v615_v29 = vpop.permute.xlu0 %614  ;;  %v872_v12 = vadd.f32 1.0, %v871_v47  ;;  %v874_v14 = vand.u32 2147483647, %v2542_v19 }
  0xef   : > { %v2578_v31 = vpop.eup %2092  ;;  %v818_v32 = vmul.f32 1.442695, %v802_v5  ;;  %v791_v48 = vand.u32 2147483647, %v2573_v24  ;;  %v789_v38 = vand.u32 2147483647, %v2576_v26  ;;  %v708_v30 = vmul.f32 %v2487_v13, %v675_v28  ;;  %v308_v33 = vpop.permute.xlu1 %307 }
  0xf0   : > { %v706_v17 = vmul.f32 %v2487_v13, %v673_v57  ;;  %v660_v22 = vmul.f32 %v2483_v7, %v615_v29  ;;  %v859_v40 = vadd.f32 1.0, %v2578_v31  ;;  %v2095_v3 = vpop.eup %2094  ;;  %v357_v28 = vmul.f32 %v2454_v53, %v308_v33 }
  0xf1   : > { %2096 = vpow2.f32 %v818_v32  ;;  %v807_v42 = vsub.f32 0.0, %v791_v48  ;;  %v805_v36 = vsub.f32 0.0, %v789_v38  ;;  %v2587_v44 = vadd.f32 %v2493_v16, %v708_v30 }
  0xf2   : > { %v2590_v46 = vadd.f32 %v2493_v16, %v706_v17  ;;  %v676_v43 = vadd.f32 %v660_v22, %v576_v37  ;;  %2098 = vlog2.f32 %v859_v40  ;;  %v870_v18 = vmul.f32 0.6931472, %v2095_v3  ;;  %v619_v8 = vpop.permute.xlu0 %618 }
  0xf3   : > { %v828_v61 = vmul.f32 1.442695, %v807_v42  ;;  %v824_v52 = vmul.f32 1.442695, %v805_v36  ;;  %v792_v59 = vand.u32 2147483647, %v2587_v44  ;;  %v318_v1 = vpop.permute.xlu1 %317  ;;  %v873_v57 = vmul.f32 %v2542_v19, %v872_v12 }
  0xf4   : > { %v790_v34 = vand.u32 2147483647, %v2590_v46  ;;  %v709_v11 = vmul.f32 %v2487_v13, %v676_v43  ;;  %v862_v48 = vmul.f32 -0.5, %v2578_v31  ;;  %vm2606_vm0 = vcmp.lt.f32.partialorder %v874_v14, 0.0004427343 }
  0xf5   : > { %2100 = vpow2.f32 %v828_v61  ;;  %v808_v2 = vsub.f32 0.0, %v792_v59  ;;  %v378_v30 = vadd.f32 %v2465_v58, %v358_v55  ;;  %v876_v33 = vsel %vm2606_vm0, %v873_v57, %v870_v18 }
  0xf6   : > { %2102 = vpow2.f32 %v824_v52  ;;  %v806_v35 = vsub.f32 0.0, %v790_v34  ;;  %v2597_v6 = vadd.f32 %v2493_v16, %v709_v11  ;;  %v377_v19 = vadd.f32 %v2465_v58, %v357_v28  ;;  %v631_v36 = vpop.permute.xlu0 %630 }
  0xf7   : > { %v830_v9 = vmul.f32 1.442695, %v808_v2  ;;  %v323_v10 = vpop.permute.xlu1 %322  ;;  %v359_v22 = vmul.f32 %v2454_v53, %v318_v1  ;;  %v740_v40 = vmax.f32 %v2501_v21, 0.0  ;;  %v464_v42 = vmul.f32 %v2469_v60, %v2498_v20 }
  0xf8   : > { %v826_v49 = vmul.f32 1.442695, %v806_v35  ;;  %v793_v51 = vand.u32 2147483647, %v2597_v6  ;;  %v360_v37 = vmul.f32 %v2454_v53, %v323_v10  ;;  %v865_v43 = vand.u32 2147483647, %v2578_v31 }
  0xf9   : > { %2104 = vpow2.f32 %v830_v9  ;;  %v562_v61 = vmul.f32 %v2474_v63, %v2518_v39  ;;  %v739_v59 = vmax.f32 %v2523_v56, 0.0  ;;  %v863_v1 = vadd.f32 1.0, %v862_v48 }
  0xfa   : > { %2106 = vpow2.f32 %v826_v49  ;;  %v809_v5 = vsub.f32 0.0, %v793_v51  ;;  %v996_v34 = vadd.f32 %v876_v33, %v740_v40  ;;  %v380_v11 = vadd.f32 %v2465_v58, %v360_v37 }
  0xfb   : > { %v661_v20 = vmul.f32 %v2483_v7, %v619_v8  ;;  %v738_v2 = vmax.f32 %v2561_v62, 0.0  ;;  %v379_v35 = vadd.f32 %v2465_v58, %v359_v22  ;;  %v477_v10 = vadd.f32 %v461_v41, %v377_v19 }
  0xfc   : > { %v832_v29 = vmul.f32 1.442695, %v809_v5  ;;  %v423_v32 = vpop.permute.xlu1 %422  ;;  %v2638_v39 = vmul.f32 %v2483_v7, %v631_v36  ;;  %vm2642_vm2 = vcmp.lt.f32.partialorder %v865_v43, 0.0004427343  ;;  %v741_v14 = vmax.f32 %v2576_v26, 0.0 }
  0xfd   : > { %v462_v9 = vmul.f32 %v2469_v60, %v423_v32  ;;  %v864_v18 = vmul.f32 %v2578_v31, %v863_v1  ;;  %v2654_v28 = vsel %vm756_vm1, %v2501_v21, %v996_v34  ;;  %v742_v8 = vmax.f32 %v2590_v46, 0.0 }
  0xfe   : > { %v2616_v17 = vpop.eup %2096  ;;  %2108 = vpow2.f32 %v832_v29  ;;  %v480_v29 = vadd.f32 %v464_v42, %v380_v11  ;;  %v743_v48 = vmax.f32 %v2573_v24, 0.0  ;;  %v744_v21 = vmax.f32 %v2587_v44, 0.0 }
  0xff   : > { %v850_v15 = vadd.f32 1.0, %v2616_v17  ;;  %v2099_v47 = vpop.eup %2098  ;;  %v853_v32 = vmul.f32 -0.5, %v2616_v17  ;;  %v478_v38 = vadd.f32 %v462_v9, %v378_v30  ;;  %v856_v19 = vand.u32 2147483647, %v2616_v17 }
 0x100   : > { %v427_v52 = vpop.permute.xlu1 %426  ;;  %v861_v49 = vmul.f32 0.6931472, %v2099_v47  ;;  %v745_v1 = vmax.f32 %v2597_v6, 0.0  ;;  %vm757_vm8 = vcmp.ne.f32.partialorder %v2576_v26, %v2576_v26  ;;  %vm759_vm10 = vcmp.ne.f32.partialorder %v2573_v24, %v2573_v24 }
 0x101   : > { %2110 = vlog2.f32 %v850_v15  ;;  %v463_v33 = vmul.f32 %v2469_v60, %v427_v52  ;;  %v854_v47 = vadd.f32 1.0, %v853_v32  ;;  %v578_v11 = vadd.f32 %v562_v61, %v478_v38 }
 0x102   : > { %v2633_v3 = vpop.eup %2100  ;;  %v867_v22 = vsel %vm2642_vm2, %v864_v18, %v861_v49  ;;  %vm2681_vm5 = vcmp.lt.f32.partialorder %v856_v19, 0.0004427343  ;;  %vm758_vm11 = vcmp.ne.f32.partialorder %v2590_v46, %v2590_v46  ;;  %vm760_vm14 = vcmp.ne.f32.partialorder %v2587_v44, %v2587_v44 }
 0x103   : > { %v2640_v12 = vpop.eup %2102  ;;  %v895_v55 = vadd.f32 1.0, %v2633_v3  ;;  %v898_v15 = vmul.f32 -0.5, %v2633_v3  ;;  %v995_v9 = vadd.f32 %v867_v22, %v739_v59  ;;  %v901_v18 = vand.u32 2147483647, %v2633_v3 }
 0x104   : > { %v877_v5 = vadd.f32 1.0, %v2640_v12  ;;  %v880_v36 = vmul.f32 -0.5, %v2640_v12  ;;  %vm761_vm15 = vcmp.ne.f32.partialorder %v2597_v6, %v2597_v6 }
 0x105   : > { %v519_v57 = vpop.permute.xlu1 %518  ;;  %2112 = vlog2.f32 %v895_v55  ;;  %v883_v55 = vand.u32 2147483647, %v2640_v12  ;;  %v899_v61 = vadd.f32 1.0, %v898_v15  ;;  %vm2705_vm7 = vcmp.lt.f32.partialorder %v901_v18, 0.0004427343 }
 0x106   : > { %v2661_v31 = vpop.eup %2104  ;;  %v561_v41 = vmul.f32 %v2474_v63, %v519_v57  ;;  %2114 = vlog2.f32 %v877_v5 }
 0x107   : > { %v2665_v37 = vpop.eup %2106  ;;  %v904_v40 = vadd.f32 1.0, %v2661_v31  ;;  %v907_v52 = vmul.f32 -0.5, %v2661_v31  ;;  %vm2701_vm6 = vcmp.lt.f32.partialorder %v883_v55, 0.0004427343 }
 0x108   : > { %v577_v42 = vadd.f32 %v561_v41, %v477_v10  ;;  %v886_v30 = vadd.f32 1.0, %v2665_v37  ;;  %v479_v10 = vadd.f32 %v463_v33, %v379_v35  ;;  %v855_v35 = vmul.f32 %v2616_v17, %v854_v47 }
 0x109   : > { %v527_v43 = vpop.permute.xlu1 %526  ;;  %2116 = vlog2.f32 %v904_v40  ;;  %v889_v32 = vmul.f32 -0.5, %v2665_v37  ;;  %v892_v38 = vand.u32 2147483647, %v2665_v37  ;;  %v908_v41 = vadd.f32 1.0, %v907_v52 }
 0x10a   : > { %v677_v34 = vadd.f32 %v661_v20, %v577_v42  ;;  %2118 = vlog2.f32 %v886_v30  ;;  %v881_v20 = vadd.f32 1.0, %v880_v36  ;;  %v1011_v40 = vsel %vm755_vm3, %v2523_v56, %v995_v9 }
 0x10b   : > { %v2677_v49 = vpop.eup %2108  ;;  %v563_v42 = vmul.f32 %v2474_v63, %v527_v43  ;;  %v900_v52 = vmul.f32 %v2633_v3, %v899_v61  ;;  %vm2716_vm9 = vcmp.lt.f32.partialorder %v892_v38, 0.0004427343  ;;  %v909_v55 = vmul.f32 %v2661_v31, %v908_v41 }
 0x10c   : > { %v710_v5 = vmul.f32 %v2487_v13, %v677_v34  ;;  %v913_v59 = vadd.f32 1.0, %v2677_v49  ;;  %v882_v56 = vmul.f32 %v2640_v12, %v881_v20  ;;  %v890_v34 = vadd.f32 1.0, %v889_v32 }
 0x10d   : > { %v531_v57 = vpop.permute.xlu1 %530  ;;  %v910_v3 = vand.u32 2147483647, %v2661_v31  ;;  %v579_v51 = vadd.f32 %v563_v42, %v479_v10 }
 0x10e   : > { %v2111_v33 = vpop.eup %2110  ;;  %v2693_v19 = vadd.f32 %v2493_v16, %v710_v5  ;;  %v564_v22 = vmul.f32 %v2474_v63, %v531_v57  ;;  %2120 = vlog2.f32 %v913_v59  ;;  %v891_v41 = vmul.f32 %v2665_v37, %v890_v34 }
 0x10f   : > { %v852_v17 = vmul.f32 0.6931472, %v2111_v33  ;;  %vm2759_vm12 = vcmp.lt.f32.partialorder %v910_v3, 0.0004427343 }
 0x110   : > { %v794_v15 = vand.u32 2147483647, %v2693_v19  ;;  %v580_v47 = vadd.f32 %v564_v22, %v480_v29  ;;  %vm762_vm0 = vcmp.ne.f32.partialorder %v2693_v19, %v2693_v19 }
 0x111   : > { %v858_v43 = vsel %vm2681_vm5, %v855_v35, %v852_v17  ;;  %v916_v35 = vmul.f32 -0.5, %v2677_v49 }
 0x112   : > { %v2113_v18 = vpop.eup %2112  ;;  %v810_v5 = vsub.f32 0.0, %v794_v15  ;;  %v680_v29 = vadd.f32 %v2638_v39, %v580_v47  ;;  %v623_v59 = vpop.permute.xlu1 %622  ;;  %v994_v12 = vadd.f32 %v858_v43, %v738_v2  ;;  %v919_v15 = vand.u32 2147483647, %v2677_v49 }
 0x113   : > { %v2115_v20 = vpop.eup %2114  ;;  %v662_v61 = vmul.f32 %v2483_v7, %v623_v59  ;;  %v897_v57 = vmul.f32 0.6931472, %v2113_v18  ;;  %v917_v36 = vadd.f32 1.0, %v916_v35 }
 0x114   : > { %v834_v32 = vmul.f32 1.442695, %v810_v5  ;;  %v713_v38 = vmul.f32 %v2487_v13, %v680_v29  ;;  %v1010_v2 = vsel %vm754_vm4, %v2561_v62, %v994_v12  ;;  %v879_v39 = vmul.f32 0.6931472, %v2115_v20 }
 0x115   : > { %v678_v31 = vadd.f32 %v662_v61, %v578_v11  ;;  %v1044_v10 = vpack.c.bf16 %v1011_v40, %v1010_v2  ;;  %v903_v33 = vsel %vm2705_vm7, %v900_v52, %v897_v57  ;;  %vm2772_vm13 = vcmp.lt.f32.partialorder %v919_v15, 0.0004427343 }
 0x116   : > { %v2117_v22 = vpop.eup %2116  ;;  %2122 = vpow2.f32 %v834_v32  ;;  %v2740_v42 = vadd.f32 %v2493_v16, %v713_v38  ;;  %v627_v17 = vpop.permute.xlu1 %626  ;;  %v885_v62 = vsel %vm2701_vm6, %v882_v56, %v879_v39  ;;  %v999_v34 = vadd.f32 %v903_v33, %v743_v48 }
 0x117   : > { %v2119_v47 = vpop.eup %2118  ;;  %v711_v11 = vmul.f32 %v2487_v13, %v678_v31  ;;  %v663_v40 = vmul.f32 %v2483_v7, %v627_v17  ;;  %1971 = vmatprep.mubr.bf16.mxu0 %v1044_v10  ;;  %v997_v37 = vadd.f32 %v885_v62, %v741_v14  ;;  %v906_v30 = vmul.f32 0.6931472, %v2117_v22 }
 0x118   : > { %v797_v52 = vand.u32 2147483647, %v2740_v42  ;;  %v888_v43 = vmul.f32 0.6931472, %v2119_v47  ;;  %v1015_v9 = vsel %vm759_vm10, %v2573_v24, %v999_v34  ;;  %v918_v35 = vmul.f32 %v2677_v49, %v917_v36  ;;  %v635_v34 = vpop.permute.xlu0 %634 }
 0x119   : > { %v2753_v56 = vadd.f32 %v2493_v16, %v711_v11  ;;  %v679_v18 = vadd.f32 %v663_v40, %v579_v51  ;;  %v1013_v5 = vsel %vm757_vm8, %v2576_v26, %v997_v37  ;;  %v912_v12 = vsel %vm2759_vm12, %v909_v55, %v906_v30 }
 0x11a   : > { %v813_v14 = vsub.f32 0.0, %v797_v52  ;;  %v1045_v59 = vpack.c.bf16 %v1013_v5, %v2654_v28  ;;  %v894_v48 = vsel %vm2716_vm9, %v891_v41, %v888_v43  ;;  %v1000_v2 = vadd.f32 %v912_v12, %v744_v21 }
 0x11b   : > { %v2121_v20 = vpop.eup %2120  ;;  %v795_v51 = vand.u32 2147483647, %v2753_v56  ;;  %v712_v61 = vmul.f32 %v2487_v13, %v679_v18  ;;  %v328_v57 = vpop.permute.xlu1 %327  ;;  %v998_v26 = vadd.f32 %v894_v48, %v742_v8  ;;  %v566_v30 = vmul.f32 %v2474_v63, %v2533_v4 }
 0x11c   : > { %v840_v28 = vmul.f32 1.442695, %v813_v14  ;;  %1972 = vmatmul.mubr.bf16.vlgmr.msra.gmra.mxu0 %v1045_v59  ;;  %v915_v55 = vmul.f32 0.6931472, %v2121_v20  ;;  %v1016_v21 = vsel %vm760_vm14, %v2587_v44, %v1000_v2  ;;  %v361_v44 = vmul.f32 %v2454_v53, %v328_v57 }
 0x11d   : > { %v811_v32 = vsub.f32 0.0, %v795_v51  ;;  %v2782_v38 = vadd.f32 %v2493_v16, %v712_v61  ;;  %v1014_v8 = vsel %vm758_vm11, %v2590_v46, %v998_v26  ;;  %v465_v14 = vmul.f32 %v2469_v60, %v2503_v23  ;;  %v647_v51 = vpop.permute.xlu0 %646 }
 0x11e   : > { %2124 = vpow2.f32 %v840_v28  ;;  %v1046_v39 = vpack.c.bf16 %v1015_v9, %v1014_v8  ;;  %v921_v24 = vsel %vm2772_vm13, %v918_v35, %v915_v55  ;;  %v381_v5 = vadd.f32 %v2465_v58, %v361_v44 }
 0x11f   : > { %v836_v31 = vmul.f32 1.442695, %v811_v32  ;;  %v796_v49 = vand.u32 2147483647, %v2782_v38  ;;  %v338_v10 = vpop.permute.xlu1 %337  ;;  %v1001_v41 = vadd.f32 %v921_v24, %v745_v1  ;;  %v362_v1 = vmul.f32 %v2454_v53, %v2440_v45 }
 0x120   : > { %1975 = vmatprep.mubr.bf16.mxu0 %v1046_v39  ;;  %v481_v12 = vadd.f32 %v465_v14, %v381_v5  ;;  %v665_v26 = vmul.f32 %v2483_v7, %v635_v34  ;;  %v468_v23 = vmul.f32 %v2469_v60, %v2508_v27  ;;  %v668_v35 = vmul.f32 %v2483_v7, %v647_v51 }
 0x121   : > { %2126 = vpow2.f32 %v836_v31  ;;  %v812_v46 = vsub.f32 0.0, %v796_v49  ;;  %v1017_v33 = vsel %vm761_vm15, %v2597_v6, %v1001_v41  ;;  %v382_v40 = vadd.f32 %v2465_v58, %v362_v1 }
 0x122   : > { %v1047_v22 = vpack.c.bf16 %v1017_v33, %v1016_v21  ;;  %v746_v8 = vmax.f32 %v2693_v19, 0.0  ;;  %v363_v39 = vmul.f32 %v2454_v53, %v338_v10  ;;  %v747_v41 = vmax.f32 %v2753_v56, 0.0 }
 0x123   : > { %v2801_v17 = vpop.eup %2122  ;;  %v838_v62 = vmul.f32 1.442695, %v812_v46  ;;  %v343_v15 = vpop.permute.xlu1 %342  ;;  %v749_v46 = vmax.f32 %v2740_v42, 0.0  ;;  %vm763_vm1 = vcmp.ne.f32.partialorder %v2753_v56, %v2753_v56  ;;  %vm764_vm6 = vcmp.ne.f32.partialorder %v2782_v38, %v2782_v38 }
 0x124   : > { %1976 = vmatmul.mubr.bf16.gmra.mxu0 %v1047_v22  ;;  %v922_v47 = vadd.f32 1.0, %v2801_v17  ;;  %v364_v59 = vmul.f32 %v2454_v53, %v343_v15  ;;  %v925_v61 = vmul.f32 -0.5, %v2801_v17  ;;  %v928_v31 = vand.u32 2147483647, %v2801_v17 }
 0x125   : > { %2128 = vpow2.f32 %v838_v62  ;;  %v748_v53 = vmax.f32 %v2782_v38, 0.0  ;;  %vm765_vm7 = vcmp.ne.f32.partialorder %v2740_v42, %v2740_v42 }
 0x126   : > { %2130 = vlog2.f32 %v922_v47  ;;  %v384_v28 = vadd.f32 %v2465_v58, %v364_v59  ;;  %v926_v24 = vadd.f32 1.0, %v925_v61  ;;  %vm2855_vm2 = vcmp.lt.f32.partialorder %v928_v31, 0.0004427343 }
 0x128   : > { %v439_v11 = vpop.permute.xlu1 %438  ;;  %v484_v62 = vadd.f32 %v468_v23, %v384_v28 }
 0x129   : > { %v466_v37 = vmul.f32 %v2469_v60, %v439_v11 }
 0x12b   : > { %v2809_v6 = vpop.eup %2124  ;;  %v482_v52 = vadd.f32 %v466_v37, %v382_v40  ;;  %v383_v37 = vadd.f32 %v2465_v58, %v363_v39 }
 0x12c   : > { %v443_v43 = vpop.permute.xlu1 %442  ;;  %v949_v45 = vadd.f32 1.0, %v2809_v6  ;;  %v952_v2 = vmul.f32 -0.5, %v2809_v6  ;;  %v955_v21 = vand.u32 2147483647, %v2809_v6 }
 0x12d   : > { %v2814_v36 = vadd.f32 %v566_v30, %v482_v52  ;;  %v467_v33 = vmul.f32 %v2469_v60, %v443_v43  ;;  %v927_v60 = vmul.f32 %v2801_v17, %v926_v24 }
 0x12e   : > { %v2816_v18 = vpop.eup %2126  ;;  %2132 = vlog2.f32 %v949_v45  ;;  %v953_v11 = vadd.f32 1.0, %v952_v2  ;;  %vm2861_vm3 = vcmp.lt.f32.partialorder %v955_v21, 0.0004427343 }
 0x12f   : > { %v931_v29 = vadd.f32 1.0, %v2816_v18  ;;  %v934_v49 = vmul.f32 -0.5, %v2816_v18  ;;  %v937_v45 = vand.u32 2147483647, %v2816_v18  ;;  %v483_v34 = vadd.f32 %v467_v33, %v383_v37 }
 0x130   : > { %v954_v51 = vmul.f32 %v2809_v6, %v953_v11 }
 0x131   : > { %v535_v4 = vpop.permute.xlu1 %534  ;;  %2134 = vlog2.f32 %v931_v29  ;;  %v935_v30 = vadd.f32 1.0, %v934_v49  ;;  %vm938_vm4 = vcmp.lt.f32.partialorder %v937_v45, 0.0004427343 }
 0x132   : > { %v2823_v48 = vpop.eup %2128  ;;  %v565_v20 = vmul.f32 %v2474_v63, %v535_v4 }
 0x133   : > { %v940_v57 = vadd.f32 1.0, %v2823_v48  ;;  %v2131_v55 = vpop.eup %2130  ;;  %v943_v47 = vmul.f32 -0.5, %v2823_v48  ;;  %v946_v17 = vand.u32 2147483647, %v2823_v48 }
 0x134   : > { %v581_v3 = vadd.f32 %v565_v20, %v481_v12  ;;  %v924_v15 = vmul.f32 0.6931472, %v2131_v55 }
 0x135   : > { %v543_v9 = vpop.permute.xlu1 %542  ;;  %2136 = vlog2.f32 %v940_v57  ;;  %v944_v20 = vadd.f32 1.0, %v943_v47  ;;  %vm2874_vm5 = vcmp.lt.f32.partialorder %v946_v17, 0.0004427343 }
 0x136   : > { %v681_v32 = vadd.f32 %v665_v26, %v581_v3  ;;  %v930_v5 = vsel %vm2855_vm2, %v927_v60, %v924_v15  ;;  %v567_v61 = vmul.f32 %v2474_v63, %v543_v9  ;;  %v936_v3 = vmul.f32 %v2816_v18, %v935_v30 }
 0x137   : > { %v1002_v55 = vadd.f32 %v930_v5, %v746_v8  ;;  %v945_v24 = vmul.f32 %v2823_v48, %v944_v20 }
 0x138   : > { %v714_v27 = vmul.f32 %v2487_v13, %v681_v32  ;;  %v583_v8 = vadd.f32 %v567_v61, %v483_v34 }
 0x139   : > { %v547_v22 = vpop.permute.xlu1 %546  ;;  %v1018_v21 = vsel %vm762_vm0, %v2693_v19, %v1002_v55 }
 0x13a   : > { %v2845_v10 = vadd.f32 %v2493_v16, %v714_v27  ;;  %v568_v1 = vmul.f32 %v2474_v63, %v547_v22 }
 0x13b   : > { %v2133_v40 = vpop.eup %2132 }
 0x13c   : > { %v798_v52 = vand.u32 2147483647, %v2845_v10  ;;  %v584_v43 = vadd.f32 %v568_v1, %v484_v62  ;;  %v951_v29 = vmul.f32 0.6931472, %v2133_v40  ;;  %vm766_vm11 = vcmp.ne.f32.partialorder %v2845_v10, %v2845_v10 }
 0x13e   : > { %v2135_v14 = vpop.eup %2134  ;;  %v814_v59 = vsub.f32 0.0, %v798_v52  ;;  %v684_v4 = vadd.f32 %v668_v35, %v584_v43  ;;  %v639_v12 = vpop.permute.xlu1 %638  ;;  %v957_v63 = vsel %vm2861_vm3, %v954_v51, %v951_v29 }
 0x13f   : > { %v666_v57 = vmul.f32 %v2483_v7, %v639_v12  ;;  %v933_v26 = vmul.f32 0.6931472, %v2135_v14  ;;  %v1005_v33 = vadd.f32 %v957_v63, %v749_v46 }
 0x140   : > { %v842_v23 = vmul.f32 1.442695, %v814_v59  ;;  %v717_v28 = vmul.f32 %v2487_v13, %v684_v4 }
 0x141   : > { %v682_v32 = vadd.f32 %v666_v57, %v2814_v36  ;;  %v939_v2 = vsel %vm938_vm4, %v936_v3, %v933_v26  ;;  %v1021_v11 = vsel %vm765_vm7, %v2740_v42, %v1005_v33 }
 0x142   : > { %v2137_v6 = vpop.eup %2136  ;;  %2138 = vpow2.f32 %v842_v23  ;;  %v2881_v9 = vadd.f32 %v2493_v16, %v717_v28  ;;  %v643_v18 = vpop.permute.xlu1 %642  ;;  %v1003_v39 = vadd.f32 %v939_v2, %v747_v41  ;;  %v750_v2 = vmax.f32 %v2845_v10, 0.0 }
 0x143   : > { %v715_v36 = vmul.f32 %v2487_v13, %v682_v32  ;;  %v667_v31 = vmul.f32 %v2483_v7, %v643_v18  ;;  %v942_v49 = vmul.f32 0.6931472, %v2137_v6 }
 0x144   : > { %v801_v27 = vand.u32 2147483647, %v2881_v9  ;;  %v1019_v41 = vsel %vm763_vm1, %v2753_v56, %v1003_v39  ;;  %vm769_vm15 = vcmp.ne.f32.partialorder %v2881_v9, %v2881_v9 }
 0x145   : > { %v2896_v48 = vadd.f32 %v2493_v16, %v715_v36  ;;  %v683_v22 = vadd.f32 %v667_v31, %v583_v8  ;;  %v1048_v62 = vpack.c.bf16 %v1019_v41, %v1018_v21  ;;  %v948_v7 = vsel %vm2874_vm5, %v945_v24, %v942_v49 }
 0x146   : > { %v817_v15 = vsub.f32 0.0, %v801_v27  ;;  %v1004_v1 = vadd.f32 %v948_v7, %v748_v53  ;;  %v753_v21 = vmax.f32 %v2881_v9, 0.0 }
 0x147   : > { %v799_v47 = vand.u32 2147483647, %v2896_v48  ;;  %v716_v19 = vmul.f32 %v2487_v13, %v683_v22  ;;  %1979 = vmatprep.mubr.bf16.mxu0 %v1048_v62  ;;  %v751_v35 = vmax.f32 %v2896_v48, 0.0  ;;  %vm767_vm12 = vcmp.ne.f32.partialorder %v2896_v48, %v2896_v48 }
 0x148   : > { %v848_v56 = vmul.f32 1.442695, %v817_v15  ;;  %v1020_v46 = vsel %vm764_vm6, %v2782_v38, %v1004_v1 }
 0x149   : > { %v815_v40 = vsub.f32 0.0, %v799_v47  ;;  %v2909_v37 = vadd.f32 %v2493_v16, %v716_v19  ;;  %v1049_v53 = vpack.c.bf16 %v1021_v11, %v1020_v46 }
 0x14a   : > { %2140 = vpow2.f32 %v848_v56 }
 0x14b   : > { %v844_v60 = vmul.f32 1.442695, %v815_v40  ;;  %v800_v13 = vand.u32 2147483647, %v2909_v37  ;;  %1980 = vmatmul.mubr.bf16.gmra.mxu0 %v1049_v53  ;;  %v752_v41 = vmax.f32 %v2909_v37, 0.0  ;;  %vm768_vm14 = vcmp.ne.f32.partialorder %v2909_v37, %v2909_v37  ;;  %v2078_v40 = vld [vmem:[%s3368_s3 + $0x68] sm:$0xff]  }
 0x14c   : > { %v2081_v53 = vld [vmem:[%s3368_s3 + $0x50] sm:$0xff]  }
 0x14d   : > { %2142 = vpow2.f32 %v844_v60  ;;  %v816_v44 = vsub.f32 0.0, %v800_v13  ;;  %v2082_v60 = vld [vmem:[%s3368_s3 + $0x48] sm:$0xff]   ;;  %v2083_v13 = vld [vmem:[%s3368_s3 + $0x40] sm:$0xff]  }
 0x14f   : > { %v2139_v30 = vpop.eup %2138  ;;  %v846_v52 = vmul.f32 1.442695, %v816_v44  ;;  %v1883_v44 = vld [vmem:[%s3369_s4 + $0x8] sm:$0xff] }
 0x150   : > { %v958_v43 = vadd.f32 1.0, %v2139_v30  ;;  %v961_v34 = vmul.f32 -0.5, %v2139_v30  ;;  %v964_v4 = vand.u32 2147483647, %v2139_v30 }
 0x151   : > { %2144 = vpow2.f32 %v846_v52  ;;  %v1203_v52 = vrot.slane %v1883_v44, 1 }
 0x152   : > { %2146 = vlog2.f32 %v958_v43  ;;  %v962_v29 = vadd.f32 1.0, %v961_v34  ;;  %vm965_vm8 = vcmp.lt.f32.partialorder %v964_v4, 0.0004427343 }
 0x154   : > { %v963_v51 = vmul.f32 %v2139_v30, %v962_v29  ;;  %v1201_v30 = vmul.f32 %v1883_v44, %v2409_v25 }
 0x156   : > { %v1205_v43 = vadd.f32 %v1203_v52, %v1201_v30 }
 0x157   : > { %v2141_v38 = vpop.eup %2140 }
 0x158   : > { %v985_v45 = vadd.f32 1.0, %v2141_v38  ;;  %v988_v59 = vmul.f32 -0.5, %v2141_v38  ;;  %v991_v23 = vand.u32 2147483647, %v2141_v38 }
 0x15a   : > { %v2143_v42 = vpop.eup %2142  ;;  %2148 = vlog2.f32 %v985_v45  ;;  %v989_v26 = vadd.f32 1.0, %v988_v59  ;;  %vm992_vm10 = vcmp.lt.f32.partialorder %v991_v23, 0.0004427343 }
 0x15b   : > { %v967_v58 = vadd.f32 1.0, %v2143_v42  ;;  %v970_v14 = vmul.f32 -0.5, %v2143_v42  ;;  %v973_v3 = vand.u32 2147483647, %v2143_v42 }
 0x15c   : > { %v990_v39 = vmul.f32 %v2141_v38, %v989_v26  ;;  %v1892_v38 = vmul.f32 -1.442695, %v1205_v43 }
 0x15d   : > { %2150 = vlog2.f32 %v967_v58  ;;  %v971_v61 = vadd.f32 1.0, %v970_v14  ;;  %vm974_vm9 = vcmp.lt.f32.partialorder %v973_v3, 0.0004427343 }
 0x15e   : > { %v2145_v16 = vpop.eup %2144 }
 0x15f   : > { %v976_v5 = vadd.f32 1.0, %v2145_v16  ;;  %v2147_v17 = vpop.eup %2146  ;;  %v979_v57 = vmul.f32 -0.5, %v2145_v16  ;;  %v972_v6 = vmul.f32 %v2143_v42, %v971_v61  ;;  %v982_v8 = vand.u32 2147483647, %v2145_v16 }
 0x160   : > { %v960_v12 = vmul.f32 0.6931472, %v2147_v17 }
 0x161   : > { %2152 = vlog2.f32 %v976_v5  ;;  %v980_v18 = vadd.f32 1.0, %v979_v57  ;;  %vm983_vm13 = vcmp.lt.f32.partialorder %v982_v8, 0.0004427343 }
 0x162   : > { %v966_v28 = vsel %vm965_vm8, %v963_v51, %v960_v12  ;;  %2154 = vpow2.f32 %v1892_v38 }
 0x163   : > { %v1006_v24 = vadd.f32 %v966_v28, %v750_v2  ;;  %v981_v22 = vmul.f32 %v2145_v16, %v980_v18  ;;  %v2957_v16 = vrot.slane %v1883_v44, %v2449_v50 }
 0x165   : > { %v1022_v62 = vsel %vm766_vm11, %v2845_v10, %v1006_v24  ;;  %v2076_v10 = vld [vmem:[%s3368_s3 + $0x78] sm:$0xff]  }
 0x166   : > { %1987 = vmatprep.subr.bf16.mxu1 %v2076_v10 }
 0x167   : > { %v2149_v20 = vpop.eup %2148  ;;  %1988 = vmatpush3.bf16.msra.mxu1 %v2076_v10 }
 0x168   : > { %v987_v55 = vmul.f32 0.6931472, %v2149_v20 }
 0x16a   : > { %v2151_v32 = vpop.eup %2150  ;;  %v993_v31 = vsel %vm992_vm10, %v990_v39, %v987_v55 }
 0x16b   : > { %v969_v63 = vmul.f32 0.6931472, %v2151_v32  ;;  %v1009_v15 = vadd.f32 %v993_v31, %v753_v21 }
 0x16d   : > { %v975_v36 = vsel %vm974_vm9, %v972_v6, %v969_v63  ;;  %v1025_v46 = vsel %vm769_vm15, %v2881_v9, %v1009_v15  ;;  %v2079_v9 = vld [vmem:[%s3368_s3 + $0x60] sm:$0xff]  }
 0x16e   : > { %v2153_v49 = vpop.eup %2152  ;;  %v1007_v27 = vadd.f32 %v975_v36, %v751_v35 }
 0x16f   : > { %v978_v33 = vmul.f32 0.6931472, %v2153_v49  ;;  %v2155_v45 = vpop.eup %2154 }
 0x170   : > { %v1023_v7 = vsel %vm767_vm12, %v2896_v48, %v1007_v27  ;;  %v2077_v48 = vld [vmem:[%s3368_s3 + $0x70] sm:$0xff]   ;;  %v1209_v42 = vadd.f32 1.0, %v2155_v45 }
 0x171   : > { %v1050_v1 = vpack.c.bf16 %v1023_v7, %v1022_v62  ;;  %v984_v47 = vsel %vm983_vm13, %v981_v22, %v978_v33  ;;  %1989 = vmatprep.subr.bf16.mxu1 %v2077_v48 }
 0x172   : > { %v1008_v19 = vadd.f32 %v984_v47, %v752_v41  ;;  %1990 = vmatpush3.bf16.msra.mxu1 %v2077_v48  ;;  %2156 = vrcp.f32 %v1209_v42 }
 0x173   : > { %1983 = vmatprep.mubr.bf16.mxu0 %v1050_v1  ;;  %1991 = vmatprep.subr.bf16.mxu1 %v2078_v40  ;;  %2158 = vtanh.f32 %v1201_v30 }
 0x174   : > { %v1024_v56 = vsel %vm768_vm14, %v2909_v37, %v1008_v19  ;;  %v2080_v37 = vld [vmem:[%s3368_s3 + $0x58] sm:$0xff]  }
 0x175   : > { %v1051_v11 = vpack.c.bf16 %v1025_v46, %v1024_v56 }
 0x176   : > { %1992 = vmatpush3.bf16.msra.mxu1 %v2078_v40 }
 0x177   : > { %1984 = vmatmul.mubr.bf16.gmra.mxu0 %v1051_v11  ;;  %1993 = vmatprep.subr.bf16.mxu1 %v2079_v9 }
 0x17a   : > { %1994 = vmatpush3.bf16.msra.mxu1 %v2079_v9 }
 0x17b   : > { %1995 = vmatprep.subr.bf16.mxu1 %v2080_v37 }
 0x17e   : > { %1996 = vmatpush3.bf16.msra.mxu1 %v2080_v37 }
 0x17f   : > { %1997 = vmatprep.subr.bf16.mxu1 %v2081_v53  ;;  %v2157_v58 = vpop.eup %2156 }
 0x180   : > { %v2159_v34 = vpop.eup %2158  ;;  %v2960_v5 = vrot.slane %v2157_v58, %v2456_v54 }
 0x181   : > { %v2964_v14 = vrot.slane %v2159_v34, %v2476_v0 }
 0x182   : > { %1998 = vmatpush3.bf16.msra.mxu1 %v2081_v53 }
 0x183   : > { %1999 = vmatprep.subr.bf16.mxu1 %v2082_v60 }
 0x186   : > { %2000 = vmatpush3.bf16.msra.mxu1 %v2082_v60 }
 0x187   : > { %2001 = vmatprep.subr.bf16.mxu1 %v2083_v13 }
 0x18a   : > { %2002 = vmatpush3.bf16.msra.mxu1 %v2083_v13 }
 0x1dc   : > { %v1973_v17 = vpop.f32.mrf.mxu0 }
 0x1dd   : > { %v1147_v29 = vadd.f32 %v1973_v17, %v2957_v16 }
 0x1de   : > { %v1138_v59 = vpop.f32.mrf.mxu0 }
 0x1df   : > { %v1219_v4 = vmul.f32 %v2960_v5, %v1147_v29  ;;  %v1139_v12 = vadd.f32 %v1138_v59, %v2957_v16 }
 0x1e0   : > { %v1974_v20 = vpop.f32.mrf.mxu0 }
 0x1e1   : > { %v2969_v51 = vadd.f32 %v2964_v14, %v1219_v4  ;;  %v1217_v61 = vmul.f32 %v2960_v5, %v1139_v12  ;;  %v1150_v57 = vadd.f32 %v1974_v20, %v2957_v16 }
 0x1e2   : > { %v1141_v26 = vpop.f32.mrf.mxu0 }
 0x1e3   : > { %v1303_v3 = vand.u32 2147483647, %v2969_v51  ;;  %v2975_v23 = vadd.f32 %v2964_v14, %v1217_v61  ;;  %v1220_v28 = vmul.f32 %v2960_v5, %v1150_v57  ;;  %v1142_v55 = vadd.f32 %v1141_v26, %v2957_v16 }
 0x1e4   : > { %v1977_v32 = vpop.f32.mrf.mxu0  ;;  %vm1271_vm3 = vcmp.ne.f32.partialorder %v2969_v51, %v2969_v51 }
 0x1e5   : > { %v1319_v2 = vsub.f32 0.0, %v1303_v3  ;;  %v1301_v35 = vand.u32 2147483647, %v2975_v23  ;;  %v2981_v63 = vadd.f32 %v2964_v14, %v1220_v28  ;;  %v1218_v6 = vmul.f32 %v2960_v5, %v1142_v55 }
 0x1e6   : > { %v1163_v18 = vadd.f32 %v1977_v32, %v2957_v16  ;;  %v1154_v39 = vpop.f32.mrf.mxu0  ;;  %v1253_v32 = vmax.f32 %v2975_v23, 0.0  ;;  %vm1269_vm2 = vcmp.ne.f32.partialorder %v2975_v23, %v2975_v23 }
 0x1e7   : > { %v1337_v24 = vmul.f32 1.442695, %v1319_v2  ;;  %v1317_v8 = vsub.f32 0.0, %v1301_v35  ;;  %v1304_v36 = vand.u32 2147483647, %v2981_v63  ;;  %v2987_v31 = vadd.f32 %v2964_v14, %v1218_v6 }
 0x1e8   : > { %v1223_v49 = vmul.f32 %v2960_v5, %v1163_v18  ;;  %v1155_v27 = vadd.f32 %v1154_v39, %v2957_v16  ;;  %v1978_v21 = vpop.f32.mrf.mxu0  ;;  %v1255_v2 = vmax.f32 %v2969_v51, 0.0  ;;  %v1256_v35 = vmax.f32 %v2981_v63, 0.0 }
 0x1e9   : > { %2160 = vpow2.f32 %v1337_v24  ;;  %v1333_v41 = vmul.f32 1.442695, %v1317_v8  ;;  %v1320_v33 = vsub.f32 0.0, %v1304_v36  ;;  %v1302_v22 = vand.u32 2147483647, %v2987_v31 }
 0x1ea   : > { %v2993_v62 = vadd.f32 %v2964_v14, %v1223_v49  ;;  %v1221_v7 = vmul.f32 %v2960_v5, %v1155_v27  ;;  %v1166_v15 = vadd.f32 %v1978_v21, %v2957_v16  ;;  %v1157_v1 = vpop.f32.mrf.mxu0  ;;  %v1254_v39 = vmax.f32 %v2987_v31, 0.0 }
 0x1eb   : > { %2162 = vpow2.f32 %v1333_v41  ;;  %v1339_v47 = vmul.f32 1.442695, %v1320_v33  ;;  %v1318_v19 = vsub.f32 0.0, %v1302_v22  ;;  %v1158_v56 = vadd.f32 %v1157_v1, %v2957_v16 }
 0x1ec   : > { %v1307_v46 = vand.u32 2147483647, %v2993_v62  ;;  %v3000_v11 = vadd.f32 %v2964_v14, %v1221_v7  ;;  %v1224_v10 = vmul.f32 %v2960_v5, %v1166_v15  ;;  %v1259_v36 = vmax.f32 %v2993_v62, 0.0 }
 0x1ed   : > { %2164 = vpow2.f32 %v1339_v47  ;;  %v1335_v48 = vmul.f32 1.442695, %v1318_v19  ;;  %v1222_v40 = vmul.f32 %v2960_v5, %v1158_v56  ;;  %vm1272_vm4 = vcmp.ne.f32.partialorder %v2981_v63, %v2981_v63 }
 0x1ee   : > { %v1323_v9 = vsub.f32 0.0, %v1307_v46  ;;  %v1305_v37 = vand.u32 2147483647, %v3000_v11  ;;  %v3006_v53 = vadd.f32 %v2964_v14, %v1224_v10  ;;  %v1257_v8 = vmax.f32 %v3000_v11, 0.0 }
 0x1ef   : > { %2166 = vpow2.f32 %v1335_v48  ;;  %v3009_v60 = vadd.f32 %v2964_v14, %v1222_v40  ;;  %vm1270_vm7 = vcmp.ne.f32.partialorder %v2987_v31, %v2987_v31  ;;  %vm1273_vm12 = vcmp.ne.f32.partialorder %v3000_v11, %v3000_v11 }
 0x1f0   : > { %v1345_v13 = vmul.f32 1.442695, %v1323_v9  ;;  %v1321_v44 = vsub.f32 0.0, %v1305_v37  ;;  %v1308_v30 = vand.u32 2147483647, %v3006_v53  ;;  %v1260_v15 = vmax.f32 %v3006_v53, 0.0 }
 0x1f1   : > { %v1306_v52 = vand.u32 2147483647, %v3009_v60  ;;  %vm1274_vm13 = vcmp.ne.f32.partialorder %v3009_v60, %v3009_v60  ;;  %vm1276_vm14 = vcmp.ne.f32.partialorder %v3006_v53, %v3006_v53  ;;  %vm1275_vm15 = vcmp.ne.f32.partialorder %v2993_v62, %v2993_v62 }
 0x1f2   : > { %2168 = vpow2.f32 %v1345_v13  ;;  %v1341_v43 = vmul.f32 1.442695, %v1321_v44  ;;  %v1324_v38 = vsub.f32 0.0, %v1308_v30 }
 0x1f3   : > { %v1322_v45 = vsub.f32 0.0, %v1306_v52 }
 0x1f4   : > { %2170 = vpow2.f32 %v1341_v43  ;;  %v1347_v42 = vmul.f32 1.442695, %v1324_v38 }
 0x1f5   : > { %v1343_v58 = vmul.f32 1.442695, %v1322_v45 }
 0x1f6   : > { %v2161_v34 = vpop.eup %2160  ;;  %2172 = vpow2.f32 %v1347_v42 }
 0x1f7   : > { %2174 = vpow2.f32 %v1343_v58  ;;  %v1383_v17 = vadd.f32 1.0, %v2161_v34  ;;  %v1386_v57 = vmul.f32 -0.5, %v2161_v34  ;;  %v1389_v55 = vand.u32 2147483647, %v2161_v34 }
 0x1f8   : > { %v2163_v29 = vpop.eup %2162 }
 0x1f9   : > { %v1365_v59 = vadd.f32 1.0, %v2163_v29  ;;  %2176 = vlog2.f32 %v1383_v17  ;;  %v1368_v3 = vmul.f32 -0.5, %v2163_v29  ;;  %v1371_v28 = vand.u32 2147483647, %v2163_v29 }
 0x1fa   : > { %v2165_v4 = vpop.eup %2164  ;;  %v1387_v27 = vadd.f32 1.0, %v1386_v57  ;;  %vm3031_vm1 = vcmp.lt.f32.partialorder %v1389_v55, 0.0004427343 }
 0x1fb   : > { %2178 = vlog2.f32 %v1365_v59  ;;  %v1392_v12 = vadd.f32 1.0, %v2165_v4  ;;  %v1395_v24 = vmul.f32 -0.5, %v2165_v4  ;;  %v1369_v33 = vadd.f32 1.0, %v1368_v3 }
 0x1fc   : > { %v2167_v20 = vpop.eup %2166  ;;  %vm3027_vm0 = vcmp.lt.f32.partialorder %v1371_v28, 0.0004427343  ;;  %v1398_v47 = vand.u32 2147483647, %v2165_v4  ;;  %v1388_v13 = vmul.f32 %v2161_v34, %v1387_v27 }
 0x1fd   : > { %v1374_v61 = vadd.f32 1.0, %v2167_v20  ;;  %2180 = vlog2.f32 %v1392_v12  ;;  %v1377_v49 = vmul.f32 -0.5, %v2167_v20  ;;  %v1380_v46 = vand.u32 2147483647, %v2167_v20 }
 0x1fe   : > { %v1396_v10 = vadd.f32 1.0, %v1395_v24  ;;  %v1370_v45 = vmul.f32 %v2163_v29, %v1369_v33  ;;  %vm3047_vm5 = vcmp.lt.f32.partialorder %v1398_v47, 0.0004427343 }
 0x1ff   : > { %v3013_v26 = vpop.eup %2168  ;;  %2182 = vlog2.f32 %v1374_v61  ;;  %v1378_v37 = vadd.f32 1.0, %v1377_v49  ;;  %vm3052_vm6 = vcmp.lt.f32.partialorder %v1380_v46, 0.0004427343 }
 0x200   : > { %v1419_v6 = vadd.f32 1.0, %v3013_v26  ;;  %v1422_v19 = vmul.f32 -0.5, %v3013_v26  ;;  %v1425_v44 = vand.u32 2147483647, %v3013_v26  ;;  %v1397_v12 = vmul.f32 %v2165_v4, %v1396_v10 }
 0x201   : > { %v3019_v18 = vpop.eup %2170  ;;  %v1379_v61 = vmul.f32 %v2167_v20, %v1378_v37 }
 0x202   : > { %v1401_v21 = vadd.f32 1.0, %v3019_v18  ;;  %2184 = vlog2.f32 %v1419_v6  ;;  %v1404_v48 = vmul.f32 -0.5, %v3019_v18  ;;  %v1407_v58 = vand.u32 2147483647, %v3019_v18 }
 0x203   : > { %v3025_v41 = vpop.eup %2172  ;;  %v1423_v34 = vadd.f32 1.0, %v1422_v19  ;;  %vm3063_vm8 = vcmp.lt.f32.partialorder %v1425_v44, 0.0004427343 }
 0x204   : > { %v2175_v1 = vpop.eup %2174  ;;  %2186 = vlog2.f32 %v1401_v21  ;;  %v1428_v56 = vadd.f32 1.0, %v3025_v41  ;;  %v1431_v43 = vmul.f32 -0.5, %v3025_v41  ;;  %v1405_v29 = vadd.f32 1.0, %v1404_v48 }
 0x205   : > { %v1410_v40 = vadd.f32 1.0, %v2175_v1  ;;  %v1413_v52 = vmul.f32 -0.5, %v2175_v1  ;;  %v1416_v3 = vand.u32 2147483647, %v2175_v1  ;;  %v1434_v28 = vand.u32 2147483647, %v3025_v41 }
 0x206   : > { %v2177_v9 = vpop.eup %2176  ;;  %2188 = vlog2.f32 %v1428_v56  ;;  %v1432_v4 = vadd.f32 1.0, %v1431_v43  ;;  %vm3068_vm9 = vcmp.lt.f32.partialorder %v1407_v58, 0.0004427343  ;;  %v3073_v47 = vmul.f32 %v3013_v26, %v1423_v34 }
 0x207   : > { %v1385_v30 = vmul.f32 0.6931472, %v2177_v9  ;;  %2190 = vlog2.f32 %v1410_v40  ;;  %v1414_v49 = vadd.f32 1.0, %v1413_v52  ;;  %v1406_v10 = vmul.f32 %v3019_v18, %v1405_v29 }
 0x208   : > { %v2179_v38 = vpop.eup %2178  ;;  %vm3084_vm10 = vcmp.lt.f32.partialorder %v1416_v3, 0.0004427343  ;;  %vm3088_vm11 = vcmp.lt.f32.partialorder %v1434_v28, 0.0004427343 }
 0x209   : > { %v1367_v17 = vmul.f32 0.6931472, %v2179_v38  ;;  %v1391_v57 = vsel %vm3031_vm1, %v1388_v13, %v1385_v30  ;;  %v1415_v44 = vmul.f32 %v2175_v1, %v1414_v49  ;;  %v1433_v30 = vmul.f32 %v3025_v41, %v1432_v4 }
 0x20a   : > { %v2181_v55 = vpop.eup %2180  ;;  %v1511_v46 = vadd.f32 %v1391_v57, %v1255_v2 }
 0x20b   : > { %v1981_v6 = vpop.f32.mrf.mxu0  ;;  %v1373_v24 = vsel %vm3027_vm0, %v1370_v45, %v1367_v17  ;;  %v1394_v33 = vmul.f32 0.6931472, %v2181_v55 }
 0x20c   : > { %v2183_v21 = vpop.eup %2182  ;;  %v1179_v20 = vadd.f32 %v1981_v6, %v2957_v16  ;;  %v1509_v56 = vadd.f32 %v1373_v24, %v1253_v32  ;;  %v1527_v41 = vsel %vm1271_vm3, %v2969_v51, %v1511_v46 }
 0x20d   : > { %v1170_v19 = vpop.f32.mrf.mxu0  ;;  %v1376_v22 = vmul.f32 0.6931472, %v2183_v21  ;;  %v1400_v9 = vsel %vm3047_vm5, %v1397_v12, %v1394_v33 }
 0x20e   : > { %v1227_v48 = vmul.f32 %v2960_v5, %v1179_v20  ;;  %v1171_v40 = vadd.f32 %v1170_v19, %v2957_v16  ;;  %v1512_v18 = vadd.f32 %v1400_v9, %v1256_v35  ;;  %v1525_v35 = vsel %vm1269_vm2, %v2975_v23, %v1509_v56 }
 0x20f   : > { %v2185_v32 = vpop.eup %2184  ;;  %v1982_v13 = vpop.f32.mrf.mxu0  ;;  %v1382_v2 = vsel %vm3052_vm6, %v1379_v61, %v1376_v22 }
 0x210   : > { %v3098_v52 = vadd.f32 %v2964_v14, %v1227_v48  ;;  %v1225_v43 = vmul.f32 %v2960_v5, %v1171_v40  ;;  %v1182_v38 = vadd.f32 %v1982_v13, %v2957_v16  ;;  %v1510_v45 = vadd.f32 %v1382_v2, %v1254_v39 }
 0x211   : > { %v2187_v42 = vpop.eup %2186  ;;  %v1173_v58 = vpop.f32.mrf.mxu0  ;;  %v1528_v1 = vsel %vm1272_vm4, %v2981_v63, %v1512_v18  ;;  %v1421_v34 = vmul.f32 0.6931472, %v2185_v32 }
 0x212   : > { %v1311_v39 = vand.u32 2147483647, %v3098_v52  ;;  %v3118_v17 = vadd.f32 %v2964_v14, %v1225_v43  ;;  %v1228_v59 = vmul.f32 %v2960_v5, %v1182_v38  ;;  %v1174_v23 = vadd.f32 %v1173_v58, %v2957_v16 }
 0x213   : > { %v2189_v12 = vpop.eup %2188  ;;  %v1526_v51 = vsel %vm1270_vm7, %v2987_v31, %v1510_v45  ;;  %v1561_v63 = vpack.c.bf16 %v1528_v1, %v1527_v41  ;;  %v1403_v29 = vmul.f32 0.6931472, %v2187_v42  ;;  %v1427_v61 = vsel %vm3063_vm8, %v3073_v47, %v1421_v34 }
 0x214   : > { %v2191_v57 = vpop.eup %2190  ;;  %v1327_v3 = vsub.f32 0.0, %v1311_v39  ;;  %v1309_v28 = vand.u32 2147483647, %v3118_v17  ;;  %v3133_v55 = vadd.f32 %v2964_v14, %v1228_v59  ;;  %v1226_v6 = vmul.f32 %v2960_v5, %v1174_v23 }
 0x215   : > { %v1560_v24 = vpack.c.bf16 %v1526_v51, %v1525_v35  ;;  %v1409_v49 = vsel %vm3068_vm9, %v1406_v10, %v1403_v29  ;;  %v1412_v31 = vmul.f32 0.6931472, %v2191_v57  ;;  %v1430_v4 = vmul.f32 0.6931472, %v2189_v12 }
 0x216   : > { %v1353_v21 = vmul.f32 1.442695, %v1327_v3  ;;  %v1325_v20 = vsub.f32 0.0, %v1309_v28  ;;  %v1312_v27 = vand.u32 2147483647, %v3133_v55  ;;  %v3140_v33 = vadd.f32 %v2964_v14, %v1226_v6 }
 0x217   : > { %2003 = vmatprep.mubr.bf16.mxu1 %v1560_v24  ;;  %v1258_v47 = vmax.f32 %v3009_v60, 0.0  ;;  %v1418_v19 = vsel %vm3084_vm10, %v1415_v44, %v1412_v31  ;;  %v1513_v22 = vadd.f32 %v1409_v49, %v1257_v8  ;;  %v1436_v7 = vsel %vm3088_vm11, %v1433_v30, %v1430_v4 }
 0x218   : > { %2192 = vpow2.f32 %v1353_v21  ;;  %v1349_v56 = vmul.f32 1.442695, %v1325_v20  ;;  %v1328_v46 = vsub.f32 0.0, %v1312_v27  ;;  %v1310_v10 = vand.u32 2147483647, %v3140_v33  ;;  %2004 = vmatmul.mubr.bf16.vlgmr.msra.gmra.mxu1 %v1561_v63 }
 0x219   : > { %v1514_v48 = vadd.f32 %v1418_v19, %v1258_v47  ;;  %v1515_v40 = vadd.f32 %v1427_v61, %v1259_v36  ;;  %v1516_v9 = vadd.f32 %v1436_v7, %v1260_v15  ;;  %v1529_v37 = vsel %vm1273_vm12, %v3000_v11, %v1513_v22 }
 0x21a   : > { %2194 = vpow2.f32 %v1349_v56  ;;  %v1355_v8 = vmul.f32 1.442695, %v1328_v46  ;;  %v1326_v26 = vsub.f32 0.0, %v1310_v10  ;;  %v1261_v51 = vmax.f32 %v3118_v17, 0.0 }
 0x21b   : > { %v1530_v32 = vsel %vm1274_vm13, %v3009_v60, %v1514_v48  ;;  %v1532_v13 = vsel %vm1276_vm14, %v3006_v53, %v1516_v9  ;;  %v1531_v15 = vsel %vm1275_vm15, %v2993_v62, %v1515_v40  ;;  %v1262_v63 = vmax.f32 %v3140_v33, 0.0 }
 0x21c   : > { %2196 = vpow2.f32 %v1355_v8  ;;  %v1351_v36 = vmul.f32 1.442695, %v1326_v26  ;;  %v1562_v2 = vpack.c.bf16 %v1530_v32, %v1529_v37  ;;  %v1563_v18 = vpack.c.bf16 %v1532_v13, %v1531_v15 }
 0x21d   : > { %v1264_v28 = vmax.f32 %v3133_v55, 0.0  ;;  %vm1277_vm1 = vcmp.ne.f32.partialorder %v3118_v17, %v3118_v17  ;;  %vm1278_vm5 = vcmp.ne.f32.partialorder %v3140_v33, %v3140_v33  ;;  %vm1280_vm6 = vcmp.ne.f32.partialorder %v3133_v55, %v3133_v55 }
 0x21e   : > { %2198 = vpow2.f32 %v1351_v36  ;;  %2007 = vmatprep.mubr.bf16.mxu1 %v1562_v2  ;;  %vm1279_vm7 = vcmp.ne.f32.partialorder %v3098_v52, %v3098_v52 }
 0x220   : > { %2008 = vmatmul.mubr.bf16.gmra.mxu1 %v1563_v18 }
 0x225   : > { %v2193_v44 = vpop.eup %2192 }
 0x226   : > { %v1455_v30 = vadd.f32 1.0, %v2193_v44  ;;  %v1458_v58 = vmul.f32 -0.5, %v2193_v44  ;;  %v1461_v62 = vand.u32 2147483647, %v2193_v44 }
 0x227   : > { %v2195_v43 = vpop.eup %2194 }
 0x228   : > { %v1437_v11 = vadd.f32 1.0, %v2195_v43  ;;  %2200 = vlog2.f32 %v1455_v30  ;;  %v1440_v42 = vmul.f32 -0.5, %v2195_v43  ;;  %v1443_v39 = vand.u32 2147483647, %v2195_v43 }
 0x229   : > { %v2197_v38 = vpop.eup %2196  ;;  %v1459_v59 = vadd.f32 1.0, %v1458_v58  ;;  %vm3171_vm0 = vcmp.lt.f32.partialorder %v1461_v62, 0.0004427343 }
 0x22a   : > { %2202 = vlog2.f32 %v1437_v11  ;;  %v1464_v53 = vadd.f32 1.0, %v2197_v38  ;;  %v1467_v35 = vmul.f32 -0.5, %v2197_v38  ;;  %v1441_v41 = vadd.f32 1.0, %v1440_v42 }
 0x22b   : > { %v2199_v60 = vpop.eup %2198  ;;  %v1470_v61 = vand.u32 2147483647, %v2197_v38  ;;  %vm3179_vm2 = vcmp.lt.f32.partialorder %v1443_v39, 0.0004427343  ;;  %v1460_v22 = vmul.f32 %v2193_v44, %v1459_v59 }
 0x22c   : > { %v1446_v45 = vadd.f32 1.0, %v2199_v60  ;;  %2204 = vlog2.f32 %v1464_v53  ;;  %v1449_v1 = vmul.f32 -0.5, %v2199_v60  ;;  %v1468_v29 = vadd.f32 1.0, %v1467_v35 }
 0x22d   : > { %v1442_v49 = vmul.f32 %v2195_v43, %v1441_v41  ;;  %v1452_v4 = vand.u32 2147483647, %v2199_v60  ;;  %vm3185_vm3 = vcmp.lt.f32.partialorder %v1470_v61, 0.0004427343  ;;  %v1263_v53 = vmax.f32 %v3098_v52, 0.0 }
 0x22e   : > { %2206 = vlog2.f32 %v1446_v45  ;;  %v1450_v31 = vadd.f32 1.0, %v1449_v1  ;;  %v1469_v48 = vmul.f32 %v2197_v38, %v1468_v29 }
 0x22f   : > { %vm3194_vm4 = vcmp.lt.f32.partialorder %v1452_v4, 0.0004427343 }
 0x230   : > { %v1451_v13 = vmul.f32 %v2199_v60, %v1450_v31 }
 0x235   : > { %v2201_v34 = vpop.eup %2200 }
 0x236   : > { %v1457_v21 = vmul.f32 0.6931472, %v2201_v34 }
 0x237   : > { %v2203_v23 = vpop.eup %2202  ;;  %v1985_v12 = vpop.f32.mrf.mxu0 }
 0x238   : > { %v1195_v57 = vadd.f32 %v1985_v12, %v2957_v16  ;;  %v1439_v3 = vmul.f32 0.6931472, %v2203_v23  ;;  %v1463_v2 = vsel %vm3171_vm0, %v1460_v22, %v1457_v21  ;;  %vm1769_vm0 = vcmask 31744  }
 0x239   : > { %v1186_v24 = vpop.f32.mrf.mxu0  ;;  %v2205_v20 = vpop.eup %2204 }
 0x23a   : > { %v1231_v27 = vmul.f32 %v2960_v5, %v1195_v57  ;;  %v1187_v47 = vadd.f32 %v1186_v24, %v2957_v16  ;;  %v1445_v46 = vsel %vm3179_vm2, %v1442_v49, %v1439_v3  ;;  %v1466_v10 = vmul.f32 0.6931472, %v2205_v20 }
 0x23b   : > { %v2207_v7 = vpop.eup %2206  ;;  %v1986_v56 = vpop.f32.mrf.mxu0  ;;  %v1517_v38 = vadd.f32 %v1445_v46, %v1261_v51 }
 0x23c   : > { %v3190_v9 = vadd.f32 %v2964_v14, %v1231_v27  ;;  %v1229_v8 = vmul.f32 %v2960_v5, %v1187_v47  ;;  %v1198_v26 = vadd.f32 %v1986_v56, %v2957_v16  ;;  %v1448_v37 = vmul.f32 0.6931472, %v2207_v7 }
 0x23d   : > { %v1189_v32 = vpop.f32.mrf.mxu0  ;;  %v1472_v15 = vsel %vm3185_vm3, %v1469_v48, %v1466_v10 }
 0x23e   : > { %v1315_v18 = vand.u32 2147483647, %v3190_v9  ;;  %v3204_v44 = vadd.f32 %v2964_v14, %v1229_v8  ;;  %v1232_v30 = vmul.f32 %v2960_v5, %v1198_v26  ;;  %v1190_v43 = vadd.f32 %v1189_v32, %v2957_v16 }
 0x23f   : > { %v1454_v11 = vsel %vm3194_vm4, %v1451_v13, %v1448_v37  ;;  %v1520_v60 = vadd.f32 %v1472_v15, %v1264_v28  ;;  %v1519_v16 = vadd.f32 %v1463_v2, %v1263_v53  ;;  %vm1283_vm15 = vcmp.ne.f32.partialorder %v3190_v9, %v3190_v9 }
 0x240   : > { %v1331_v45 = vsub.f32 0.0, %v1315_v18  ;;  %v1313_v42 = vand.u32 2147483647, %v3204_v44  ;;  %v3213_v58 = vadd.f32 %v2964_v14, %v1232_v30  ;;  %v1230_v35 = vmul.f32 %v2960_v5, %v1190_v43 }
 0x241   : > { %v1518_v62 = vadd.f32 %v1454_v11, %v1262_v63  ;;  %v1533_v5 = vsel %vm1277_vm1, %v3118_v17, %v1517_v38  ;;  %v1536_v23 = vsel %vm1280_vm6, %v3133_v55, %v1520_v60  ;;  %v1267_v18 = vmax.f32 %v3190_v9, 0.0 }
 0x242   : > { %v1361_v41 = vmul.f32 1.442695, %v1331_v45  ;;  %v1329_v1 = vsub.f32 0.0, %v1313_v42  ;;  %v1316_v34 = vand.u32 2147483647, %v3213_v58  ;;  %v3222_v39 = vadd.f32 %v2964_v14, %v1230_v35 }
 0x243   : > { %v1534_v59 = vsel %vm1278_vm5, %v3140_v33, %v1518_v62  ;;  %v1535_v14 = vsel %vm1279_vm7, %v3098_v52, %v1519_v16  ;;  %v1265_v43 = vmax.f32 %v3204_v44, 0.0  ;;  %v1268_v42 = vmax.f32 %v3213_v58, 0.0 }
 0x244   : > { %2208 = vpow2.f32 %v1361_v41  ;;  %v1357_v12 = vmul.f32 1.442695, %v1329_v1  ;;  %v1332_v51 = vsub.f32 0.0, %v1316_v34  ;;  %v1314_v63 = vand.u32 2147483647, %v3222_v39 }
 0x245   : > { %v1564_v29 = vpack.c.bf16 %v1534_v59, %v1533_v5  ;;  %v1565_v3 = vpack.c.bf16 %v1536_v23, %v1535_v14  ;;  %v1266_v35 = vmax.f32 %v3222_v39, 0.0  ;;  %vm1284_vm12 = vcmp.ne.f32.partialorder %v3213_v58, %v3213_v58  ;;  %v1893_v14 = vld [vmem:[%s3369_s4 + $0x10] sm:$0xff] }
 0x246   : > { %2210 = vpow2.f32 %v1357_v12  ;;  %v1363_v61 = vmul.f32 1.442695, %v1332_v51  ;;  %v1330_v57 = vsub.f32 0.0, %v1314_v63  ;;  %vm1281_vm13 = vcmp.ne.f32.partialorder %v3204_v44, %v3204_v44 }
 0x247   : > { %2011 = vmatprep.mubr.bf16.mxu1 %v1564_v29  ;;  %vm1282_vm14 = vcmp.ne.f32.partialorder %v3222_v39, %v3222_v39 }
 0x248   : > { %2212 = vpow2.f32 %v1363_v61  ;;  %v1359_v17 = vmul.f32 1.442695, %v1330_v57  ;;  %2012 = vmatmul.mubr.bf16.gmra.mxu1 %v1565_v3  ;;  %v1717_v61 = vmul.f32 %v1893_v14, %v2409_v25 }
 0x24a   : > { %2214 = vpow2.f32 %v1359_v17 }
 0x251   : > { %v2209_v33 = vpop.eup %2208 }
 0x252   : > { %v1491_v28 = vadd.f32 1.0, %v2209_v33  ;;  %v1494_v21 = vmul.f32 -0.5, %v2209_v33  ;;  %v1497_v56 = vand.u32 2147483647, %v2209_v33 }
 0x253   : > { %v2211_v55 = vpop.eup %2210 }
 0x254   : > { %v1473_v6 = vadd.f32 1.0, %v2211_v55  ;;  %2216 = vlog2.f32 %v1491_v28  ;;  %v1476_v52 = vmul.f32 -0.5, %v2211_v55  ;;  %v1479_v22 = vand.u32 2147483647, %v2211_v55 }
 0x255   : > { %v2213_v24 = vpop.eup %2212  ;;  %v1495_v7 = vadd.f32 1.0, %v1494_v21  ;;  %vm1498_vm9 = vcmp.lt.f32.partialorder %v1497_v56, 0.0004427343 }
 0x256   : > { %2218 = vlog2.f32 %v1473_v6  ;;  %v1500_v49 = vadd.f32 1.0, %v2213_v24  ;;  %v1503_v20 = vmul.f32 -0.5, %v2213_v24  ;;  %v1477_v27 = vadd.f32 1.0, %v1476_v52 }
 0x257   : > { %v2215_v31 = vpop.eup %2214  ;;  %v1506_v37 = vand.u32 2147483647, %v2213_v24  ;;  %vm3234_vm8 = vcmp.lt.f32.partialorder %v1479_v22, 0.0004427343  ;;  %v1496_v36 = vmul.f32 %v2209_v33, %v1495_v7 }
 0x258   : > { %v1482_v4 = vadd.f32 1.0, %v2215_v31  ;;  %2220 = vlog2.f32 %v1500_v49  ;;  %v1485_v47 = vmul.f32 -0.5, %v2215_v31  ;;  %v1504_v48 = vadd.f32 1.0, %v1503_v20 }
 0x259   : > { %v1478_v8 = vmul.f32 %v2211_v55, %v1477_v27  ;;  %v1488_v13 = vand.u32 2147483647, %v2215_v31  ;;  %vm1507_vm10 = vcmp.lt.f32.partialorder %v1506_v37, 0.0004427343 }
 0x25a   : > { %2222 = vlog2.f32 %v1482_v4  ;;  %v1486_v26 = vadd.f32 1.0, %v1485_v47  ;;  %v1505_v53 = vmul.f32 %v2213_v24, %v1504_v48 }
 0x25b   : > { %vm1489_vm11 = vcmp.lt.f32.partialorder %v1488_v13, 0.0004427343 }
 0x25c   : > { %v1487_v45 = vmul.f32 %v2215_v31, %v1486_v26 }
 0x261   : > { %v2217_v19 = vpop.eup %2216 }
 0x262   : > { %v1493_v10 = vmul.f32 0.6931472, %v2217_v19 }
 0x263   : > { %v2219_v46 = vpop.eup %2218 }
 0x264   : > { %v1475_v40 = vmul.f32 0.6931472, %v2219_v46  ;;  %v1499_v11 = vsel %vm1498_vm9, %v1496_v36, %v1493_v10 }
 0x265   : > { %v2221_v2 = vpop.eup %2220  ;;  %v1523_v1 = vadd.f32 %v1499_v11, %v1267_v18 }
 0x266   : > { %v1481_v15 = vsel %vm3234_vm8, %v1478_v8, %v1475_v40  ;;  %v1502_v38 = vmul.f32 0.6931472, %v2221_v2 }
 0x267   : > { %v2223_v30 = vpop.eup %2222  ;;  %v1521_v62 = vadd.f32 %v1481_v15, %v1265_v43  ;;  %v1539_v63 = vsel %vm1283_vm15, %v3190_v9, %v1523_v1  ;;  %v3261_v9 = vrot.slane %v1893_v14, %v2449_v50 }
 0x268   : > { %v1484_v60 = vmul.f32 0.6931472, %v2223_v30  ;;  %v1508_v16 = vsel %vm1507_vm10, %v1505_v53, %v1502_v38 }
 0x269   : > { %v1524_v34 = vadd.f32 %v1508_v16, %v1268_v42  ;;  %v1537_v23 = vsel %vm1281_vm13, %v3204_v44, %v1521_v62 }
 0x26a   : > { %v1490_v41 = vsel %vm1489_vm11, %v1487_v45, %v1484_v60 }
 0x26b   : > { %v1522_v5 = vadd.f32 %v1490_v41, %v1266_v35  ;;  %v1540_v59 = vsel %vm1284_vm12, %v3213_v58, %v1524_v34  ;;  %v1719_v58 = vrot.slane %v1893_v14, 1 }
 0x26c   : > { %v1567_v29 = vpack.c.bf16 %v1540_v59, %v1539_v63 }
 0x26d   : > { %v1538_v12 = vsel %vm1282_vm14, %v3222_v39, %v1522_v5  ;;  %v1721_v57 = vadd.f32 %v1719_v58, %v1717_v61 }
 0x26e   : > { %v1566_v51 = vpack.c.bf16 %v1538_v12, %v1537_v23 }
 0x26f   : > { %v1918_v44 = vmul.f32 -1.442695, %v1721_v57 }
 0x270   : > { %2015 = vmatprep.mubr.bf16.mxu1 %v1566_v51 }
 0x271   : > { %2016 = vmatmul.mubr.bf16.gmra.mxu1 %v1567_v29  ;;  %2224 = vpow2.f32 %v1918_v44 }
 0x27e   : > { %v2225_v39 = vpop.eup %2224 }
 0x27f   : > { %v1725_v3 = vadd.f32 1.0, %v2225_v39 }
 0x281   : > { %2226 = vrcp.f32 %v1725_v3 }
 0x282   : > { %2228 = vtanh.f32 %v1717_v61 }
 0x28e   : > { %v2227_v17 = vpop.eup %2226 }
 0x28f   : > { %v2229_v33 = vpop.eup %2228  ;;  %v3264_v28 = vrot.slane %v2227_v17, %v2456_v54 }
 0x290   : > { %v3268_v6 = vrot.slane %v2229_v33, %v2476_v0 }
 0x2d8   : > { %v2005_v55 = vpop.f32.mrf.mxu1 }
 0x2d9   : > { %v1663_v25 = vadd.f32 %v2005_v55, %v3261_v9 }
 0x2da   : > { %v1654_v24 = vpop.f32.mrf.mxu1 }
 0x2db   : > { %v1735_v49 = vmul.f32 %v3264_v28, %v1663_v25  ;;  %v1655_v31 = vadd.f32 %v1654_v24, %v3261_v9 }
 0x2dc   : > { %v2006_v50 = vpop.f32.mrf.mxu1 }
 0x2dd   : > { %v1755_v54 = vadd.f32 %v3268_v6, %v1735_v49  ;;  %v1733_v0 = vmul.f32 %v3264_v28, %v1655_v31  ;;  %v1666_v4 = vadd.f32 %v2006_v50, %v3261_v9 }
 0x2de   : > { %v1657_v52 = vpop.f32.mrf.mxu1 }
 0x2df   : > { %1772 = vst.msk [vmem:[%s3277_s7 + $0x10] sm:$0xff] %vm1769_vm0, %v1755_v54  ;;  %v1753_v21 = vadd.f32 %v3268_v6, %v1733_v0  ;;  %v1736_v20 = vmul.f32 %v3264_v28, %v1666_v4  ;;  %v1658_v27 = vadd.f32 %v1657_v52, %v3261_v9 }
 0x2e0   : > { %v2009_v47 = vpop.f32.mrf.mxu1 }
 0x2e1   : > { %1770 = vst.msk [vmem:[%s3277_s7] sm:$0xff] %vm1769_vm0, %v1753_v21  ;;  %v1756_v19 = vadd.f32 %v3268_v6, %v1736_v20  ;;  %v1734_v22 = vmul.f32 %v3264_v28, %v1658_v27  ;;  %v1679_v7 = vadd.f32 %v2009_v47, %v3261_v9 }
 0x2e2   : > { %v1670_v56 = vpop.f32.mrf.mxu1 }
 0x2e3   : > { %1773 = vst.msk [vmem:[%s3277_s7 + $0x18] sm:$0xff] %vm1769_vm0, %v1756_v19  ;;  %v1754_v46 = vadd.f32 %v3268_v6, %v1734_v22  ;;  %v1739_v10 = vmul.f32 %v3264_v28, %v1679_v7  ;;  %v1671_v48 = vadd.f32 %v1670_v56, %v3261_v9 }
 0x2e4   : > { %v2010_v40 = vpop.f32.mrf.mxu1 }
 0x2e5   : > { %1771 = vst.msk [vmem:[%s3277_s7 + $0x8] sm:$0xff] %vm1769_vm0, %v1754_v46  ;;  %v1759_v8 = vadd.f32 %v3268_v6, %v1739_v10  ;;  %v1737_v26 = vmul.f32 %v3264_v28, %v1671_v48  ;;  %v1682_v37 = vadd.f32 %v2010_v40, %v3261_v9 }
 0x2e6   : > { %v1673_v32 = vpop.f32.mrf.mxu1 }
 0x2e7   : > { %1776 = vst.msk [vmem:[%s3277_s7 + $0x30] sm:$0xff] %vm1769_vm0, %v1759_v8  ;;  %v1757_v13 = vadd.f32 %v3268_v6, %v1737_v26  ;;  %v1740_v36 = vmul.f32 %v3264_v28, %v1682_v37  ;;  %v1674_v2 = vadd.f32 %v1673_v32, %v3261_v9 }
 0x2e9   : > { %1774 = vst.msk [vmem:[%s3277_s7 + $0x20] sm:$0xff] %vm1769_vm0, %v1757_v13  ;;  %v1760_v15 = vadd.f32 %v3268_v6, %v1740_v36  ;;  %v1738_v18 = vmul.f32 %v3264_v28, %v1674_v2 }
 0x2eb   : > { %1777 = vst.msk [vmem:[%s3277_s7 + $0x38] sm:$0xff] %vm1769_vm0, %v1760_v15  ;;  %v1758_v30 = vadd.f32 %v3268_v6, %v1738_v18 }
 0x2ed   : > { %1775 = vst.msk [vmem:[%s3277_s7 + $0x28] sm:$0xff] %vm1769_vm0, %v1758_v30 }
 0x308   : > { %v2013_v43 = vpop.f32.mrf.mxu1 }
 0x309   : > { %v1695_v11 = vadd.f32 %v2013_v43, %v3261_v9 }
 0x30a   : > { %v1686_v38 = vpop.f32.mrf.mxu1 }
 0x30b   : > { %v1743_v53 = vmul.f32 %v3264_v28, %v1695_v11  ;;  %v1687_v60 = vadd.f32 %v1686_v38, %v3261_v9 }
 0x30c   : > { %v2014_v45 = vpop.f32.mrf.mxu1 }
 0x30d   : > { %v1763_v42 = vadd.f32 %v3268_v6, %v1743_v53  ;;  %v1741_v35 = vmul.f32 %v3264_v28, %v1687_v60  ;;  %v1698_v62 = vadd.f32 %v2014_v45, %v3261_v9 }
 0x30e   : > { %v1689_v16 = vpop.f32.mrf.mxu1 }
 0x30f   : > { %1780 = vst.msk [vmem:[%s3277_s7 + $0x50] sm:$0xff] %vm1769_vm0, %v1763_v42  ;;  %v1761_v41 = vadd.f32 %v3268_v6, %v1741_v35  ;;  %v1744_v1 = vmul.f32 %v3264_v28, %v1698_v62  ;;  %v1690_v34 = vadd.f32 %v1689_v16, %v3261_v9 }
 0x311   : > { %1778 = vst.msk [vmem:[%s3277_s7 + $0x40] sm:$0xff] %vm1769_vm0, %v1761_v41  ;;  %v1764_v5 = vadd.f32 %v3268_v6, %v1744_v1  ;;  %v1742_v59 = vmul.f32 %v3264_v28, %v1690_v34 }
 0x313   : > { %1781 = vst.msk [vmem:[%s3277_s7 + $0x58] sm:$0xff] %vm1769_vm0, %v1764_v5  ;;  %v1762_v23 = vadd.f32 %v3268_v6, %v1742_v59 }
 0x315   : > { %1779 = vst.msk [vmem:[%s3277_s7 + $0x48] sm:$0xff] %vm1769_vm0, %v1762_v23 }
 0x331   : > { %v2017_v12 = vpop.f32.mrf.mxu1 }
 0x332   : > { %v1711_v51 = vadd.f32 %v2017_v12, %v3261_v9 }
 0x333   : > { %v1702_v63 = vpop.f32.mrf.mxu1 }
 0x334   : > { %v1747_v29 = vmul.f32 %v3264_v28, %v1711_v51  ;;  %v1703_v14 = vadd.f32 %v1702_v63, %v3261_v9 }
 0x335   : > { %v2018_v61 = vpop.f32.mrf.mxu1 }
 0x336   : > { %v1767_v58 = vadd.f32 %v3268_v6, %v1747_v29  ;;  %v1745_v57 = vmul.f32 %v3264_v28, %v1703_v14  ;;  %v1714_v44 = vadd.f32 %v2018_v61, %v3261_v9 }
 0x337   : > { %v1705_v39 = vpop.f32.mrf.mxu1 }
 0x338   : > { %1784 = vst.msk [vmem:[%s3277_s7 + $0x70] sm:$0xff] %vm1769_vm0, %v1767_v58  ;;  %v1765_v3 = vadd.f32 %v3268_v6, %v1745_v57  ;;  %v1748_v17 = vmul.f32 %v3264_v28, %v1714_v44  ;;  %v1706_v33 = vadd.f32 %v1705_v39, %v3261_v9 }
 0x33a   : > { %1782 = vst.msk [vmem:[%s3277_s7 + $0x60] sm:$0xff] %vm1769_vm0, %v1765_v3  ;;  %v1768_v55 = vadd.f32 %v3268_v6, %v1748_v17  ;;  %v1746_v25 = vmul.f32 %v3264_v28, %v1706_v33 }
 0x33c   : > { %1785 = vst.msk [vmem:[%s3277_s7 + $0x78] sm:$0xff] %vm1769_vm0, %v1768_v55  ;;  %v1766_v24 = vadd.f32 %v3268_v6, %v1746_v25 }
 0x33e   : > { %1783 = vst.msk [vmem:[%s3277_s7 + $0x68] sm:$0xff] %vm1769_vm0, %v1766_v24 }
 0x33f PF: > { %s21_s25 = sadd.s32 1, %s2266_s25   ;;  %s3419_s23 = smov %s2262_s24 }
 0x340   : > { %p18_p10 = scmp.ge.s32.totalorder %s21_s25, 4   ;;  %s3420_s24 = smov %s3422_s0 }
 0x342   :  { %20 = sbr.rel (!%p18_p10) target bundleno = 17 (0x11), region = 69 }

// kernel: tpu_custom_call.1
= control target key start
LH: loop header
LB: loop body
LE: loop exit
PB: predicated region body
PF: predicated region fallthrough
CT: control target
= control target key end

     0   :  { %s3365_s0 = inlined_call_operand.vmem [shape: f32[2], index: 0, kind: input, shape index: {}]   ;;  %s3366_s1 = inlined_call_operand.vmem [shape: f32[2,128,4], index: 1, kind: input, shape index: {}]   ;;  %s3367_s2 = inlined_call_operand.vmem [shape: bf16[4,128], index: 2, kind: input, shape index: {}]   ;;  %s3368_s3 = inlined_call_operand.vmem [shape: bf16[2,128,128], index: 3, kind: input, shape index: {}]   ;;  %s3369_s4 = inlined_call_operand.vmem [shape: f32[3,8,128], index: 4, kind: input, shape index: {}]   ;;  %s3370_s5 = inlined_call_operand.vmem [shape: f32[2,128,4], index: 5, kind: output, shape index: {}]  }
   0x1   :  { %s10_s20 = sshll.u32 %s3365_s0, 4  ;;  %s11_s20 = int_to_ptr.vmem [resolvable:$true] %s10_s20 }
   0x2   :  { %s2230_s21 = scalar_lea.vmem %s11_s20, 16  ;;  %p2235_p1 = scmp.lt.s32.totalorder %s11_s20, %s11_s20 }
   0x3   :  { %p2231_p0 = scmp.ne.s32.totalorder %s11_s20, %s2230_s21  ;;  %p2236_p2 = scmp.lt.s32.totalorder %s2230_s21, %s2230_s21 }
   0x5   :  { %p2237_p3 = por %p2236_p2, %p2235_p1 }
   0x7   :  { %p2238_p4 = pnand %p2237_p3, %p2231_p0 }
   0x9   :  { %2241 = shalt.err (!%p2238_p4)  }
   0xa   :  { %s2268_s22 = smov [#allocation3]  }
   0xb   :  { %13 = dma.vmem_to_smem %s11_s20, 16, %s2268_s22, [#allocation2] }
   0xc   :  { %2254 = dma.done.wait [#allocation2], 16 }
   0xd   :  { %2255 = vsyncadd [#allocation2], 4294967280 }
   0xe   :  { %15 = sfence }
   0xf   :  { %s2306_s23 = smov 0   ;;  %s2308_s24 = smov 0  }
  0x10   :  { %s2310_s25 = smov 0  }
  0x11 LB: > { %s30_s0 = sadd.s32 1, %s2262_s24  ;;  %p1877_p5 = scmp.ge.s32.totalorder %s2266_s25, 1  ;;  %s2266_s25 = sphi %s2310_s25, %s21_s25   ;;  %s2262_s24 = sphi %s2308_s24, %s3420_s24   ;;  %s2258_s23 = sphi %s2306_s23, %s3419_s23  }
  0x12   : > { %p31_p6 = scmp.ge.s32.totalorder %s30_s0, 2  ;;  %p190_p7 = scmp.lt.s32.totalorder %s2266_s25, 3 }
  0x14   : > { %s3422_s0 = smov (%p31_p6, %s30_s0), 0  ;;  %p191_p8 = pnand %p1877_p5, %p190_p7 }
  0x15   : > { %p225_p9 = scmp.lt.s32.totalorder (!%p191_p8), %s2258_s23, 1  ;;  %s245_s12 = sld [smem:[#allocation3 + %s2258_s23]] (!%p191_p8) }
  0x16   : > { %194 = sbr.rel (%p191_p8) target bundleno = 831 (0x33f), region = 36 }
  0x1b   : > { %v2269_v0 = vmov 0   ;;  %s2330_s26 = scalar_select %p225_p9, %s2258_s23, 1  ;;  %v2270_v7 = vmov 1   ;;  %v2271_v9 = vmov 2   ;;  %v2272_v11 = vmov 3   ;;  %v2068_v19 = vld [vmem:[%s3368_s3 + $0x38] sm:$0xff]  }
  0x1c   : > { %2049 = vset.pattern.permute.xlu1 %v2269_v0  ;;  %2048 = vset.pattern.permute.xlu0 %v2269_v0  ;;  %v2069_v20 = vld [vmem:[%s3368_s3 + $0x30] sm:$0xff]   ;;  %v2070_v21 = vld [vmem:[%s3368_s3 + $0x28] sm:$0xff]   ;;  %v2071_v22 = vld [vmem:[%s3368_s3 + $0x20] sm:$0xff]   ;;  %v2409_v25 = vstv %s245_s12  ;;  %v345_v40 = vlaneseq }
  0x1d   : > { %s1921_s27 = sshll.u32 %s2330_s26, 7  ;;  %1955 = vmatprep.subr.bf16.mxu0 %v2068_v19  ;;  %v2072_v23 = vld [vmem:[%s3368_s3 + $0x18] sm:$0xff]   ;;  %v262_v24 = vld [vmem:[%s3369_s4] sm:$0xff]  ;;  %v2073_v26 = vld [vmem:[%s3368_s3 + $0x10] sm:$0xff]  }
  0x1e   : > { %s2338_s30 = scalar_lea.vmem %s3366_s1, %s1921_s27  ;;  %1956 = vmatpush3.bf16.msra.mxu0 %v2068_v19  ;;  %v686_v27 = vmul.f32 %v2409_v25, %v262_v24  ;;  %v688_v28 = vrot.slane %v262_v24, 1  ;;  %v2074_v29 = vld [vmem:[%s3368_s3 + $0x8] sm:$0xff]   ;;  %v2075_v31 = vld [vmem:[%s3368_s3] sm:$0xff]   ;;  %v346_v44 = vshrl.u32 %v345_v40, 7  ;;  %s3277_s7 = scalar_lea.vmem %s3370_s5, %s1921_s27 }
  0x1f   : > { %v248_v1 = vld [vmem:[%s2338_s30 + $0x10] sm:$0xff]  ;;  %v246_v2 = vld [vmem:[%s2338_s30] sm:$0xff]  ;;  %v249_v3 = vld [vmem:[%s2338_s30 + $0x18] sm:$0xff]  ;;  %1957 = vmatprep.subr.bf16.mxu0 %v2069_v20 }
  0x20   : > { %277 = vperm.xlu1 %2049, %v248_v1   ;;  %267 = vperm.xlu0 %2048, %v246_v2   ;;  %v247_v4 = vld [vmem:[%s2338_s30 + $0x8] sm:$0xff]  ;;  %v250_v10 = vld [vmem:[%s2338_s30 + $0x20] sm:$0xff]  ;;  %v253_v12 = vld [vmem:[%s2338_s30 + $0x38] sm:$0xff]  ;;  %v690_v30 = vadd.f32 %v688_v28, %v686_v27  ;;  %v2449_v50 = vsub.s32 0, %v346_v44  ;;  %v2456_v54 = vsub.s32 1, %v346_v44  ;;  %v551_v56 = vsub.s32 2, %v346_v44 }
  0x21   : > { %v251_v5 = vld [vmem:[%s2338_s30 + $0x28] sm:$0xff]  ;;  %v254_v13 = vld [vmem:[%s2338_s30 + $0x40] sm:$0xff]  ;;  %v2361_v14 = vld [vmem:[%s2338_s30 + $0x58] sm:$0xff] }
  0x22   : > { %v2346_v6 = vld [vmem:[%s2338_s30 + $0x48] sm:$0xff]  ;;  %v252_v15 = vld [vmem:[%s2338_s30 + $0x30] sm:$0xff]  ;;  %v2367_v16 = vld [vmem:[%s2338_s30 + $0x60] sm:$0xff]  ;;  %1958 = vmatpush3.bf16.msra.mxu0 %v2069_v20  ;;  %v1882_v32 = vmul.f32 -1.442695, %v690_v30  ;;  %v2465_v58 = vrot.slane %v262_v24, %v2449_v50 }
  0x23   : > { %v2351_v8 = vld [vmem:[%s2338_s30 + $0x68] sm:$0xff]  ;;  %v2371_v17 = vld [vmem:[%s2338_s30 + $0x78] sm:$0xff]  ;;  %v256_v18 = vld [vmem:[%s2338_s30 + $0x50] sm:$0xff]  ;;  %1959 = vmatprep.subr.bf16.mxu0 %v2070_v21 }
  0x24   : > { %282 = vperm.xlu1 %2049, %v249_v3   ;;  %272 = vperm.xlu0 %2048, %v247_v4   ;;  %2084 = vpow2.f32 %v1882_v32  ;;  %v260_v37 = vld [vmem:[%s2338_s30 + $0x70] sm:$0xff]  ;;  %v263_v47 = vld [vmem:[%s3367_s2] sm:$0x3] }
  0x25   : > { %v264_v49 = vunpack.c.l.bf16 %v263_v47 }
  0x26   : > { %1960 = vmatpush3.bf16.msra.mxu0 %v2070_v21 }
  0x27   : > { %1961 = vmatprep.subr.bf16.mxu0 %v2071_v22  ;;  %v2454_v53 = vrot.slane %v264_v49, %v2449_v50  ;;  %v2469_v60 = vrot.slane %v264_v49, %v2456_v54  ;;  %v2474_v63 = vrot.slane %v264_v49, %v551_v56 }
  0x28   : > { %2050 = vset.pattern.permute.xlu1 %v2270_v7  ;;  %292 = vperm.xlu0 %2048, %v251_v5  }
  0x29   : > { %390 = vperm.xlu1 %2050, %v247_v4  }
  0x2a   : > { %1962 = vmatpush3.bf16.msra.mxu0 %v2071_v22 }
  0x2b   : > { %1963 = vmatprep.subr.bf16.mxu0 %v2072_v23 }
  0x2c   : > { %312 = vperm.xlu0 %2048, %v2346_v6  }
  0x2d   : > { %394 = vperm.xlu1 %2050, %v248_v1  }
  0x2e   : > { %1964 = vmatpush3.bf16.msra.mxu0 %v2072_v23 }
  0x2f   : > { %1965 = vmatprep.subr.bf16.mxu0 %v2073_v26 }
  0x30   : > { %332 = vperm.xlu0 %2048, %v2351_v8  }
  0x31   : > { %2051 = vset.pattern.permute.xlu1 %v2271_v9  ;;  %v2085_v42 = vpop.eup %2084 }
  0x32   : > { %486 = vperm.xlu1 %2051, %v246_v2   ;;  %1966 = vmatpush3.bf16.msra.mxu0 %v2073_v26  ;;  %v694_v46 = vadd.f32 1.0, %v2085_v42 }
  0x33   : > { %1967 = vmatprep.subr.bf16.mxu0 %v2074_v29 }
  0x34   : > { %2062 = vset.pattern.permute.xlu0 %v2270_v7  ;;  %2086 = vrcp.f32 %v694_v46 }
  0x35   : > { %386 = vperm.xlu0 %2062, %v246_v2   ;;  %2088 = vtanh.f32 %v686_v27 }
  0x36   : > { %494 = vperm.xlu1 %2051, %v248_v1   ;;  %1968 = vmatpush3.bf16.msra.mxu0 %v2074_v29 }
  0x37   : > { %1969 = vmatprep.subr.bf16.mxu0 %v2075_v31 }
  0x39   : > { %398 = vperm.xlu0 %2062, %v249_v3  }
  0x3a   : > { %498 = vperm.xlu1 %2051, %v249_v3   ;;  %1970 = vmatpush3.bf16.msra.mxu0 %v2075_v31 }
  0x3d   : > { %402 = vperm.xlu0 %2062, %v250_v10  }
  0x3e   : > { %2052 = vset.pattern.permute.xlu1 %v2272_v11 }
  0x3f   : > { %590 = vperm.xlu1 %2052, %v247_v4  }
  0x41   : > { %414 = vperm.xlu0 %2062, %v253_v12  }
  0x43   : > { %594 = vperm.xlu1 %2052, %v248_v1  }
  0x45   : > { %418 = vperm.xlu0 %2062, %v254_v13  }
  0x47   : > { %2053 = vset.pattern.permute.xlu1 %v2269_v0 }
  0x48   : > { %287 = vperm.xlu1 %2053, %v250_v10  }
  0x49   : > { %430 = vperm.xlu0 %2062, %v2361_v14  }
  0x4c   : > { %297 = vperm.xlu1 %2053, %v252_v15  }
  0x4d   : > { %434 = vperm.xlu0 %2062, %v2367_v16  }
  0x50   : > { %302 = vperm.xlu1 %2053, %v253_v12  }
  0x51   : > { %446 = vperm.xlu0 %2062, %v2371_v17  }
  0x54   : > { %2054 = vset.pattern.permute.xlu1 %v2270_v7 }
  0x55   : > { %406 = vperm.xlu1 %2054, %v251_v5   ;;  %2064 = vset.pattern.permute.xlu0 %v2271_v9 }
  0x56   : > { %490 = vperm.xlu0 %2064, %v247_v4   ;;  %v2087_v4 = vpop.eup %2086 }
  0x59   : > { %410 = vperm.xlu1 %2054, %v252_v15  }
  0x5a   : > { %506 = vperm.xlu0 %2064, %v251_v5  }
  0x5d   : > { %2055 = vset.pattern.permute.xlu1 %v2271_v9 }
  0x5e   : > { %502 = vperm.xlu1 %2055, %v250_v10   ;;  %522 = vperm.xlu0 %2064, %v2346_v6  }
  0x62   : > { %510 = vperm.xlu1 %2055, %v252_v15   ;;  %538 = vperm.xlu0 %2064, %v2351_v8  }
  0x66   : > { %514 = vperm.xlu1 %2055, %v253_v12   ;;  %2066 = vset.pattern.permute.xlu0 %v2272_v11 }
  0x67   : > { %586 = vperm.xlu0 %2066, %v246_v2  }
  0x6a   : > { %2056 = vset.pattern.permute.xlu1 %v2272_v11 }
  0x6b   : > { %606 = vperm.xlu1 %2056, %v251_v5   ;;  %598 = vperm.xlu0 %2066, %v249_v3  }
  0x6f   : > { %610 = vperm.xlu1 %2056, %v252_v15   ;;  %602 = vperm.xlu0 %2066, %v250_v10  }
  0x73   : > { %2057 = vset.pattern.permute.xlu1 %v2269_v0  ;;  %614 = vperm.xlu0 %2066, %v253_v12  }
  0x74   : > { %307 = vperm.xlu1 %2057, %v254_v13  }
  0x77   : > { %618 = vperm.xlu0 %2066, %v254_v13  }
  0x78   : > { %317 = vperm.xlu1 %2057, %v256_v18  }
  0x7b   : > { %630 = vperm.xlu0 %2066, %v2361_v14  }
  0x7c   : > { %322 = vperm.xlu1 %2057, %v2361_v14  }
  0x7f   : > { %634 = vperm.xlu0 %2066, %v2367_v16  }
  0x80   : > { %2058 = vset.pattern.permute.xlu1 %v2270_v7 }
  0x81   : > { %422 = vperm.xlu1 %2058, %v2346_v6  }
  0x83   : > { %646 = vperm.xlu0 %2066, %v2371_v17  }
  0x85   : > { %426 = vperm.xlu1 %2058, %v256_v18  }
  0x89   : > { %2059 = vset.pattern.permute.xlu1 %v2271_v9 }
  0x8a   : > { %518 = vperm.xlu1 %2059, %v254_v13   ;;  %v2487_v13 = vrot.slane %v2087_v4, %v2456_v54 }
  0x8e   : > { %526 = vperm.xlu1 %2059, %v256_v18  }
  0x92   : > { %530 = vperm.xlu1 %2059, %v2361_v14  }
  0x96   : > { %2060 = vset.pattern.permute.xlu1 %v2272_v11 }
  0x97   : > { %622 = vperm.xlu1 %2060, %v2346_v6  }
  0x9b   : > { %v278_v33 = vpop.permute.xlu1 %277  ;;  %626 = vperm.xlu1 %2060, %v256_v18   ;;  %v2424_v34 = vpop.permute.xlu0 %267 }
  0x9c   : > { %v351_v59 = vmul.f32 %v2454_v53, %v278_v33  ;;  %v349_v46 = vmul.f32 %v2454_v53, %v2424_v34 }
  0x9e   : > { %v371_v2 = vadd.f32 %v2465_v58, %v351_v59  ;;  %v369_v59 = vadd.f32 %v2465_v58, %v349_v46 }
  0x9f   : > { %v2426_v35 = vpop.permute.xlu1 %282  ;;  %2061 = vset.pattern.permute.xlu1 %v2269_v0  ;;  %v2429_v36 = vpop.permute.xlu0 %272  ;;  %v2476_v0 = vsub.s32 3, %v346_v44 }
  0xa0   : > { %327 = vperm.xlu1 %2061, %v2367_v16   ;;  %v350_v26 = vmul.f32 %v2454_v53, %v2429_v36 }
  0xa3   : > { %v2433_v38 = vpop.permute.xlu0 %292 }
  0xa4   : > { %v2435_v39 = vpop.permute.xlu1 %390  ;;  %337 = vperm.xlu1 %2061, %v260_v37  }
  0xa5   : > { %v454_v29 = vmul.f32 %v2469_v60, %v2435_v39 }
  0xa7   : > { %v2437_v41 = vpop.permute.xlu0 %312 }
  0xa8   : > { %v395_v43 = vpop.permute.xlu1 %394  ;;  %342 = vperm.xlu1 %2061, %v2371_v17  }
  0xa9   : > { %v455_v62 = vmul.f32 %v2469_v60, %v395_v43 }
  0xab   : > { %v2440_v45 = vpop.permute.xlu0 %332  ;;  %v471_v6 = vadd.f32 %v455_v62, %v371_v2  ;;  %v354_v2 = vmul.f32 %v2454_v53, %v2433_v38 }
  0xac   : > { %2063 = vset.pattern.permute.xlu1 %v2270_v7  ;;  %v2483_v7 = vrot.slane %v264_v49, %v2476_v0 }
  0xad   : > { %438 = vperm.xlu1 %2063, %v2351_v8   ;;  %v2447_v48 = vpop.permute.xlu1 %486 }
  0xb0   : > { %v2451_v51 = vpop.permute.xlu0 %386 }
  0xb1   : > { %442 = vperm.xlu1 %2063, %v260_v37   ;;  %v495_v52 = vpop.permute.xlu1 %494  ;;  %v453_v62 = vmul.f32 %v2469_v60, %v2451_v51 }
  0xb2   : > { %v555_v3 = vmul.f32 %v2474_v63, %v495_v52  ;;  %v352_v52 = vmul.f32 %v2454_v53, %v2426_v35 }
  0xb4   : > { %v2458_v55 = vpop.permute.xlu0 %398  ;;  %v571_v12 = vadd.f32 %v555_v3, %v471_v6  ;;  %v372_v35 = vadd.f32 %v2465_v58, %v352_v52 }
  0xb5   : > { %2065 = vset.pattern.permute.xlu1 %v2271_v9  ;;  %v2461_v57 = vpop.permute.xlu1 %498  ;;  %v2089_v9 = vpop.eup %2088 }
  0xb6   : > { %534 = vperm.xlu1 %2065, %v2367_v16   ;;  %v2493_v16 = vrot.slane %v2089_v9, %v2476_v0  ;;  %v469_v9 = vadd.f32 %v453_v62, %v369_v59 }
  0xb8   : > { %v2471_v61 = vpop.permute.xlu0 %402 }
  0xba   : > { %542 = vperm.xlu1 %2065, %v260_v37   ;;  %v591_v1 = vpop.permute.xlu1 %590 }
  0xbb   : > { %v654_v40 = vmul.f32 %v2483_v7, %v591_v1  ;;  %v456_v1 = vmul.f32 %v2469_v60, %v2458_v55  ;;  %v553_v55 = vmul.f32 %v2474_v63, %v2447_v48  ;;  %v457_v48 = vmul.f32 %v2469_v60, %v2471_v61 }
  0xbc   : > { %v2480_v5 = vpop.permute.xlu0 %414 }
  0xbe   : > { %546 = vperm.xlu1 %2065, %v2371_v17   ;;  %v595_v10 = vpop.permute.xlu1 %594 }
  0xbf   : > { %v655_v14 = vmul.f32 %v2483_v7, %v595_v10  ;;  %v472_v10 = vadd.f32 %v456_v1, %v372_v35 }
  0xc0   : > { %v2490_v15 = vpop.permute.xlu0 %418 }
  0xc1   : > { %v671_v18 = vadd.f32 %v655_v14, %v571_v12  ;;  %v556_v12 = vmul.f32 %v2474_v63, %v2461_v57  ;;  %v374_v14 = vadd.f32 %v2465_v58, %v354_v2  ;;  %v569_v57 = vadd.f32 %v553_v55, %v469_v9 }
  0xc2   : > { %2067 = vset.pattern.permute.xlu1 %v2272_v11 }
  0xc3   : > { %v704_v19 = vmul.f32 %v2487_v13, %v671_v18  ;;  %638 = vperm.xlu1 %2067, %v2351_v8   ;;  %v288_v17 = vpop.permute.xlu1 %287  ;;  %v370_v8 = vadd.f32 %v2465_v58, %v350_v26 }
  0xc4   : > { %v2498_v20 = vpop.permute.xlu0 %430 }
  0xc5   : > { %v2501_v21 = vadd.f32 %v2493_v16, %v704_v19  ;;  %v470_v33 = vadd.f32 %v454_v29, %v370_v8 }
  0xc7   : > { %642 = vperm.xlu1 %2067, %v260_v37   ;;  %v298_v22 = vpop.permute.xlu1 %297  ;;  %v788_v24 = vand.u32 2147483647, %v2501_v21  ;;  %vm756_vm1 = vcmp.ne.f32.partialorder %v2501_v21, %v2501_v21 }
  0xc8   : > { %v2503_v23 = vpop.permute.xlu0 %434  ;;  %v355_v26 = vmul.f32 %v2454_v53, %v298_v22 }
  0xc9   : > { %v804_v28 = vsub.f32 0.0, %v788_v24  ;;  %v353_v24 = vmul.f32 %v2454_v53, %v288_v17 }
  0xca   : > { %v375_v22 = vadd.f32 %v2465_v58, %v355_v26 }
  0xcb   : > { %v303_v11 = vpop.permute.xlu1 %302  ;;  %v822_v31 = vmul.f32 1.442695, %v804_v28  ;;  %v373_v17 = vadd.f32 %v2465_v58, %v353_v24 }
  0xcc   : > { %v2508_v27 = vpop.permute.xlu0 %446 }
  0xcd   : > { %2090 = vpow2.f32 %v822_v31  ;;  %v572_v31 = vadd.f32 %v556_v12, %v472_v10 }
  0xd0   : > { %v407_v30 = vpop.permute.xlu1 %406 }
  0xd1   : > { %v491_v32 = vpop.permute.xlu0 %490  ;;  %v458_v18 = vmul.f32 %v2469_v60, %v407_v30 }
  0xd2   : > { %v554_v37 = vmul.f32 %v2474_v63, %v491_v32 }
  0xd3   : > { %v474_v30 = vadd.f32 %v458_v18, %v374_v14 }
  0xd4   : > { %v570_v42 = vadd.f32 %v554_v37, %v470_v33  ;;  %v411_v43 = vpop.permute.xlu1 %410 }
  0xd5   : > { %v507_v36 = vpop.permute.xlu0 %506  ;;  %v459_v32 = vmul.f32 %v2469_v60, %v411_v43 }
  0xd6   : > { %v670_v44 = vadd.f32 %v654_v40, %v570_v42  ;;  %v558_v8 = vmul.f32 %v2474_v63, %v507_v36  ;;  %v356_v40 = vmul.f32 %v2454_v53, %v303_v11  ;;  %v460_v11 = vmul.f32 %v2469_v60, %v2480_v5 }
  0xd7   : > { %v475_v52 = vadd.f32 %v459_v32, %v375_v22 }
  0xd8   : > { %v703_v47 = vmul.f32 %v2487_v13, %v670_v44  ;;  %v574_v46 = vadd.f32 %v558_v8, %v474_v30  ;;  %v376_v2 = vadd.f32 %v2465_v58, %v356_v40 }
  0xd9   : > { %v503_v49 = vpop.permute.xlu1 %502  ;;  %v2518_v39 = vpop.permute.xlu0 %522 }
  0xda   : > { %v2523_v56 = vadd.f32 %v2493_v16, %v703_v47  ;;  %v2542_v19 = vpop.eup %2090  ;;  %v557_v59 = vmul.f32 %v2474_v63, %v503_v49  ;;  %v476_v8 = vadd.f32 %v460_v11, %v376_v2 }
  0xdb   : > { %v868_v37 = vadd.f32 1.0, %v2542_v19 }
  0xdc   : > { %v787_v34 = vand.u32 2147483647, %v2523_v56  ;;  %vm755_vm3 = vcmp.ne.f32.partialorder %v2523_v56, %v2523_v56 }
  0xdd   : > { %v511_v3 = vpop.permute.xlu1 %510  ;;  %v2533_v4 = vpop.permute.xlu0 %538 }
  0xde   : > { %v803_v6 = vsub.f32 0.0, %v787_v34  ;;  %v559_v42 = vmul.f32 %v2474_v63, %v511_v3  ;;  %v473_v3 = vadd.f32 %v457_v48, %v373_v17 }
  0xe0   : > { %v820_v51 = vmul.f32 1.442695, %v803_v6  ;;  %v575_v35 = vadd.f32 %v559_v42, %v475_v52  ;;  %v573_v14 = vadd.f32 %v557_v59, %v473_v3 }
  0xe1   : > { %v515_v38 = vpop.permute.xlu1 %514 }
  0xe2   : > { %2092 = vpow2.f32 %v820_v51  ;;  %v587_v28 = vpop.permute.xlu0 %586  ;;  %v560_v55 = vmul.f32 %v2474_v63, %v515_v38 }
  0xe3   : > { %v653_v29 = vmul.f32 %v2483_v7, %v587_v28  ;;  %2094 = vlog2.f32 %v868_v37 }
  0xe4   : > { %v576_v37 = vadd.f32 %v560_v55, %v476_v8  ;;  %v358_v55 = vmul.f32 %v2454_v53, %v2437_v41  ;;  %v461_v41 = vmul.f32 %v2469_v60, %v2490_v15 }
  0xe5   : > { %v669_v33 = vadd.f32 %v653_v29, %v569_v57 }
  0xe6   : > { %v607_v36 = vpop.permute.xlu1 %606  ;;  %v599_v44 = vpop.permute.xlu0 %598 }
  0xe7   : > { %v702_v43 = vmul.f32 %v2487_v13, %v669_v33  ;;  %v658_v47 = vmul.f32 %v2483_v7, %v607_v36  ;;  %v656_v61 = vmul.f32 %v2483_v7, %v599_v44 }
  0xe9   : > { %v2561_v62 = vadd.f32 %v2493_v16, %v702_v43  ;;  %v674_v1 = vadd.f32 %v658_v47, %v574_v46  ;;  %v672_v34 = vadd.f32 %v656_v61, %v572_v31  ;;  %v871_v47 = vmul.f32 -0.5, %v2542_v19 }
  0xea   : > { %v611_v6 = vpop.permute.xlu1 %610  ;;  %v603_v9 = vpop.permute.xlu0 %602 }
  0xeb   : > { %v786_v10 = vand.u32 2147483647, %v2561_v62  ;;  %v707_v12 = vmul.f32 %v2487_v13, %v674_v1  ;;  %v705_v49 = vmul.f32 %v2487_v13, %v672_v34  ;;  %v659_v51 = vmul.f32 %v2483_v7, %v611_v6 }
  0xec   : > { %v657_v18 = vmul.f32 %v2483_v7, %v603_v9  ;;  %vm754_vm4 = vcmp.ne.f32.partialorder %v2561_v62, %v2561_v62 }
  0xed   : > { %v802_v5 = vsub.f32 0.0, %v786_v10  ;;  %v2573_v24 = vadd.f32 %v2493_v16, %v707_v12  ;;  %v2576_v26 = vadd.f32 %v2493_v16, %v705_v49  ;;  %v675_v28 = vadd.f32 %v659_v51, %v575_v35 }
  0xee   : > { %v673_v57 = vadd.f32 %v657_v18, %v573_v14  ;;  %v615_v29 = vpop.permute.xlu0 %614  ;;  %v872_v12 = vadd.f32 1.0, %v871_v47  ;;  %v874_v14 = vand.u32 2147483647, %v2542_v19 }
  0xef   : > { %v2578_v31 = vpop.eup %2092  ;;  %v818_v32 = vmul.f32 1.442695, %v802_v5  ;;  %v791_v48 = vand.u32 2147483647, %v2573_v24  ;;  %v789_v38 = vand.u32 2147483647, %v2576_v26  ;;  %v708_v30 = vmul.f32 %v2487_v13, %v675_v28  ;;  %v308_v33 = vpop.permute.xlu1 %307 }
  0xf0   : > { %v706_v17 = vmul.f32 %v2487_v13, %v673_v57  ;;  %v660_v22 = vmul.f32 %v2483_v7, %v615_v29  ;;  %v859_v40 = vadd.f32 1.0, %v2578_v31  ;;  %v2095_v3 = vpop.eup %2094  ;;  %v357_v28 = vmul.f32 %v2454_v53, %v308_v33 }
  0xf1   : > { %2096 = vpow2.f32 %v818_v32  ;;  %v807_v42 = vsub.f32 0.0, %v791_v48  ;;  %v805_v36 = vsub.f32 0.0, %v789_v38  ;;  %v2587_v44 = vadd.f32 %v2493_v16, %v708_v30 }
  0xf2   : > { %v2590_v46 = vadd.f32 %v2493_v16, %v706_v17  ;;  %v676_v43 = vadd.f32 %v660_v22, %v576_v37  ;;  %2098 = vlog2.f32 %v859_v40  ;;  %v870_v18 = vmul.f32 0.6931472, %v2095_v3  ;;  %v619_v8 = vpop.permute.xlu0 %618 }
  0xf3   : > { %v828_v61 = vmul.f32 1.442695, %v807_v42  ;;  %v824_v52 = vmul.f32 1.442695, %v805_v36  ;;  %v792_v59 = vand.u32 2147483647, %v2587_v44  ;;  %v318_v1 = vpop.permute.xlu1 %317  ;;  %v873_v57 = vmul.f32 %v2542_v19, %v872_v12 }
  0xf4   : > { %v790_v34 = vand.u32 2147483647, %v2590_v46  ;;  %v709_v11 = vmul.f32 %v2487_v13, %v676_v43  ;;  %v862_v48 = vmul.f32 -0.5, %v2578_v31  ;;  %vm2606_vm0 = vcmp.lt.f32.partialorder %v874_v14, 0.0004427343 }
  0xf5   : > { %2100 = vpow2.f32 %v828_v61  ;;  %v808_v2 = vsub.f32 0.0, %v792_v59  ;;  %v378_v30 = vadd.f32 %v2465_v58, %v358_v55  ;;  %v876_v33 = vsel %vm2606_vm0, %v873_v57, %v870_v18 }
  0xf6   : > { %2102 = vpow2.f32 %v824_v52  ;;  %v806_v35 = vsub.f32 0.0, %v790_v34  ;;  %v2597_v6 = vadd.f32 %v2493_v16, %v709_v11  ;;  %v377_v19 = vadd.f32 %v2465_v58, %v357_v28  ;;  %v631_v36 = vpop.permute.xlu0 %630 }
  0xf7   : > { %v830_v9 = vmul.f32 1.442695, %v808_v2  ;;  %v323_v10 = vpop.permute.xlu1 %322  ;;  %v359_v22 = vmul.f32 %v2454_v53, %v318_v1  ;;  %v740_v40 = vmax.f32 %v2501_v21, 0.0  ;;  %v464_v42 = vmul.f32 %v2469_v60, %v2498_v20 }
  0xf8   : > { %v826_v49 = vmul.f32 1.442695, %v806_v35  ;;  %v793_v51 = vand.u32 2147483647, %v2597_v6  ;;  %v360_v37 = vmul.f32 %v2454_v53, %v323_v10  ;;  %v865_v43 = vand.u32 2147483647, %v2578_v31 }
  0xf9   : > { %2104 = vpow2.f32 %v830_v9  ;;  %v562_v61 = vmul.f32 %v2474_v63, %v2518_v39  ;;  %v739_v59 = vmax.f32 %v2523_v56, 0.0  ;;  %v863_v1 = vadd.f32 1.0, %v862_v48 }
  0xfa   : > { %2106 = vpow2.f32 %v826_v49  ;;  %v809_v5 = vsub.f32 0.0, %v793_v51  ;;  %v996_v34 = vadd.f32 %v876_v33, %v740_v40  ;;  %v380_v11 = vadd.f32 %v2465_v58, %v360_v37 }
  0xfb   : > { %v661_v20 = vmul.f32 %v2483_v7, %v619_v8  ;;  %v738_v2 = vmax.f32 %v2561_v62, 0.0  ;;  %v379_v35 = vadd.f32 %v2465_v58, %v359_v22  ;;  %v477_v10 = vadd.f32 %v461_v41, %v377_v19 }
  0xfc   : > { %v832_v29 = vmul.f32 1.442695, %v809_v5  ;;  %v423_v32 = vpop.permute.xlu1 %422  ;;  %v2638_v39 = vmul.f32 %v2483_v7, %v631_v36  ;;  %vm2642_vm2 = vcmp.lt.f32.partialorder %v865_v43, 0.0004427343  ;;  %v741_v14 = vmax.f32 %v2576_v26, 0.0 }
  0xfd   : > { %v462_v9 = vmul.f32 %v2469_v60, %v423_v32  ;;  %v864_v18 = vmul.f32 %v2578_v31, %v863_v1  ;;  %v2654_v28 = vsel %vm756_vm1, %v2501_v21, %v996_v34  ;;  %v742_v8 = vmax.f32 %v2590_v46, 0.0 }
  0xfe   : > { %v2616_v17 = vpop.eup %2096  ;;  %2108 = vpow2.f32 %v832_v29  ;;  %v480_v29 = vadd.f32 %v464_v42, %v380_v11  ;;  %v743_v48 = vmax.f32 %v2573_v24, 0.0  ;;  %v744_v21 = vmax.f32 %v2587_v44, 0.0 }
  0xff   : > { %v850_v15 = vadd.f32 1.0, %v2616_v17  ;;  %v2099_v47 = vpop.eup %2098  ;;  %v853_v32 = vmul.f32 -0.5, %v2616_v17  ;;  %v478_v38 = vadd.f32 %v462_v9, %v378_v30  ;;  %v856_v19 = vand.u32 2147483647, %v2616_v17 }
 0x100   : > { %v427_v52 = vpop.permute.xlu1 %426  ;;  %v861_v49 = vmul.f32 0.6931472, %v2099_v47  ;;  %v745_v1 = vmax.f32 %v2597_v6, 0.0  ;;  %vm757_vm8 = vcmp.ne.f32.partialorder %v2576_v26, %v2576_v26  ;;  %vm759_vm10 = vcmp.ne.f32.partialorder %v2573_v24, %v2573_v24 }
 0x101   : > { %2110 = vlog2.f32 %v850_v15  ;;  %v463_v33 = vmul.f32 %v2469_v60, %v427_v52  ;;  %v854_v47 = vadd.f32 1.0, %v853_v32  ;;  %v578_v11 = vadd.f32 %v562_v61, %v478_v38 }
 0x102   : > { %v2633_v3 = vpop.eup %2100  ;;  %v867_v22 = vsel %vm2642_vm2, %v864_v18, %v861_v49  ;;  %vm2681_vm5 = vcmp.lt.f32.partialorder %v856_v19, 0.0004427343  ;;  %vm758_vm11 = vcmp.ne.f32.partialorder %v2590_v46, %v2590_v46  ;;  %vm760_vm14 = vcmp.ne.f32.partialorder %v2587_v44, %v2587_v44 }
 0x103   : > { %v2640_v12 = vpop.eup %2102  ;;  %v895_v55 = vadd.f32 1.0, %v2633_v3  ;;  %v898_v15 = vmul.f32 -0.5, %v2633_v3  ;;  %v995_v9 = vadd.f32 %v867_v22, %v739_v59  ;;  %v901_v18 = vand.u32 2147483647, %v2633_v3 }
 0x104   : > { %v877_v5 = vadd.f32 1.0, %v2640_v12  ;;  %v880_v36 = vmul.f32 -0.5, %v2640_v12  ;;  %vm761_vm15 = vcmp.ne.f32.partialorder %v2597_v6, %v2597_v6 }
 0x105   : > { %v519_v57 = vpop.permute.xlu1 %518  ;;  %2112 = vlog2.f32 %v895_v55  ;;  %v883_v55 = vand.u32 2147483647, %v2640_v12  ;;  %v899_v61 = vadd.f32 1.0, %v898_v15  ;;  %vm2705_vm7 = vcmp.lt.f32.partialorder %v901_v18, 0.0004427343 }
 0x106   : > { %v2661_v31 = vpop.eup %2104  ;;  %v561_v41 = vmul.f32 %v2474_v63, %v519_v57  ;;  %2114 = vlog2.f32 %v877_v5 }
 0x107   : > { %v2665_v37 = vpop.eup %2106  ;;  %v904_v40 = vadd.f32 1.0, %v2661_v31  ;;  %v907_v52 = vmul.f32 -0.5, %v2661_v31  ;;  %vm2701_vm6 = vcmp.lt.f32.partialorder %v883_v55, 0.0004427343 }
 0x108   : > { %v577_v42 = vadd.f32 %v561_v41, %v477_v10  ;;  %v886_v30 = vadd.f32 1.0, %v2665_v37  ;;  %v479_v10 = vadd.f32 %v463_v33, %v379_v35  ;;  %v855_v35 = vmul.f32 %v2616_v17, %v854_v47 }
 0x109   : > { %v527_v43 = vpop.permute.xlu1 %526  ;;  %2116 = vlog2.f32 %v904_v40  ;;  %v889_v32 = vmul.f32 -0.5, %v2665_v37  ;;  %v892_v38 = vand.u32 2147483647, %v2665_v37  ;;  %v908_v41 = vadd.f32 1.0, %v907_v52 }
 0x10a   : > { %v677_v34 = vadd.f32 %v661_v20, %v577_v42  ;;  %2118 = vlog2.f32 %v886_v30  ;;  %v881_v20 = vadd.f32 1.0, %v880_v36  ;;  %v1011_v40 = vsel %vm755_vm3, %v2523_v56, %v995_v9 }
 0x10b   : > { %v2677_v49 = vpop.eup %2108  ;;  %v563_v42 = vmul.f32 %v2474_v63, %v527_v43  ;;  %v900_v52 = vmul.f32 %v2633_v3, %v899_v61  ;;  %vm2716_vm9 = vcmp.lt.f32.partialorder %v892_v38, 0.0004427343  ;;  %v909_v55 = vmul.f32 %v2661_v31, %v908_v41 }
 0x10c   : > { %v710_v5 = vmul.f32 %v2487_v13, %v677_v34  ;;  %v913_v59 = vadd.f32 1.0, %v2677_v49  ;;  %v882_v56 = vmul.f32 %v2640_v12, %v881_v20  ;;  %v890_v34 = vadd.f32 1.0, %v889_v32 }
 0x10d   : > { %v531_v57 = vpop.permute.xlu1 %530  ;;  %v910_v3 = vand.u32 2147483647, %v2661_v31  ;;  %v579_v51 = vadd.f32 %v563_v42, %v479_v10 }
 0x10e   : > { %v2111_v33 = vpop.eup %2110  ;;  %v2693_v19 = vadd.f32 %v2493_v16, %v710_v5  ;;  %v564_v22 = vmul.f32 %v2474_v63, %v531_v57  ;;  %2120 = vlog2.f32 %v913_v59  ;;  %v891_v41 = vmul.f32 %v2665_v37, %v890_v34 }
 0x10f   : > { %v852_v17 = vmul.f32 0.6931472, %v2111_v33  ;;  %vm2759_vm12 = vcmp.lt.f32.partialorder %v910_v3, 0.0004427343 }
 0x110   : > { %v794_v15 = vand.u32 2147483647, %v2693_v19  ;;  %v580_v47 = vadd.f32 %v564_v22, %v480_v29  ;;  %vm762_vm0 = vcmp.ne.f32.partialorder %v2693_v19, %v2693_v19 }
 0x111   : > { %v858_v43 = vsel %vm2681_vm5, %v855_v35, %v852_v17  ;;  %v916_v35 = vmul.f32 -0.5, %v2677_v49 }
 0x112   : > { %v2113_v18 = vpop.eup %2112  ;;  %v810_v5 = vsub.f32 0.0, %v794_v15  ;;  %v680_v29 = vadd.f32 %v2638_v39, %v580_v47  ;;  %v623_v59 = vpop.permute.xlu1 %622  ;;  %v994_v12 = vadd.f32 %v858_v43, %v738_v2  ;;  %v919_v15 = vand.u32 2147483647, %v2677_v49 }
 0x113   : > { %v2115_v20 = vpop.eup %2114  ;;  %v662_v61 = vmul.f32 %v2483_v7, %v623_v59  ;;  %v897_v57 = vmul.f32 0.6931472, %v2113_v18  ;;  %v917_v36 = vadd.f32 1.0, %v916_v35 }
 0x114   : > { %v834_v32 = vmul.f32 1.442695, %v810_v5  ;;  %v713_v38 = vmul.f32 %v2487_v13, %v680_v29  ;;  %v1010_v2 = vsel %vm754_vm4, %v2561_v62, %v994_v12  ;;  %v879_v39 = vmul.f32 0.6931472, %v2115_v20 }
 0x115   : > { %v678_v31 = vadd.f32 %v662_v61, %v578_v11  ;;  %v1044_v10 = vpack.c.bf16 %v1011_v40, %v1010_v2  ;;  %v903_v33 = vsel %vm2705_vm7, %v900_v52, %v897_v57  ;;  %vm2772_vm13 = vcmp.lt.f32.partialorder %v919_v15, 0.0004427343 }
 0x116   : > { %v2117_v22 = vpop.eup %2116  ;;  %2122 = vpow2.f32 %v834_v32  ;;  %v2740_v42 = vadd.f32 %v2493_v16, %v713_v38  ;;  %v627_v17 = vpop.permute.xlu1 %626  ;;  %v885_v62 = vsel %vm2701_vm6, %v882_v56, %v879_v39  ;;  %v999_v34 = vadd.f32 %v903_v33, %v743_v48 }
 0x117   : > { %v2119_v47 = vpop.eup %2118  ;;  %v711_v11 = vmul.f32 %v2487_v13, %v678_v31  ;;  %v663_v40 = vmul.f32 %v2483_v7, %v627_v17  ;;  %1971 = vmatprep.mubr.bf16.mxu0 %v1044_v10  ;;  %v997_v37 = vadd.f32 %v885_v62, %v741_v14  ;;  %v906_v30 = vmul.f32 0.6931472, %v2117_v22 }
 0x118   : > { %v797_v52 = vand.u32 2147483647, %v2740_v42  ;;  %v888_v43 = vmul.f32 0.6931472, %v2119_v47  ;;  %v1015_v9 = vsel %vm759_vm10, %v2573_v24, %v999_v34  ;;  %v918_v35 = vmul.f32 %v2677_v49, %v917_v36  ;;  %v635_v34 = vpop.permute.xlu0 %634 }
 0x119   : > { %v2753_v56 = vadd.f32 %v2493_v16, %v711_v11  ;;  %v679_v18 = vadd.f32 %v663_v40, %v579_v51  ;;  %v1013_v5 = vsel %vm757_vm8, %v2576_v26, %v997_v37  ;;  %v912_v12 = vsel %vm2759_vm12, %v909_v55, %v906_v30 }
 0x11a   : > { %v813_v14 = vsub.f32 0.0, %v797_v52  ;;  %v1045_v59 = vpack.c.bf16 %v1013_v5, %v2654_v28  ;;  %v894_v48 = vsel %vm2716_vm9, %v891_v41, %v888_v43  ;;  %v1000_v2 = vadd.f32 %v912_v12, %v744_v21 }
 0x11b   : > { %v2121_v20 = vpop.eup %2120  ;;  %v795_v51 = vand.u32 2147483647, %v2753_v56  ;;  %v712_v61 = vmul.f32 %v2487_v13, %v679_v18  ;;  %v328_v57 = vpop.permute.xlu1 %327  ;;  %v998_v26 = vadd.f32 %v894_v48, %v742_v8  ;;  %v566_v30 = vmul.f32 %v2474_v63, %v2533_v4 }
 0x11c   : > { %v840_v28 = vmul.f32 1.442695, %v813_v14  ;;  %1972 = vmatmul.mubr.bf16.vlgmr.msra.gmra.mxu0 %v1045_v59  ;;  %v915_v55 = vmul.f32 0.6931472, %v2121_v20  ;;  %v1016_v21 = vsel %vm760_vm14, %v2587_v44, %v1000_v2  ;;  %v361_v44 = vmul.f32 %v2454_v53, %v328_v57 }
 0x11d   : > { %v811_v32 = vsub.f32 0.0, %v795_v51  ;;  %v2782_v38 = vadd.f32 %v2493_v16, %v712_v61  ;;  %v1014_v8 = vsel %vm758_vm11, %v2590_v46, %v998_v26  ;;  %v465_v14 = vmul.f32 %v2469_v60, %v2503_v23  ;;  %v647_v51 = vpop.permute.xlu0 %646 }
 0x11e   : > { %2124 = vpow2.f32 %v840_v28  ;;  %v1046_v39 = vpack.c.bf16 %v1015_v9, %v1014_v8  ;;  %v921_v24 = vsel %vm2772_vm13, %v918_v35, %v915_v55  ;;  %v381_v5 = vadd.f32 %v2465_v58, %v361_v44 }
 0x11f   : > { %v836_v31 = vmul.f32 1.442695, %v811_v32  ;;  %v796_v49 = vand.u32 2147483647, %v2782_v38  ;;  %v338_v10 = vpop.permute.xlu1 %337  ;;  %v1001_v41 = vadd.f32 %v921_v24, %v745_v1  ;;  %v362_v1 = vmul.f32 %v2454_v53, %v2440_v45 }
 0x120   : > { %1975 = vmatprep.mubr.bf16.mxu0 %v1046_v39  ;;  %v481_v12 = vadd.f32 %v465_v14, %v381_v5  ;;  %v665_v26 = vmul.f32 %v2483_v7, %v635_v34  ;;  %v468_v23 = vmul.f32 %v2469_v60, %v2508_v27  ;;  %v668_v35 = vmul.f32 %v2483_v7, %v647_v51 }
 0x121   : > { %2126 = vpow2.f32 %v836_v31  ;;  %v812_v46 = vsub.f32 0.0, %v796_v49  ;;  %v1017_v33 = vsel %vm761_vm15, %v2597_v6, %v1001_v41  ;;  %v382_v40 = vadd.f32 %v2465_v58, %v362_v1 }
 0x122   : > { %v1047_v22 = vpack.c.bf16 %v1017_v33, %v1016_v21  ;;  %v746_v8 = vmax.f32 %v2693_v19, 0.0  ;;  %v363_v39 = vmul.f32 %v2454_v53, %v338_v10  ;;  %v747_v41 = vmax.f32 %v2753_v56, 0.0 }
 0x123   : > { %v2801_v17 = vpop.eup %2122  ;;  %v838_v62 = vmul.f32 1.442695, %v812_v46  ;;  %v343_v15 = vpop.permute.xlu1 %342  ;;  %v749_v46 = vmax.f32 %v2740_v42, 0.0  ;;  %vm763_vm1 = vcmp.ne.f32.partialorder %v2753_v56, %v2753_v56  ;;  %vm764_vm6 = vcmp.ne.f32.partialorder %v2782_v38, %v2782_v38 }
 0x124   : > { %1976 = vmatmul.mubr.bf16.gmra.mxu0 %v1047_v22  ;;  %v922_v47 = vadd.f32 1.0, %v2801_v17  ;;  %v364_v59 = vmul.f32 %v2454_v53, %v343_v15  ;;  %v925_v61 = vmul.f32 -0.5, %v2801_v17  ;;  %v928_v31 = vand.u32 2147483647, %v2801_v17 }
 0x125   : > { %2128 = vpow2.f32 %v838_v62  ;;  %v748_v53 = vmax.f32 %v2782_v38, 0.0  ;;  %vm765_vm7 = vcmp.ne.f32.partialorder %v2740_v42, %v2740_v42 }
 0x126   : > { %2130 = vlog2.f32 %v922_v47  ;;  %v384_v28 = vadd.f32 %v2465_v58, %v364_v59  ;;  %v926_v24 = vadd.f32 1.0, %v925_v61  ;;  %vm2855_vm2 = vcmp.lt.f32.partialorder %v928_v31, 0.0004427343 }
 0x128   : > { %v439_v11 = vpop.permute.xlu1 %438  ;;  %v484_v62 = vadd.f32 %v468_v23, %v384_v28 }
 0x129   : > { %v466_v37 = vmul.f32 %v2469_v60, %v439_v11 }
 0x12b   : > { %v2809_v6 = vpop.eup %2124  ;;  %v482_v52 = vadd.f32 %v466_v37, %v382_v40  ;;  %v383_v37 = vadd.f32 %v2465_v58, %v363_v39 }
 0x12c   : > { %v443_v43 = vpop.permute.xlu1 %442  ;;  %v949_v45 = vadd.f32 1.0, %v2809_v6  ;;  %v952_v2 = vmul.f32 -0.5, %v2809_v6  ;;  %v955_v21 = vand.u32 2147483647, %v2809_v6 }
 0x12d   : > { %v2814_v36 = vadd.f32 %v566_v30, %v482_v52  ;;  %v467_v33 = vmul.f32 %v2469_v60, %v443_v43  ;;  %v927_v60 = vmul.f32 %v2801_v17, %v926_v24 }
 0x12e   : > { %v2816_v18 = vpop.eup %2126  ;;  %2132 = vlog2.f32 %v949_v45  ;;  %v953_v11 = vadd.f32 1.0, %v952_v2  ;;  %vm2861_vm3 = vcmp.lt.f32.partialorder %v955_v21, 0.0004427343 }
 0x12f   : > { %v931_v29 = vadd.f32 1.0, %v2816_v18  ;;  %v934_v49 = vmul.f32 -0.5, %v2816_v18  ;;  %v937_v45 = vand.u32 2147483647, %v2816_v18  ;;  %v483_v34 = vadd.f32 %v467_v33, %v383_v37 }
 0x130   : > { %v954_v51 = vmul.f32 %v2809_v6, %v953_v11 }
 0x131   : > { %v535_v4 = vpop.permute.xlu1 %534  ;;  %2134 = vlog2.f32 %v931_v29  ;;  %v935_v30 = vadd.f32 1.0, %v934_v49  ;;  %vm938_vm4 = vcmp.lt.f32.partialorder %v937_v45, 0.0004427343 }
 0x132   : > { %v2823_v48 = vpop.eup %2128  ;;  %v565_v20 = vmul.f32 %v2474_v63, %v535_v4 }
 0x133   : > { %v940_v57 = vadd.f32 1.0, %v2823_v48  ;;  %v2131_v55 = vpop.eup %2130  ;;  %v943_v47 = vmul.f32 -0.5, %v2823_v48  ;;  %v946_v17 = vand.u32 2147483647, %v2823_v48 }
 0x134   : > { %v581_v3 = vadd.f32 %v565_v20, %v481_v12  ;;  %v924_v15 = vmul.f32 0.6931472, %v2131_v55 }
 0x135   : > { %v543_v9 = vpop.permute.xlu1 %542  ;;  %2136 = vlog2.f32 %v940_v57  ;;  %v944_v20 = vadd.f32 1.0, %v943_v47  ;;  %vm2874_vm5 = vcmp.lt.f32.partialorder %v946_v17, 0.0004427343 }
 0x136   : > { %v681_v32 = vadd.f32 %v665_v26, %v581_v3  ;;  %v930_v5 = vsel %vm2855_vm2, %v927_v60, %v924_v15  ;;  %v567_v61 = vmul.f32 %v2474_v63, %v543_v9  ;;  %v936_v3 = vmul.f32 %v2816_v18, %v935_v30 }
 0x137   : > { %v1002_v55 = vadd.f32 %v930_v5, %v746_v8  ;;  %v945_v24 = vmul.f32 %v2823_v48, %v944_v20 }
 0x138   : > { %v714_v27 = vmul.f32 %v2487_v13, %v681_v32  ;;  %v583_v8 = vadd.f32 %v567_v61, %v483_v34 }
 0x139   : > { %v547_v22 = vpop.permute.xlu1 %546  ;;  %v1018_v21 = vsel %vm762_vm0, %v2693_v19, %v1002_v55 }
 0x13a   : > { %v2845_v10 = vadd.f32 %v2493_v16, %v714_v27  ;;  %v568_v1 = vmul.f32 %v2474_v63, %v547_v22 }
 0x13b   : > { %v2133_v40 = vpop.eup %2132 }
 0x13c   : > { %v798_v52 = vand.u32 2147483647, %v2845_v10  ;;  %v584_v43 = vadd.f32 %v568_v1, %v484_v62  ;;  %v951_v29 = vmul.f32 0.6931472, %v2133_v40  ;;  %vm766_vm11 = vcmp.ne.f32.partialorder %v2845_v10, %v2845_v10 }
 0x13e   : > { %v2135_v14 = vpop.eup %2134  ;;  %v814_v59 = vsub.f32 0.0, %v798_v52  ;;  %v684_v4 = vadd.f32 %v668_v35, %v584_v43  ;;  %v639_v12 = vpop.permute.xlu1 %638  ;;  %v957_v63 = vsel %vm2861_vm3, %v954_v51, %v951_v29 }
 0x13f   : > { %v666_v57 = vmul.f32 %v2483_v7, %v639_v12  ;;  %v933_v26 = vmul.f32 0.6931472, %v2135_v14  ;;  %v1005_v33 = vadd.f32 %v957_v63, %v749_v46 }
 0x140   : > { %v842_v23 = vmul.f32 1.442695, %v814_v59  ;;  %v717_v28 = vmul.f32 %v2487_v13, %v684_v4 }
 0x141   : > { %v682_v32 = vadd.f32 %v666_v57, %v2814_v36  ;;  %v939_v2 = vsel %vm938_vm4, %v936_v3, %v933_v26  ;;  %v1021_v11 = vsel %vm765_vm7, %v2740_v42, %v1005_v33 }
 0x142   : > { %v2137_v6 = vpop.eup %2136  ;;  %2138 = vpow2.f32 %v842_v23  ;;  %v2881_v9 = vadd.f32 %v2493_v16, %v717_v28  ;;  %v643_v18 = vpop.permute.xlu1 %642  ;;  %v1003_v39 = vadd.f32 %v939_v2, %v747_v41  ;;  %v750_v2 = vmax.f32 %v2845_v10, 0.0 }
 0x143   : > { %v715_v36 = vmul.f32 %v2487_v13, %v682_v32  ;;  %v667_v31 = vmul.f32 %v2483_v7, %v643_v18  ;;  %v942_v49 = vmul.f32 0.6931472, %v2137_v6 }
 0x144   : > { %v801_v27 = vand.u32 2147483647, %v2881_v9  ;;  %v1019_v41 = vsel %vm763_vm1, %v2753_v56, %v1003_v39  ;;  %vm769_vm15 = vcmp.ne.f32.partialorder %v2881_v9, %v2881_v9 }
 0x145   : > { %v2896_v48 = vadd.f32 %v2493_v16, %v715_v36  ;;  %v683_v22 = vadd.f32 %v667_v31, %v583_v8  ;;  %v1048_v62 = vpack.c.bf16 %v1019_v41, %v1018_v21  ;;  %v948_v7 = vsel %vm2874_vm5, %v945_v24, %v942_v49 }
 0x146   : > { %v817_v15 = vsub.f32 0.0, %v801_v27  ;;  %v1004_v1 = vadd.f32 %v948_v7, %v748_v53  ;;  %v753_v21 = vmax.f32 %v2881_v9, 0.0 }
 0x147   : > { %v799_v47 = vand.u32 2147483647, %v2896_v48  ;;  %v716_v19 = vmul.f32 %v2487_v13, %v683_v22  ;;  %1979 = vmatprep.mubr.bf16.mxu0 %v1048_v62  ;;  %v751_v35 = vmax.f32 %v2896_v48, 0.0  ;;  %vm767_vm12 = vcmp.ne.f32.partialorder %v2896_v48, %v2896_v48 }
 0x148   : > { %v848_v56 = vmul.f32 1.442695, %v817_v15  ;;  %v1020_v46 = vsel %vm764_vm6, %v2782_v38, %v1004_v1 }
 0x149   : > { %v815_v40 = vsub.f32 0.0, %v799_v47  ;;  %v2909_v37 = vadd.f32 %v2493_v16, %v716_v19  ;;  %v1049_v53 = vpack.c.bf16 %v1021_v11, %v1020_v46 }
 0x14a   : > { %2140 = vpow2.f32 %v848_v56 }
 0x14b   : > { %v844_v60 = vmul.f32 1.442695, %v815_v40  ;;  %v800_v13 = vand.u32 2147483647, %v2909_v37  ;;  %1980 = vmatmul.mubr.bf16.gmra.mxu0 %v1049_v53  ;;  %v752_v41 = vmax.f32 %v2909_v37, 0.0  ;;  %vm768_vm14 = vcmp.ne.f32.partialorder %v2909_v37, %v2909_v37  ;;  %v2078_v40 = vld [vmem:[%s3368_s3 + $0x68] sm:$0xff]  }
 0x14c   : > { %v2081_v53 = vld [vmem:[%s3368_s3 + $0x50] sm:$0xff]  }
 0x14d   : > { %2142 = vpow2.f32 %v844_v60  ;;  %v816_v44 = vsub.f32 0.0, %v800_v13  ;;  %v2082_v60 = vld [vmem:[%s3368_s3 + $0x48] sm:$0xff]   ;;  %v2083_v13 = vld [vmem:[%s3368_s3 + $0x40] sm:$0xff]  }
 0x14f   : > { %v2139_v30 = vpop.eup %2138  ;;  %v846_v52 = vmul.f32 1.442695, %v816_v44  ;;  %v1883_v44 = vld [vmem:[%s3369_s4 + $0x8] sm:$0xff] }
 0x150   : > { %v958_v43 = vadd.f32 1.0, %v2139_v30  ;;  %v961_v34 = vmul.f32 -0.5, %v2139_v30  ;;  %v964_v4 = vand.u32 2147483647, %v2139_v30 }
 0x151   : > { %2144 = vpow2.f32 %v846_v52  ;;  %v1203_v52 = vrot.slane %v1883_v44, 1 }
 0x152   : > { %2146 = vlog2.f32 %v958_v43  ;;  %v962_v29 = vadd.f32 1.0, %v961_v34  ;;  %vm965_vm8 = vcmp.lt.f32.partialorder %v964_v4, 0.0004427343 }
 0x154   : > { %v963_v51 = vmul.f32 %v2139_v30, %v962_v29  ;;  %v1201_v30 = vmul.f32 %v1883_v44, %v2409_v25 }
 0x156   : > { %v1205_v43 = vadd.f32 %v1203_v52, %v1201_v30 }
 0x157   : > { %v2141_v38 = vpop.eup %2140 }
 0x158   : > { %v985_v45 = vadd.f32 1.0, %v2141_v38  ;;  %v988_v59 = vmul.f32 -0.5, %v2141_v38  ;;  %v991_v23 = vand.u32 2147483647, %v2141_v38 }
 0x15a   : > { %v2143_v42 = vpop.eup %2142  ;;  %2148 = vlog2.f32 %v985_v45  ;;  %v989_v26 = vadd.f32 1.0, %v988_v59  ;;  %vm992_vm10 = vcmp.lt.f32.partialorder %v991_v23, 0.0004427343 }
 0x15b   : > { %v967_v58 = vadd.f32 1.0, %v2143_v42  ;;  %v970_v14 = vmul.f32 -0.5, %v2143_v42  ;;  %v973_v3 = vand.u32 2147483647, %v2143_v42 }
 0x15c   : > { %v990_v39 = vmul.f32 %v2141_v38, %v989_v26  ;;  %v1892_v38 = vmul.f32 -1.442695, %v1205_v43 }
 0x15d   : > { %2150 = vlog2.f32 %v967_v58  ;;  %v971_v61 = vadd.f32 1.0, %v970_v14  ;;  %vm974_vm9 = vcmp.lt.f32.partialorder %v973_v3, 0.0004427343 }
 0x15e   : > { %v2145_v16 = vpop.eup %2144 }
 0x15f   : > { %v976_v5 = vadd.f32 1.0, %v2145_v16  ;;  %v2147_v17 = vpop.eup %2146  ;;  %v979_v57 = vmul.f32 -0.5, %v2145_v16  ;;  %v972_v6 = vmul.f32 %v2143_v42, %v971_v61  ;;  %v982_v8 = vand.u32 2147483647, %v2145_v16 }
 0x160   : > { %v960_v12 = vmul.f32 0.6931472, %v2147_v17 }
 0x161   : > { %2152 = vlog2.f32 %v976_v5  ;;  %v980_v18 = vadd.f32 1.0, %v979_v57  ;;  %vm983_vm13 = vcmp.lt.f32.partialorder %v982_v8, 0.0004427343 }
 0x162   : > { %v966_v28 = vsel %vm965_vm8, %v963_v51, %v960_v12  ;;  %2154 = vpow2.f32 %v1892_v38 }
 0x163   : > { %v1006_v24 = vadd.f32 %v966_v28, %v750_v2  ;;  %v981_v22 = vmul.f32 %v2145_v16, %v980_v18  ;;  %v2957_v16 = vrot.slane %v1883_v44, %v2449_v50 }
 0x165   : > { %v1022_v62 = vsel %vm766_vm11, %v2845_v10, %v1006_v24  ;;  %v2076_v10 = vld [vmem:[%s3368_s3 + $0x78] sm:$0xff]  }
 0x166   : > { %1987 = vmatprep.subr.bf16.mxu1 %v2076_v10 }
 0x167   : > { %v2149_v20 = vpop.eup %2148  ;;  %1988 = vmatpush3.bf16.msra.mxu1 %v2076_v10 }
 0x168   : > { %v987_v55 = vmul.f32 0.6931472, %v2149_v20 }
 0x16a   : > { %v2151_v32 = vpop.eup %2150  ;;  %v993_v31 = vsel %vm992_vm10, %v990_v39, %v987_v55 }
 0x16b   : > { %v969_v63 = vmul.f32 0.6931472, %v2151_v32  ;;  %v1009_v15 = vadd.f32 %v993_v31, %v753_v21 }
 0x16d   : > { %v975_v36 = vsel %vm974_vm9, %v972_v6, %v969_v63  ;;  %v1025_v46 = vsel %vm769_vm15, %v2881_v9, %v1009_v15  ;;  %v2079_v9 = vld [vmem:[%s3368_s3 + $0x60] sm:$0xff]  }
 0x16e   : > { %v2153_v49 = vpop.eup %2152  ;;  %v1007_v27 = vadd.f32 %v975_v36, %v751_v35 }
 0x16f   : > { %v978_v33 = vmul.f32 0.6931472, %v2153_v49  ;;  %v2155_v45 = vpop.eup %2154 }
 0x170   : > { %v1023_v7 = vsel %vm767_vm12, %v2896_v48, %v1007_v27  ;;  %v2077_v48 = vld [vmem:[%s3368_s3 + $0x70] sm:$0xff]   ;;  %v1209_v42 = vadd.f32 1.0, %v2155_v45 }
 0x171   : > { %v1050_v1 = vpack.c.bf16 %v1023_v7, %v1022_v62  ;;  %v984_v47 = vsel %vm983_vm13, %v981_v22, %v978_v33  ;;  %1989 = vmatprep.subr.bf16.mxu1 %v2077_v48 }
 0x172   : > { %v1008_v19 = vadd.f32 %v984_v47, %v752_v41  ;;  %1990 = vmatpush3.bf16.msra.mxu1 %v2077_v48  ;;  %2156 = vrcp.f32 %v1209_v42 }
 0x173   : > { %1983 = vmatprep.mubr.bf16.mxu0 %v1050_v1  ;;  %1991 = vmatprep.subr.bf16.mxu1 %v2078_v40  ;;  %2158 = vtanh.f32 %v1201_v30 }
 0x174   : > { %v1024_v56 = vsel %vm768_vm14, %v2909_v37, %v1008_v19  ;;  %v2080_v37 = vld [vmem:[%s3368_s3 + $0x58] sm:$0xff]  }
 0x175   : > { %v1051_v11 = vpack.c.bf16 %v1025_v46, %v1024_v56 }
 0x176   : > { %1992 = vmatpush3.bf16.msra.mxu1 %v2078_v40 }
 0x177   : > { %1984 = vmatmul.mubr.bf16.gmra.mxu0 %v1051_v11  ;;  %1993 = vmatprep.subr.bf16.mxu1 %v2079_v9 }
 0x17a   : > { %1994 = vmatpush3.bf16.msra.mxu1 %v2079_v9 }
 0x17b   : > { %1995 = vmatprep.subr.bf16.mxu1 %v2080_v37 }
 0x17e   : > { %1996 = vmatpush3.bf16.msra.mxu1 %v2080_v37 }
 0x17f   : > { %1997 = vmatprep.subr.bf16.mxu1 %v2081_v53  ;;  %v2157_v58 = vpop.eup %2156 }
 0x180   : > { %v2159_v34 = vpop.eup %2158  ;;  %v2960_v5 = vrot.slane %v2157_v58, %v2456_v54 }
 0x181   : > { %v2964_v14 = vrot.slane %v2159_v34, %v2476_v0 }
 0x182   : > { %1998 = vmatpush3.bf16.msra.mxu1 %v2081_v53 }
 0x183   : > { %1999 = vmatprep.subr.bf16.mxu1 %v2082_v60 }
 0x186   : > { %2000 = vmatpush3.bf16.msra.mxu1 %v2082_v60 }
 0x187   : > { %2001 = vmatprep.subr.bf16.mxu1 %v2083_v13 }
 0x18a   : > { %2002 = vmatpush3.bf16.msra.mxu1 %v2083_v13 }
 0x1dc   : > { %v1973_v17 = vpop.f32.mrf.mxu0 }
 0x1dd   : > { %v1147_v29 = vadd.f32 %v1973_v17, %v2957_v16 }
 0x1de   : > { %v1138_v59 = vpop.f32.mrf.mxu0 }
 0x1df   : > { %v1219_v4 = vmul.f32 %v2960_v5, %v1147_v29  ;;  %v1139_v12 = vadd.f32 %v1138_v59, %v2957_v16 }
 0x1e0   : > { %v1974_v20 = vpop.f32.mrf.mxu0 }
 0x1e1   : > { %v2969_v51 = vadd.f32 %v2964_v14, %v1219_v4  ;;  %v1217_v61 = vmul.f32 %v2960_v5, %v1139_v12  ;;  %v1150_v57 = vadd.f32 %v1974_v20, %v2957_v16 }
 0x1e2   : > { %v1141_v26 = vpop.f32.mrf.mxu0 }
 0x1e3   : > { %v1303_v3 = vand.u32 2147483647, %v2969_v51  ;;  %v2975_v23 = vadd.f32 %v2964_v14, %v1217_v61  ;;  %v1220_v28 = vmul.f32 %v2960_v5, %v1150_v57  ;;  %v1142_v55 = vadd.f32 %v1141_v26, %v2957_v16 }
 0x1e4   : > { %v1977_v32 = vpop.f32.mrf.mxu0  ;;  %vm1271_vm3 = vcmp.ne.f32.partialorder %v2969_v51, %v2969_v51 }
 0x1e5   : > { %v1319_v2 = vsub.f32 0.0, %v1303_v3  ;;  %v1301_v35 = vand.u32 2147483647, %v2975_v23  ;;  %v2981_v63 = vadd.f32 %v2964_v14, %v1220_v28  ;;  %v1218_v6 = vmul.f32 %v2960_v5, %v1142_v55 }
 0x1e6   : > { %v1163_v18 = vadd.f32 %v1977_v32, %v2957_v16  ;;  %v1154_v39 = vpop.f32.mrf.mxu0  ;;  %v1253_v32 = vmax.f32 %v2975_v23, 0.0  ;;  %vm1269_vm2 = vcmp.ne.f32.partialorder %v2975_v23, %v2975_v23 }
 0x1e7   : > { %v1337_v24 = vmul.f32 1.442695, %v1319_v2  ;;  %v1317_v8 = vsub.f32 0.0, %v1301_v35  ;;  %v1304_v36 = vand.u32 2147483647, %v2981_v63  ;;  %v2987_v31 = vadd.f32 %v2964_v14, %v1218_v6 }
 0x1e8   : > { %v1223_v49 = vmul.f32 %v2960_v5, %v1163_v18  ;;  %v1155_v27 = vadd.f32 %v1154_v39, %v2957_v16  ;;  %v1978_v21 = vpop.f32.mrf.mxu0  ;;  %v1255_v2 = vmax.f32 %v2969_v51, 0.0  ;;  %v1256_v35 = vmax.f32 %v2981_v63, 0.0 }
 0x1e9   : > { %2160 = vpow2.f32 %v1337_v24  ;;  %v1333_v41 = vmul.f32 1.442695, %v1317_v8  ;;  %v1320_v33 = vsub.f32 0.0, %v1304_v36  ;;  %v1302_v22 = vand.u32 2147483647, %v2987_v31 }
 0x1ea   : > { %v2993_v62 = vadd.f32 %v2964_v14, %v1223_v49  ;;  %v1221_v7 = vmul.f32 %v2960_v5, %v1155_v27  ;;  %v1166_v15 = vadd.f32 %v1978_v21, %v2957_v16  ;;  %v1157_v1 = vpop.f32.mrf.mxu0  ;;  %v1254_v39 = vmax.f32 %v2987_v31, 0.0 }
 0x1eb   : > { %2162 = vpow2.f32 %v1333_v41  ;;  %v1339_v47 = vmul.f32 1.442695, %v1320_v33  ;;  %v1318_v19 = vsub.f32 0.0, %v1302_v22  ;;  %v1158_v56 = vadd.f32 %v1157_v1, %v2957_v16 }
 0x1ec   : > { %v1307_v46 = vand.u32 2147483647, %v2993_v62  ;;  %v3000_v11 = vadd.f32 %v2964_v14, %v1221_v7  ;;  %v1224_v10 = vmul.f32 %v2960_v5, %v1166_v15  ;;  %v1259_v36 = vmax.f32 %v2993_v62, 0.0 }
 0x1ed   : > { %2164 = vpow2.f32 %v1339_v47  ;;  %v1335_v48 = vmul.f32 1.442695, %v1318_v19  ;;  %v1222_v40 = vmul.f32 %v2960_v5, %v1158_v56  ;;  %vm1272_vm4 = vcmp.ne.f32.partialorder %v2981_v63, %v2981_v63 }
 0x1ee   : > { %v1323_v9 = vsub.f32 0.0, %v1307_v46  ;;  %v1305_v37 = vand.u32 2147483647, %v3000_v11  ;;  %v3006_v53 = vadd.f32 %v2964_v14, %v1224_v10  ;;  %v1257_v8 = vmax.f32 %v3000_v11, 0.0 }
 0x1ef   : > { %2166 = vpow2.f32 %v1335_v48  ;;  %v3009_v60 = vadd.f32 %v2964_v14, %v1222_v40  ;;  %vm1270_vm7 = vcmp.ne.f32.partialorder %v2987_v31, %v2987_v31  ;;  %vm1273_vm12 = vcmp.ne.f32.partialorder %v3000_v11, %v3000_v11 }
 0x1f0   : > { %v1345_v13 = vmul.f32 1.442695, %v1323_v9  ;;  %v1321_v44 = vsub.f32 0.0, %v1305_v37  ;;  %v1308_v30 = vand.u32 2147483647, %v3006_v53  ;;  %v1260_v15 = vmax.f32 %v3006_v53, 0.0 }
 0x1f1   : > { %v1306_v52 = vand.u32 2147483647, %v3009_v60  ;;  %vm1274_vm13 = vcmp.ne.f32.partialorder %v3009_v60, %v3009_v60  ;;  %vm1276_vm14 = vcmp.ne.f32.partialorder %v3006_v53, %v3006_v53  ;;  %vm1275_vm15 = vcmp.ne.f32.partialorder %v2993_v62, %v2993_v62 }
 0x1f2   : > { %2168 = vpow2.f32 %v1345_v13  ;;  %v1341_v43 = vmul.f32 1.442695, %v1321_v44  ;;  %v1324_v38 = vsub.f32 0.0, %v1308_v30 }
 0x1f3   : > { %v1322_v45 = vsub.f32 0.0, %v1306_v52 }
 0x1f4   : > { %2170 = vpow2.f32 %v1341_v43  ;;  %v1347_v42 = vmul.f32 1.442695, %v1324_v38 }
 0x1f5   : > { %v1343_v58 = vmul.f32 1.442695, %v1322_v45 }
 0x1f6   : > { %v2161_v34 = vpop.eup %2160  ;;  %2172 = vpow2.f32 %v1347_v42 }
 0x1f7   : > { %2174 = vpow2.f32 %v1343_v58  ;;  %v1383_v17 = vadd.f32 1.0, %v2161_v34  ;;  %v1386_v57 = vmul.f32 -0.5, %v2161_v34  ;;  %v1389_v55 = vand.u32 2147483647, %v2161_v34 }
 0x1f8   : > { %v2163_v29 = vpop.eup %2162 }
 0x1f9   : > { %v1365_v59 = vadd.f32 1.0, %v2163_v29  ;;  %2176 = vlog2.f32 %v1383_v17  ;;  %v1368_v3 = vmul.f32 -0.5, %v2163_v29  ;;  %v1371_v28 = vand.u32 2147483647, %v2163_v29 }
 0x1fa   : > { %v2165_v4 = vpop.eup %2164  ;;  %v1387_v27 = vadd.f32 1.0, %v1386_v57  ;;  %vm3031_vm1 = vcmp.lt.f32.partialorder %v1389_v55, 0.0004427343 }
 0x1fb   : > { %2178 = vlog2.f32 %v1365_v59  ;;  %v1392_v12 = vadd.f32 1.0, %v2165_v4  ;;  %v1395_v24 = vmul.f32 -0.5, %v2165_v4  ;;  %v1369_v33 = vadd.f32 1.0, %v1368_v3 }
 0x1fc   : > { %v2167_v20 = vpop.eup %2166  ;;  %vm3027_vm0 = vcmp.lt.f32.partialorder %v1371_v28, 0.0004427343  ;;  %v1398_v47 = vand.u32 2147483647, %v2165_v4  ;;  %v1388_v13 = vmul.f32 %v2161_v34, %v1387_v27 }
 0x1fd   : > { %v1374_v61 = vadd.f32 1.0, %v2167_v20  ;;  %2180 = vlog2.f32 %v1392_v12  ;;  %v1377_v49 = vmul.f32 -0.5, %v2167_v20  ;;  %v1380_v46 = vand.u32 2147483647, %v2167_v20 }
 0x1fe   : > { %v1396_v10 = vadd.f32 1.0, %v1395_v24  ;;  %v1370_v45 = vmul.f32 %v2163_v29, %v1369_v33  ;;  %vm3047_vm5 = vcmp.lt.f32.partialorder %v1398_v47, 0.0004427343 }
 0x1ff   : > { %v3013_v26 = vpop.eup %2168  ;;  %2182 = vlog2.f32 %v1374_v61  ;;  %v1378_v37 = vadd.f32 1.0, %v1377_v49  ;;  %vm3052_vm6 = vcmp.lt.f32.partialorder %v1380_v46, 0.0004427343 }
 0x200   : > { %v1419_v6 = vadd.f32 1.0, %v3013_v26  ;;  %v1422_v19 = vmul.f32 -0.5, %v3013_v26  ;;  %v1425_v44 = vand.u32 2147483647, %v3013_v26  ;;  %v1397_v12 = vmul.f32 %v2165_v4, %v1396_v10 }
 0x201   : > { %v3019_v18 = vpop.eup %2170  ;;  %v1379_v61 = vmul.f32 %v2167_v20, %v1378_v37 }
 0x202   : > { %v1401_v21 = vadd.f32 1.0, %v3019_v18  ;;  %2184 = vlog2.f32 %v1419_v6  ;;  %v1404_v48 = vmul.f32 -0.5, %v3019_v18  ;;  %v1407_v58 = vand.u32 2147483647, %v3019_v18 }
 0x203   : > { %v3025_v41 = vpop.eup %2172  ;;  %v1423_v34 = vadd.f32 1.0, %v1422_v19  ;;  %vm3063_vm8 = vcmp.lt.f32.partialorder %v1425_v44, 0.0004427343 }
 0x204   : > { %v2175_v1 = vpop.eup %2174  ;;  %2186 = vlog2.f32 %v1401_v21  ;;  %v1428_v56 = vadd.f32 1.0, %v3025_v41  ;;  %v1431_v43 = vmul.f32 -0.5, %v3025_v41  ;;  %v1405_v29 = vadd.f32 1.0, %v1404_v48 }
 0x205   : > { %v1410_v40 = vadd.f32 1.0, %v2175_v1  ;;  %v1413_v52 = vmul.f32 -0.5, %v2175_v1  ;;  %v1416_v3 = vand.u32 2147483647, %v2175_v1  ;;  %v1434_v28 = vand.u32 2147483647, %v3025_v41 }
 0x206   : > { %v2177_v9 = vpop.eup %2176  ;;  %2188 = vlog2.f32 %v1428_v56  ;;  %v1432_v4 = vadd.f32 1.0, %v1431_v43  ;;  %vm3068_vm9 = vcmp.lt.f32.partialorder %v1407_v58, 0.0004427343  ;;  %v3073_v47 = vmul.f32 %v3013_v26, %v1423_v34 }
 0x207   : > { %v1385_v30 = vmul.f32 0.6931472, %v2177_v9  ;;  %2190 = vlog2.f32 %v1410_v40  ;;  %v1414_v49 = vadd.f32 1.0, %v1413_v52  ;;  %v1406_v10 = vmul.f32 %v3019_v18, %v1405_v29 }
 0x208   : > { %v2179_v38 = vpop.eup %2178  ;;  %vm3084_vm10 = vcmp.lt.f32.partialorder %v1416_v3, 0.0004427343  ;;  %vm3088_vm11 = vcmp.lt.f32.partialorder %v1434_v28, 0.0004427343 }
 0x209   : > { %v1367_v17 = vmul.f32 0.6931472, %v2179_v38  ;;  %v1391_v57 = vsel %vm3031_vm1, %v1388_v13, %v1385_v30  ;;  %v1415_v44 = vmul.f32 %v2175_v1, %v1414_v49  ;;  %v1433_v30 = vmul.f32 %v3025_v41, %v1432_v4 }
 0x20a   : > { %v2181_v55 = vpop.eup %2180  ;;  %v1511_v46 = vadd.f32 %v1391_v57, %v1255_v2 }
 0x20b   : > { %v1981_v6 = vpop.f32.mrf.mxu0  ;;  %v1373_v24 = vsel %vm3027_vm0, %v1370_v45, %v1367_v17  ;;  %v1394_v33 = vmul.f32 0.6931472, %v2181_v55 }
 0x20c   : > { %v2183_v21 = vpop.eup %2182  ;;  %v1179_v20 = vadd.f32 %v1981_v6, %v2957_v16  ;;  %v1509_v56 = vadd.f32 %v1373_v24, %v1253_v32  ;;  %v1527_v41 = vsel %vm1271_vm3, %v2969_v51, %v1511_v46 }
 0x20d   : > { %v1170_v19 = vpop.f32.mrf.mxu0  ;;  %v1376_v22 = vmul.f32 0.6931472, %v2183_v21  ;;  %v1400_v9 = vsel %vm3047_vm5, %v1397_v12, %v1394_v33 }
 0x20e   : > { %v1227_v48 = vmul.f32 %v2960_v5, %v1179_v20  ;;  %v1171_v40 = vadd.f32 %v1170_v19, %v2957_v16  ;;  %v1512_v18 = vadd.f32 %v1400_v9, %v1256_v35  ;;  %v1525_v35 = vsel %vm1269_vm2, %v2975_v23, %v1509_v56 }
 0x20f   : > { %v2185_v32 = vpop.eup %2184  ;;  %v1982_v13 = vpop.f32.mrf.mxu0  ;;  %v1382_v2 = vsel %vm3052_vm6, %v1379_v61, %v1376_v22 }
 0x210   : > { %v3098_v52 = vadd.f32 %v2964_v14, %v1227_v48  ;;  %v1225_v43 = vmul.f32 %v2960_v5, %v1171_v40  ;;  %v1182_v38 = vadd.f32 %v1982_v13, %v2957_v16  ;;  %v1510_v45 = vadd.f32 %v1382_v2, %v1254_v39 }
 0x211   : > { %v2187_v42 = vpop.eup %2186  ;;  %v1173_v58 = vpop.f32.mrf.mxu0  ;;  %v1528_v1 = vsel %vm1272_vm4, %v2981_v63, %v1512_v18  ;;  %v1421_v34 = vmul.f32 0.6931472, %v2185_v32 }
 0x212   : > { %v1311_v39 = vand.u32 2147483647, %v3098_v52  ;;  %v3118_v17 = vadd.f32 %v2964_v14, %v1225_v43  ;;  %v1228_v59 = vmul.f32 %v2960_v5, %v1182_v38  ;;  %v1174_v23 = vadd.f32 %v1173_v58, %v2957_v16 }
 0x213   : > { %v2189_v12 = vpop.eup %2188  ;;  %v1526_v51 = vsel %vm1270_vm7, %v2987_v31, %v1510_v45  ;;  %v1561_v63 = vpack.c.bf16 %v1528_v1, %v1527_v41  ;;  %v1403_v29 = vmul.f32 0.6931472, %v2187_v42  ;;  %v1427_v61 = vsel %vm3063_vm8, %v3073_v47, %v1421_v34 }
 0x214   : > { %v2191_v57 = vpop.eup %2190  ;;  %v1327_v3 = vsub.f32 0.0, %v1311_v39  ;;  %v1309_v28 = vand.u32 2147483647, %v3118_v17  ;;  %v3133_v55 = vadd.f32 %v2964_v14, %v1228_v59  ;;  %v1226_v6 = vmul.f32 %v2960_v5, %v1174_v23 }
 0x215   : > { %v1560_v24 = vpack.c.bf16 %v1526_v51, %v1525_v35  ;;  %v1409_v49 = vsel %vm3068_vm9, %v1406_v10, %v1403_v29  ;;  %v1412_v31 = vmul.f32 0.6931472, %v2191_v57  ;;  %v1430_v4 = vmul.f32 0.6931472, %v2189_v12 }
 0x216   : > { %v1353_v21 = vmul.f32 1.442695, %v1327_v3  ;;  %v1325_v20 = vsub.f32 0.0, %v1309_v28  ;;  %v1312_v27 = vand.u32 2147483647, %v3133_v55  ;;  %v3140_v33 = vadd.f32 %v2964_v14, %v1226_v6 }
 0x217   : > { %2003 = vmatprep.mubr.bf16.mxu1 %v1560_v24  ;;  %v1258_v47 = vmax.f32 %v3009_v60, 0.0  ;;  %v1418_v19 = vsel %vm3084_vm10, %v1415_v44, %v1412_v31  ;;  %v1513_v22 = vadd.f32 %v1409_v49, %v1257_v8  ;;  %v1436_v7 = vsel %vm3088_vm11, %v1433_v30, %v1430_v4 }
 0x218   : > { %2192 = vpow2.f32 %v1353_v21  ;;  %v1349_v56 = vmul.f32 1.442695, %v1325_v20  ;;  %v1328_v46 = vsub.f32 0.0, %v1312_v27  ;;  %v1310_v10 = vand.u32 2147483647, %v3140_v33  ;;  %2004 = vmatmul.mubr.bf16.vlgmr.msra.gmra.mxu1 %v1561_v63 }
 0x219   : > { %v1514_v48 = vadd.f32 %v1418_v19, %v1258_v47  ;;  %v1515_v40 = vadd.f32 %v1427_v61, %v1259_v36  ;;  %v1516_v9 = vadd.f32 %v1436_v7, %v1260_v15  ;;  %v1529_v37 = vsel %vm1273_vm12, %v3000_v11, %v1513_v22 }
 0x21a   : > { %2194 = vpow2.f32 %v1349_v56  ;;  %v1355_v8 = vmul.f32 1.442695, %v1328_v46  ;;  %v1326_v26 = vsub.f32 0.0, %v1310_v10  ;;  %v1261_v51 = vmax.f32 %v3118_v17, 0.0 }
 0x21b   : > { %v1530_v32 = vsel %vm1274_vm13, %v3009_v60, %v1514_v48  ;;  %v1532_v13 = vsel %vm1276_vm14, %v3006_v53, %v1516_v9  ;;  %v1531_v15 = vsel %vm1275_vm15, %v2993_v62, %v1515_v40  ;;  %v1262_v63 = vmax.f32 %v3140_v33, 0.0 }
 0x21c   : > { %2196 = vpow2.f32 %v1355_v8  ;;  %v1351_v36 = vmul.f32 1.442695, %v1326_v26  ;;  %v1562_v2 = vpack.c.bf16 %v1530_v32, %v1529_v37  ;;  %v1563_v18 = vpack.c.bf16 %v1532_v13, %v1531_v15 }
 0x21d   : > { %v1264_v28 = vmax.f32 %v3133_v55, 0.0  ;;  %vm1277_vm1 = vcmp.ne.f32.partialorder %v3118_v17, %v3118_v17  ;;  %vm1278_vm5 = vcmp.ne.f32.partialorder %v3140_v33, %v3140_v33  ;;  %vm1280_vm6 = vcmp.ne.f32.partialorder %v3133_v55, %v3133_v55 }
 0x21e   : > { %2198 = vpow2.f32 %v1351_v36  ;;  %2007 = vmatprep.mubr.bf16.mxu1 %v1562_v2  ;;  %vm1279_vm7 = vcmp.ne.f32.partialorder %v3098_v52, %v3098_v52 }
 0x220   : > { %2008 = vmatmul.mubr.bf16.gmra.mxu1 %v1563_v18 }
 0x225   : > { %v2193_v44 = vpop.eup %2192 }
 0x226   : > { %v1455_v30 = vadd.f32 1.0, %v2193_v44  ;;  %v1458_v58 = vmul.f32 -0.5, %v2193_v44  ;;  %v1461_v62 = vand.u32 2147483647, %v2193_v44 }
 0x227   : > { %v2195_v43 = vpop.eup %2194 }
 0x228   : > { %v1437_v11 = vadd.f32 1.0, %v2195_v43  ;;  %2200 = vlog2.f32 %v1455_v30  ;;  %v1440_v42 = vmul.f32 -0.5, %v2195_v43  ;;  %v1443_v39 = vand.u32 2147483647, %v2195_v43 }
 0x229   : > { %v2197_v38 = vpop.eup %2196  ;;  %v1459_v59 = vadd.f32 1.0, %v1458_v58  ;;  %vm3171_vm0 = vcmp.lt.f32.partialorder %v1461_v62, 0.0004427343 }
 0x22a   : > { %2202 = vlog2.f32 %v1437_v11  ;;  %v1464_v53 = vadd.f32 1.0, %v2197_v38  ;;  %v1467_v35 = vmul.f32 -0.5, %v2197_v38  ;;  %v1441_v41 = vadd.f32 1.0, %v1440_v42 }
 0x22b   : > { %v2199_v60 = vpop.eup %2198  ;;  %v1470_v61 = vand.u32 2147483647, %v2197_v38  ;;  %vm3179_vm2 = vcmp.lt.f32.partialorder %v1443_v39, 0.0004427343  ;;  %v1460_v22 = vmul.f32 %v2193_v44, %v1459_v59 }
 0x22c   : > { %v1446_v45 = vadd.f32 1.0, %v2199_v60  ;;  %2204 = vlog2.f32 %v1464_v53  ;;  %v1449_v1 = vmul.f32 -0.5, %v2199_v60  ;;  %v1468_v29 = vadd.f32 1.0, %v1467_v35 }
 0x22d   : > { %v1442_v49 = vmul.f32 %v2195_v43, %v1441_v41  ;;  %v1452_v4 = vand.u32 2147483647, %v2199_v60  ;;  %vm3185_vm3 = vcmp.lt.f32.partialorder %v1470_v61, 0.0004427343  ;;  %v1263_v53 = vmax.f32 %v3098_v52, 0.0 }
 0x22e   : > { %2206 = vlog2.f32 %v1446_v45  ;;  %v1450_v31 = vadd.f32 1.0, %v1449_v1  ;;  %v1469_v48 = vmul.f32 %v2197_v38, %v1468_v29 }
 0x22f   : > { %vm3194_vm4 = vcmp.lt.f32.partialorder %v1452_v4, 0.0004427343 }
 0x230   : > { %v1451_v13 = vmul.f32 %v2199_v60, %v1450_v31 }
 0x235   : > { %v2201_v34 = vpop.eup %2200 }
 0x236   : > { %v1457_v21 = vmul.f32 0.6931472, %v2201_v34 }
 0x237   : > { %v2203_v23 = vpop.eup %2202  ;;  %v1985_v12 = vpop.f32.mrf.mxu0 }
 0x238   : > { %v1195_v57 = vadd.f32 %v1985_v12, %v2957_v16  ;;  %v1439_v3 = vmul.f32 0.6931472, %v2203_v23  ;;  %v1463_v2 = vsel %vm3171_vm0, %v1460_v22, %v1457_v21  ;;  %vm1769_vm0 = vcmask 31744  }
 0x239   : > { %v1186_v24 = vpop.f32.mrf.mxu0  ;;  %v2205_v20 = vpop.eup %2204 }
 0x23a   : > { %v1231_v27 = vmul.f32 %v2960_v5, %v1195_v57  ;;  %v1187_v47 = vadd.f32 %v1186_v24, %v2957_v16  ;;  %v1445_v46 = vsel %vm3179_vm2, %v1442_v49, %v1439_v3  ;;  %v1466_v10 = vmul.f32 0.6931472, %v2205_v20 }
 0x23b   : > { %v2207_v7 = vpop.eup %2206  ;;  %v1986_v56 = vpop.f32.mrf.mxu0  ;;  %v1517_v38 = vadd.f32 %v1445_v46, %v1261_v51 }
 0x23c   : > { %v3190_v9 = vadd.f32 %v2964_v14, %v1231_v27  ;;  %v1229_v8 = vmul.f32 %v2960_v5, %v1187_v47  ;;  %v1198_v26 = vadd.f32 %v1986_v56, %v2957_v16  ;;  %v1448_v37 = vmul.f32 0.6931472, %v2207_v7 }
 0x23d   : > { %v1189_v32 = vpop.f32.mrf.mxu0  ;;  %v1472_v15 = vsel %vm3185_vm3, %v1469_v48, %v1466_v10 }
 0x23e   : > { %v1315_v18 = vand.u32 2147483647, %v3190_v9  ;;  %v3204_v44 = vadd.f32 %v2964_v14, %v1229_v8  ;;  %v1232_v30 = vmul.f32 %v2960_v5, %v1198_v26  ;;  %v1190_v43 = vadd.f32 %v1189_v32, %v2957_v16 }
 0x23f   : > { %v1454_v11 = vsel %vm3194_vm4, %v1451_v13, %v1448_v37  ;;  %v1520_v60 = vadd.f32 %v1472_v15, %v1264_v28  ;;  %v1519_v16 = vadd.f32 %v1463_v2, %v1263_v53  ;;  %vm1283_vm15 = vcmp.ne.f32.partialorder %v3190_v9, %v3190_v9 }
 0x240   : > { %v1331_v45 = vsub.f32 0.0, %v1315_v18  ;;  %v1313_v42 = vand.u32 2147483647, %v3204_v44  ;;  %v3213_v58 = vadd.f32 %v2964_v14, %v1232_v30  ;;  %v1230_v35 = vmul.f32 %v2960_v5, %v1190_v43 }
 0x241   : > { %v1518_v62 = vadd.f32 %v1454_v11, %v1262_v63  ;;  %v1533_v5 = vsel %vm1277_vm1, %v3118_v17, %v1517_v38  ;;  %v1536_v23 = vsel %vm1280_vm6, %v3133_v55, %v1520_v60  ;;  %v1267_v18 = vmax.f32 %v3190_v9, 0.0 }
 0x242   : > { %v1361_v41 = vmul.f32 1.442695, %v1331_v45  ;;  %v1329_v1 = vsub.f32 0.0, %v1313_v42  ;;  %v1316_v34 = vand.u32 2147483647, %v3213_v58  ;;  %v3222_v39 = vadd.f32 %v2964_v14, %v1230_v35 }
 0x243   : > { %v1534_v59 = vsel %vm1278_vm5, %v3140_v33, %v1518_v62  ;;  %v1535_v14 = vsel %vm1279_vm7, %v3098_v52, %v1519_v16  ;;  %v1265_v43 = vmax.f32 %v3204_v44, 0.0  ;;  %v1268_v42 = vmax.f32 %v3213_v58, 0.0 }
 0x244   : > { %2208 = vpow2.f32 %v1361_v41  ;;  %v1357_v12 = vmul.f32 1.442695, %v1329_v1  ;;  %v1332_v51 = vsub.f32 0.0, %v1316_v34  ;;  %v1314_v63 = vand.u32 2147483647, %v3222_v39 }
 0x245   : > { %v1564_v29 = vpack.c.bf16 %v1534_v59, %v1533_v5  ;;  %v1565_v3 = vpack.c.bf16 %v1536_v23, %v1535_v14  ;;  %v1266_v35 = vmax.f32 %v3222_v39, 0.0  ;;  %vm1284_vm12 = vcmp.ne.f32.partialorder %v3213_v58, %v3213_v58  ;;  %v1893_v14 = vld [vmem:[%s3369_s4 + $0x10] sm:$0xff] }
 0x246   : > { %2210 = vpow2.f32 %v1357_v12  ;;  %v1363_v61 = vmul.f32 1.442695, %v1332_v51  ;;  %v1330_v57 = vsub.f32 0.0, %v1314_v63  ;;  %vm1281_vm13 = vcmp.ne.f32.partialorder %v3204_v44, %v3204_v44 }
 0x247   : > { %2011 = vmatprep.mubr.bf16.mxu1 %v1564_v29  ;;  %vm1282_vm14 = vcmp.ne.f32.partialorder %v3222_v39, %v3222_v39 }
 0x248   : > { %2212 = vpow2.f32 %v1363_v61  ;;  %v1359_v17 = vmul.f32 1.442695, %v1330_v57  ;;  %2012 = vmatmul.mubr.bf16.gmra.mxu1 %v1565_v3  ;;  %v1717_v61 = vmul.f32 %v1893_v14, %v2409_v25 }
 0x24a   : > { %2214 = vpow2.f32 %v1359_v17 }
 0x251   : > { %v2209_v33 = vpop.eup %2208 }
 0x252   : > { %v1491_v28 = vadd.f32 1.0, %v2209_v33  ;;  %v1494_v21 = vmul.f32 -0.5, %v2209_v33  ;;  %v1497_v56 = vand.u32 2147483647, %v2209_v33 }
 0x253   : > { %v2211_v55 = vpop.eup %2210 }
 0x254   : > { %v1473_v6 = vadd.f32 1.0, %v2211_v55  ;;  %2216 = vlog2.f32 %v1491_v28  ;;  %v1476_v52 = vmul.f32 -0.5, %v2211_v55  ;;  %v1479_v22 = vand.u32 2147483647, %v2211_v55 }
 0x255   : > { %v2213_v24 = vpop.eup %2212  ;;  %v1495_v7 = vadd.f32 1.0, %v1494_v21  ;;  %vm1498_vm9 = vcmp.lt.f32.partialorder %v1497_v56, 0.0004427343 }
 0x256   : > { %2218 = vlog2.f32 %v1473_v6  ;;  %v1500_v49 = vadd.f32 1.0, %v2213_v24  ;;  %v1503_v20 = vmul.f32 -0.5, %v2213_v24  ;;  %v1477_v27 = vadd.f32 1.0, %v1476_v52 }
 0x257   : > { %v2215_v31 = vpop.eup %2214  ;;  %v1506_v37 = vand.u32 2147483647, %v2213_v24  ;;  %vm3234_vm8 = vcmp.lt.f32.partialorder %v1479_v22, 0.0004427343  ;;  %v1496_v36 = vmul.f32 %v2209_v33, %v1495_v7 }
 0x258   : > { %v1482_v4 = vadd.f32 1.0, %v2215_v31  ;;  %2220 = vlog2.f32 %v1500_v49  ;;  %v1485_v47 = vmul.f32 -0.5, %v2215_v31  ;;  %v1504_v48 = vadd.f32 1.0, %v1503_v20 }
 0x259   : > { %v1478_v8 = vmul.f32 %v2211_v55, %v1477_v27  ;;  %v1488_v13 = vand.u32 2147483647, %v2215_v31  ;;  %vm1507_vm10 = vcmp.lt.f32.partialorder %v1506_v37, 0.0004427343 }
 0x25a   : > { %2222 = vlog2.f32 %v1482_v4  ;;  %v1486_v26 = vadd.f32 1.0, %v1485_v47  ;;  %v1505_v53 = vmul.f32 %v2213_v24, %v1504_v48 }
 0x25b   : > { %vm1489_vm11 = vcmp.lt.f32.partialorder %v1488_v13, 0.0004427343 }
 0x25c   : > { %v1487_v45 = vmul.f32 %v2215_v31, %v1486_v26 }
 0x261   : > { %v2217_v19 = vpop.eup %2216 }
 0x262   : > { %v1493_v10 = vmul.f32 0.6931472, %v2217_v19 }
 0x263   : > { %v2219_v46 = vpop.eup %2218 }
 0x264   : > { %v1475_v40 = vmul.f32 0.6931472, %v2219_v46  ;;  %v1499_v11 = vsel %vm1498_vm9, %v1496_v36, %v1493_v10 }
 0x265   : > { %v2221_v2 = vpop.eup %2220  ;;  %v1523_v1 = vadd.f32 %v1499_v11, %v1267_v18 }
 0x266   : > { %v1481_v15 = vsel %vm3234_vm8, %v1478_v8, %v1475_v40  ;;  %v1502_v38 = vmul.f32 0.6931472, %v2221_v2 }
 0x267   : > { %v2223_v30 = vpop.eup %2222  ;;  %v1521_v62 = vadd.f32 %v1481_v15, %v1265_v43  ;;  %v1539_v63 = vsel %vm1283_vm15, %v3190_v9, %v1523_v1  ;;  %v3261_v9 = vrot.slane %v1893_v14, %v2449_v50 }
 0x268   : > { %v1484_v60 = vmul.f32 0.6931472, %v2223_v30  ;;  %v1508_v16 = vsel %vm1507_vm10, %v1505_v53, %v1502_v38 }
 0x269   : > { %v1524_v34 = vadd.f32 %v1508_v16, %v1268_v42  ;;  %v1537_v23 = vsel %vm1281_vm13, %v3204_v44, %v1521_v62 }
 0x26a   : > { %v1490_v41 = vsel %vm1489_vm11, %v1487_v45, %v1484_v60 }
 0x26b   : > { %v1522_v5 = vadd.f32 %v1490_v41, %v1266_v35  ;;  %v1540_v59 = vsel %vm1284_vm12, %v3213_v58, %v1524_v34  ;;  %v1719_v58 = vrot.slane %v1893_v14, 1 }
 0x26c   : > { %v1567_v29 = vpack.c.bf16 %v1540_v59, %v1539_v63 }
 0x26d   : > { %v1538_v12 = vsel %vm1282_vm14, %v3222_v39, %v1522_v5  ;;  %v1721_v57 = vadd.f32 %v1719_v58, %v1717_v61 }
 0x26e   : > { %v1566_v51 = vpack.c.bf16 %v1538_v12, %v1537_v23 }
 0x26f   : > { %v1918_v44 = vmul.f32 -1.442695, %v1721_v57 }
 0x270   : > { %2015 = vmatprep.mubr.bf16.mxu1 %v1566_v51 }
 0x271   : > { %2016 = vmatmul.mubr.bf16.gmra.mxu1 %v1567_v29  ;;  %2224 = vpow2.f32 %v1918_v44 }
 0x27e   : > { %v2225_v39 = vpop.eup %2224 }
 0x27f   : > { %v1725_v3 = vadd.f32 1.0, %v2225_v39 }
 0x281   : > { %2226 = vrcp.f32 %v1725_v3 }
 0x282   : > { %2228 = vtanh.f32 %v1717_v61 }
 0x28e   : > { %v2227_v17 = vpop.eup %2226 }
 0x28f   : > { %v2229_v33 = vpop.eup %2228  ;;  %v3264_v28 = vrot.slane %v2227_v17, %v2456_v54 }
 0x290   : > { %v3268_v6 = vrot.slane %v2229_v33, %v2476_v0 }
 0x2d8   : > { %v2005_v55 = vpop.f32.mrf.mxu1 }
 0x2d9   : > { %v1663_v25 = vadd.f32 %v2005_v55, %v3261_v9 }
 0x2da   : > { %v1654_v24 = vpop.f32.mrf.mxu1 }
 0x2db   : > { %v1735_v49 = vmul.f32 %v3264_v28, %v1663_v25  ;;  %v1655_v31 = vadd.f32 %v1654_v24, %v3261_v9 }
 0x2dc   : > { %v2006_v50 = vpop.f32.mrf.mxu1 }
 0x2dd   : > { %v1755_v54 = vadd.f32 %v3268_v6, %v1735_v49  ;;  %v1733_v0 = vmul.f32 %v3264_v28, %v1655_v31  ;;  %v1666_v4 = vadd.f32 %v2006_v50, %v3261_v9 }
 0x2de   : > { %v1657_v52 = vpop.f32.mrf.mxu1 }
 0x2df   : > { %1772 = vst.msk [vmem:[%s3277_s7 + $0x10] sm:$0xff] %vm1769_vm0, %v1755_v54  ;;  %v1753_v21 = vadd.f32 %v3268_v6, %v1733_v0  ;;  %v1736_v20 = vmul.f32 %v3264_v28, %v1666_v4  ;;  %v1658_v27 = vadd.f32 %v1657_v52, %v3261_v9 }
 0x2e0   : > { %v2009_v47 = vpop.f32.mrf.mxu1 }
 0x2e1   : > { %1770 = vst.msk [vmem:[%s3277_s7] sm:$0xff] %vm1769_vm0, %v1753_v21  ;;  %v1756_v19 = vadd.f32 %v3268_v6, %v1736_v20  ;;  %v1734_v22 = vmul.f32 %v3264_v28, %v1658_v27  ;;  %v1679_v7 = vadd.f32 %v2009_v47, %v3261_v9 }
 0x2e2   : > { %v1670_v56 = vpop.f32.mrf.mxu1 }
 0x2e3   : > { %1773 = vst.msk [vmem:[%s3277_s7 + $0x18] sm:$0xff] %vm1769_vm0, %v1756_v19  ;;  %v1754_v46 = vadd.f32 %v3268_v6, %v1734_v22  ;;  %v1739_v10 = vmul.f32 %v3264_v28, %v1679_v7  ;;  %v1671_v48 = vadd.f32 %v1670_v56, %v3261_v9 }
 0x2e4   : > { %v2010_v40 = vpop.f32.mrf.mxu1 }
 0x2e5   : > { %1771 = vst.msk [vmem:[%s3277_s7 + $0x8] sm:$0xff] %vm1769_vm0, %v1754_v46  ;;  %v1759_v8 = vadd.f32 %v3268_v6, %v1739_v10  ;;  %v1737_v26 = vmul.f32 %v3264_v28, %v1671_v48  ;;  %v1682_v37 = vadd.f32 %v2010_v40, %v3261_v9 }
 0x2e6   : > { %v1673_v32 = vpop.f32.mrf.mxu1 }
 0x2e7   : > { %1776 = vst.msk [vmem:[%s3277_s7 + $0x30] sm:$0xff] %vm1769_vm0, %v1759_v8  ;;  %v1757_v13 = vadd.f32 %v3268_v6, %v1737_v26  ;;  %v1740_v36 = vmul.f32 %v3264_v28, %v1682_v37  ;;  %v1674_v2 = vadd.f32 %v1673_v32, %v3261_v9 }
 0x2e9   : > { %1774 = vst.msk [vmem:[%s3277_s7 + $0x20] sm:$0xff] %vm1769_vm0, %v1757_v13  ;;  %v1760_v15 = vadd.f32 %v3268_v6, %v1740_v36  ;;  %v1738_v18 = vmul.f32 %v3264_v28, %v1674_v2 }
 0x2eb   : > { %1777 = vst.msk [vmem:[%s3277_s7 + $0x38] sm:$0xff] %vm1769_vm0, %v1760_v15  ;;  %v1758_v30 = vadd.f32 %v3268_v6, %v1738_v18 }
 0x2ed   : > { %1775 = vst.msk [vmem:[%s3277_s7 + $0x28] sm:$0xff] %vm1769_vm0, %v1758_v30 }
 0x308   : > { %v2013_v43 = vpop.f32.mrf.mxu1 }
 0x309   : > { %v1695_v11 = vadd.f32 %v2013_v43, %v3261_v9 }
 0x30a   : > { %v1686_v38 = vpop.f32.mrf.mxu1 }
 0x30b   : > { %v1743_v53 = vmul.f32 %v3264_v28, %v1695_v11  ;;  %v1687_v60 = vadd.f32 %v1686_v38, %v3261_v9 }
 0x30c   : > { %v2014_v45 = vpop.f32.mrf.mxu1 }
 0x30d   : > { %v1763_v42 = vadd.f32 %v3268_v6, %v1743_v53  ;;  %v1741_v35 = vmul.f32 %v3264_v28, %v1687_v60  ;;  %v1698_v62 = vadd.f32 %v2014_v45, %v3261_v9 }
 0x30e   : > { %v1689_v16 = vpop.f32.mrf.mxu1 }
 0x30f   : > { %1780 = vst.msk [vmem:[%s3277_s7 + $0x50] sm:$0xff] %vm1769_vm0, %v1763_v42  ;;  %v1761_v41 = vadd.f32 %v3268_v6, %v1741_v35  ;;  %v1744_v1 = vmul.f32 %v3264_v28, %v1698_v62  ;;  %v1690_v34 = vadd.f32 %v1689_v16, %v3261_v9 }
 0x311   : > { %1778 = vst.msk [vmem:[%s3277_s7 + $0x40] sm:$0xff] %vm1769_vm0, %v1761_v41  ;;  %v1764_v5 = vadd.f32 %v3268_v6, %v1744_v1  ;;  %v1742_v59 = vmul.f32 %v3264_v28, %v1690_v34 }
 0x313   : > { %1781 = vst.msk [vmem:[%s3277_s7 + $0x58] sm:$0xff] %vm1769_vm0, %v1764_v5  ;;  %v1762_v23 = vadd.f32 %v3268_v6, %v1742_v59 }
 0x315   : > { %1779 = vst.msk [vmem:[%s3277_s7 + $0x48] sm:$0xff] %vm1769_vm0, %v1762_v23 }
 0x331   : > { %v2017_v12 = vpop.f32.mrf.mxu1 }
 0x332   : > { %v1711_v51 = vadd.f32 %v2017_v12, %v3261_v9 }
 0x333   : > { %v1702_v63 = vpop.f32.mrf.mxu1 }
 0x334   : > { %v1747_v29 = vmul.f32 %v3264_v28, %v1711_v51  ;;  %v1703_v14 = vadd.f32 %v1702_v63, %v3261_v9 }
 0x335   : > { %v2018_v61 = vpop.f32.mrf.mxu1 }
 0x336   : > { %v1767_v58 = vadd.f32 %v3268_v6, %v1747_v29  ;;  %v1745_v57 = vmul.f32 %v3264_v28, %v1703_v14  ;;  %v1714_v44 = vadd.f32 %v2018_v61, %v3261_v9 }
 0x337   : > { %v1705_v39 = vpop.f32.mrf.mxu1 }
 0x338   : > { %1784 = vst.msk [vmem:[%s3277_s7 + $0x70] sm:$0xff] %vm1769_vm0, %v1767_v58  ;;  %v1765_v3 = vadd.f32 %v3268_v6, %v1745_v57  ;;  %v1748_v17 = vmul.f32 %v3264_v28, %v1714_v44  ;;  %v1706_v33 = vadd.f32 %v1705_v39, %v3261_v9 }
 0x33a   : > { %1782 = vst.msk [vmem:[%s3277_s7 + $0x60] sm:$0xff] %vm1769_vm0, %v1765_v3  ;;  %v1768_v55 = vadd.f32 %v3268_v6, %v1748_v17  ;;  %v1746_v25 = vmul.f32 %v3264_v28, %v1706_v33 }
 0x33c   : > { %1785 = vst.msk [vmem:[%s3277_s7 + $0x78] sm:$0xff] %vm1769_vm0, %v1768_v55  ;;  %v1766_v24 = vadd.f32 %v3268_v6, %v1746_v25 }
 0x33e   : > { %1783 = vst.msk [vmem:[%s3277_s7 + $0x68] sm:$0xff] %vm1769_vm0, %v1766_v24 }
 0x33f PF: > { %s21_s25 = sadd.s32 1, %s2266_s25   ;;  %s3419_s23 = smov %s2262_s24 }
 0x340   : > { %p18_p10 = scmp.ge.s32.totalorder %s21_s25, 4   ;;  %s3420_s24 = smov %s3422_s0 }
 0x342   :  { %20 = sbr.rel (!%p18_p10) target bundleno = 17 (0x11), region = 69 }

</bundles_post_ra>
